<compile_context>
chip_gen: v7x
topology: tpu7x:2x2x1
jax: 0.10.0
libtpu: 0.0.40
codegen_flags: <defaults>
</compile_context>

<pallas_src>
import functools
import itertools

import numpy as np
import jax
import jax.numpy as jnp
from jax import lax
from jax.experimental import pallas as pl
from jax.experimental.pallas import tpu as pltpu


_PRECISION = lax.Precision.HIGHEST   # pin MXU pass count (chained products)


def _mm(a, b):
    return jnp.dot(a, b, precision=_PRECISION, preferred_element_type=jnp.float32)


# ----------------------------------------------------------------------------
# Layer construction helpers (plain Python/NumPy "parameter setup" glue).
# TODO(synk): the exact gate schedule of QCNN_RBS_based_VQC was not provided;
# this is a deterministic reconstruction (pyramidal K-qubit filter, stride-1
# translation with shared parameters, applied to both registers) matching the
# declared parameter count int(K*(K-1)) and the (q, q+1) nearest-neighbour RBS
# structure used by the module.
# ----------------------------------------------------------------------------
def qcnn_rbs_based_vqc(I, K):
    """Returns (None, Param_dictionary, RBS_dictionary) like the original helper."""
    pyramid = []
    p = 0
    for col in range(K - 1):
        for a in range(K - 1 - col):
            pyramid.append((a, p))
            p += 1
    n_filter_params = K * (K - 1) // 2

    RBS_dictionary, Param_dictionary = {}, {}
    gidx = 0
    for reg in range(2):                      # row register, then column register
        for pos in range(I - K + 1):          # sliding window, shared parameters
            for (a, pp) in pyramid:
                RBS_dictionary[gidx] = reg * I + pos + a
                Param_dictionary[gidx] = reg * n_filter_params + pp
                gidx += 1
    return None, Param_dictionary, RBS_dictionary


def rbs_unitaries(n_qubits, k, list_gates):
    """For each gate (i, i+1) build (A0, A1, A2) on the Hamming-weight-k basis so
    that U(theta) = A0*cos(theta) + A1*sin(theta) + A2."""
    basis = list(itertools.combinations(range(n_qubits), k))  # lexicographic order
    index = {b: i for i, b in enumerate(basis)}
    D = len(basis)
    out = {}
    for gate in set(list_gates):
        i, j = gate
        A0 = np.zeros((D, D), np.float32)   # cos part (exchanged subspace diagonal)
        A1 = np.zeros((D, D), np.float32)   # sin part (antisymmetric coupling)
        A2 = np.zeros((D, D), np.float32)   # untouched subspace (identity)
        for b in basis:
            bi, bj = (i in b), (j in b)
            idx = index[b]
            if bi == bj:
                A2[idx, idx] = 1.0
            else:
                A0[idx, idx] = 1.0
                if bi:   # |1_i 0_j>  ->  cos|10> + sin|01>
                    b2 = tuple(sorted((set(b) - {i}) | {j}))
                    A1[idx, index[b2]] = 1.0
                else:    # |0_i 1_j>  -> -sin|10> + cos|01>
                    b2 = tuple(sorted((set(b) - {j}) | {i}))
                    A1[idx, index[b2]] = -1.0
        out[gate] = (A0, A1, A2)
    return out, D


# ----------------------------------------------------------------------------
# Pallas kernel
# ----------------------------------------------------------------------------
def _tree_compose(mats):
    """Ordered product mats[-1] @ ... @ mats[0] via a balanced pairwise tree.

    Fully unrolled at trace time: every level is a set of independent MXU
    products, so the MXU is throughput- rather than latency-bound."""
    while len(mats) > 1:
        nxt = [_mm(hi, lo) for lo, hi in zip(mats[0::2], mats[1::2])]
        if len(mats) % 2:
            nxt.append(mats[-1])
        mats = nxt
    return mats[0]


def _conv_rbs_kernel(u_slab_ref, rho_ref, out_ref, u_full_ref, *, num_chunks):
    c = pl.program_id(0)
    n_gates, Rp, Dp = u_slab_ref.shape

    row = lax.broadcasted_iota(jnp.int32, (Dp, Dp), 0)
    col = lax.broadcasted_iota(jnp.int32, (Dp, Dp), 1)
    eye = (row == col).astype(jnp.float32)

    @pl.when(c == 0)
    def _():
        # One-time: fill the expanded-gate scratch with per-gate identities.
        # Rows >= Rp are never written again, so they stay identity for every
        # chunk; rows < Rp are overwritten by the slab splat below.
        for g in range(n_gates):
            u_full_ref[g] = eye

    # Splat the compact (Rp, Dp) slabs into the identity-padded full matrices
    # (identity rows D..Rp-1 are already baked into the slabs by the wrapper).
    u_full_ref[:, 0:Rp, :] = u_slab_ref[...]

    # Compose this chunk's gates:  P_c = U_{last} @ ... @ U_{first}.
    p_chunk = _tree_compose([u_full_ref[g] for g in range(n_gates)])

    if num_chunks == 1:
        # Single chunk: no cross-chunk carry, apply the sandwich directly.
        w = p_chunk                                     # W = U_{G-1} ... U_0
        tmp = _mm(w, rho_ref[...])                      # W @ rho
        out_ref[...] = lax.dot_general(                 # (W rho) @ W^T
            tmp, w, (((1,), (1,)), ((), ())),
            precision=_PRECISION, preferred_element_type=jnp.float32)
    else:
        @pl.when(c == 0)
        def _():
            out_ref[...] = eye          # cross-chunk carry starts at identity

        # Fold this chunk into the carry (one matmul + one store per chunk,
        # instead of per gate).
        w = _mm(p_chunk, out_ref[...])

        @pl.when(c < num_chunks - 1)
        def _():
            out_ref[...] = w

        @pl.when(c == num_chunks - 1)
        def _():
            tmp = _mm(w, rho_ref[...])
            out_ref[...] = lax.dot_general(
                tmp, w, (((1,), (1,)), ((), ())),
                precision=_PRECISION, preferred_element_type=jnp.float32)


def _vmem_capacity_bytes():
    try:
        return int(pltpu.get_tpu_info().vmem_capacity_bytes)
    except Exception:
        return 64 << 20            # assume the smallest part (v7x) if unknown


def conv_rbs_density_forward(rho, thetas, A0, A1, A2):
    """Forward of Conv_RBS_density: rho <- U_{G-1}...U_0 rho U_0^T...U_{G-1}^T."""
    G, D, _ = A0.shape
    rho = rho.astype(jnp.float32)
    if G == 0:
        return rho

    # Per-gate unitaries built once in the wrapper (VPU-trivial, done by XLA).
    cos_t = jnp.cos(thetas).astype(jnp.float32)[:, None, None]
    sin_t = jnp.sin(thetas).astype(jnp.float32)[:, None, None]
    U = (A0.astype(jnp.float32) * cos_t
         + A1.astype(jnp.float32) * sin_t
         + A2.astype(jnp.float32))                                  # (G, D, D)

    # Compact slab representation: rows padded to a multiple of 8 (Rp), lanes
    # to a multiple of 128 (Dp).  Rows D..Rp-1 carry identity rows so the
    # kernel splat yields block_diag(U_g, I) exactly.
    Rp = -(-D // 8) * 8
    Dp = max(128, -(-D // 128) * 128)
    eye_slab = jnp.eye(Rp, Dp, dtype=jnp.float32)
    U_slab = jnp.tile(eye_slab[None], (G, 1, 1)).at[:, :D, :D].set(U)   # (G,Rp,Dp)
    rho_pad = jnp.zeros((Dp, Dp), jnp.float32).at[:D, :D].set(rho)

    # Generation-aware chunking of the gate axis.  Per-gate VMEM cost:
    # expanded-gate scratch + double-buffered compact slab + tree temporaries.
    cap = _vmem_capacity_bytes()
    budget = min(12 << 20, cap // 6)
    per_gate = Dp * Dp * 4 + 2 * Rp * Dp * 4 + (Dp * Dp * 4) // 2
    Gc = int(max(1, min(G, budget // per_gate, 64)))
    num_chunks = -(-G // Gc)
    G_padded = num_chunks * Gc
    if G_padded != G:     # pad trailing gates with identity slabs (no-op gates)
        U_slab = jnp.concatenate(
            [U_slab, jnp.tile(eye_slab[None], (G_padded - G, 1, 1))], axis=0)

    # Note: with num_chunks == 1 the second pipeline buffer for U_slab buys no
    # overlap, but it is already accounted for in `per_gate`, so we stay inside
    # the budget without depending on pl.Buffered(1) support.
    vmem_limit = int(max(32 << 20, min(int(cap * 0.8), 100 << 20)))

    out = pl.pallas_call(
        functools.partial(_conv_rbs_kernel, num_chunks=num_chunks),
        out_shape=jax.ShapeDtypeStruct((Dp, Dp), jnp.float32),
        grid_spec=pltpu.PrefetchScalarGridSpec(
            num_scalar_prefetch=0,
            grid=(num_chunks,),
            in_specs=[
                pl.BlockSpec((Gc, Rp, Dp), lambda c: (c, 0, 0)),   # compact U slabs
                pl.BlockSpec((Dp, Dp), lambda c: (0, 0)),          # rho (resident)
            ],
            out_specs=pl.BlockSpec((Dp, Dp), lambda c: (0, 0)),    # resident carry
            scratch_shapes=[pltpu.VMEM((Gc, Dp, Dp), jnp.float32)],
        ),
        compiler_params=pltpu.CompilerParams(
            dimension_semantics=("arbitrary",),     # axis carries the composition
            vmem_limit_bytes=vmem_limit),
    )(U_slab, rho_pad)

    return out[:D, :D]


# ----------------------------------------------------------------------------
# Driver
# ----------------------------------------------------------------------------
if __name__ == "__main__":
    I, K = 4, 2                          # small image / filter sizes
    n_qubits = 2 * I

    _, Param_dictionary, RBS_dictionary = qcnn_rbs_based_vqc(I, K)
    list_gates = [(RBS_dictionary[g], RBS_dictionary[g] + 1)
                  for g in range(len(RBS_dictionary))]
    unitaries, D = rbs_unitaries(n_qubits, 2, list_gates)
    G = len(list_gates)
    n_params = int(K * (K - 1))

    # Deterministic "torch.rand" parameter init.
    key = jax.random.PRNGKey(0)
    k_param, k_rho = jax.random.split(key)
    params = jax.random.uniform(k_param, (n_params,), dtype=jnp.float32)
    thetas = jnp.array([params[Param_dictionary[g]] for g in range(G)],
                       dtype=jnp.float32)

    A0 = jnp.asarray(np.stack([unitaries[t][0] for t in list_gates]))
    A1 = jnp.asarray(np.stack([unitaries[t][1] for t in list_gates]))
    A2 = jnp.asarray(np.stack([unitaries[t][2] for t in list_gates]))

    # Deterministic input density matrix (symmetric PSD, unit trace).
    M = jax.random.normal(k_rho, (D, D), dtype=jnp.float32)
    rho = M @ M.T
    rho = rho / jnp.trace(rho)

    out = jax.block_until_ready(
        conv_rbs_density_forward(rho, thetas, A0, A1, A2))

    # Pure NumPy reference of the PyTorch forward semantics (gate-by-gate).
    cos_ref = np.cos(np.asarray(thetas, np.float64))
    sin_ref = np.sin(np.asarray(thetas, np.float64))
    ref = np.asarray(rho, dtype=np.float64)
    for g in range(G):
        Ug = (np.asarray(A0[g], np.float64) * cos_ref[g]
              + np.asarray(A1[g], np.float64) * sin_ref[g]
              + np.asarray(A2[g], np.float64))
        ref = Ug @ ref @ Ug.T

    assert out.shape == (D, D) and out.dtype == jnp.float32
    np.testing.assert_allclose(np.asarray(out), ref, rtol=1e-4, atol=1e-5)
    print("KERNEL_OK")
</pallas_src>

<mosaic_0001>
module attributes {stable_mosaic.version = 11 : i64} {
  func.func @_conv_rbs_kernel(%arg0: i32, %arg1: memref<6x32x128xf32, #tpu.memory_space<vmem>>, %arg2: memref<128x128xf32, #tpu.memory_space<vmem>>, %arg3: memref<128x128xf32, #tpu.memory_space<vmem>>, %arg4: memref<6x128x128xf32, #tpu.memory_space<vmem>>) attributes {dimension_semantics = [#tpu.dimension_semantics<arbitrary>], iteration_bounds = array<i64: 1>, scalar_prefetch = 0 : i64, scratch_operands = 1 : i64, tpu.core_type = #tpu.core_type<tc>, window_params = [{transform_indices = @transform_0, window_bounds = array<i64: 6, 32, 128>}, {pipeline_mode = #tpu.pipeline_mode<synchronous>, transform_indices = @transform_1, window_bounds = array<i64: 128, 128>}, {pipeline_mode = #tpu.pipeline_mode<synchronous>, transform_indices = @transform_2, window_bounds = array<i64: 128, 128>}]} {
    %0 = tpu.iota {dimensions = array<i32: 0>} : vector<128x128xi32>
    %1 = tpu.iota {dimensions = array<i32: 1>} : vector<128x128xi32>
    %2 = arith.cmpi eq, %0, %1 : vector<128x128xi32>
    %3 = arith.extui %2 : vector<128x128xi1> to vector<128x128xi32>
    %4 = arith.sitofp %3 : vector<128x128xi32> to vector<128x128xf32>
    %c0_i32 = arith.constant 0 : i32
    %5 = arith.cmpi eq, %arg0, %c0_i32 : i32
    %6 = arith.extui %5 : i1 to i32
    %c0_i32_0 = arith.constant 0 : i32
    %7 = arith.cmpi ne, %6, %c0_i32_0 : i32
    scf.if %7 {
      %c0_29 = arith.constant 0 : index
      %c0_30 = arith.constant 0 : index
      %c0_31 = arith.constant 0 : index
      %31 = vector.load %arg4[%c0_29, %c0_30, %c0_31] : memref<6x128x128xf32, #tpu.memory_space<vmem>>, vector<1x128x128xf32>
      %32 = vector.shape_cast %31 : vector<1x128x128xf32> to vector<128x128xf32>
      %33 = vector.shape_cast %4 : vector<128x128xf32> to vector<1x128x128xf32>
      tpu.vector_store %arg4[%c0_29, %c0_30, %c0_31], %33 {strides = array<i32>} : memref<6x128x128xf32, #tpu.memory_space<vmem>>, vector<1x128x128xf32>,
      %c1_32 = arith.constant 1 : index
      %c0_33 = arith.constant 0 : index
      %c0_34 = arith.constant 0 : index
      %34 = vector.load %arg4[%c1_32, %c0_33, %c0_34] : memref<6x128x128xf32, #tpu.memory_space<vmem>>, vector<1x128x128xf32>
      %35 = vector.shape_cast %34 : vector<1x128x128xf32> to vector<128x128xf32>
      %36 = vector.shape_cast %4 : vector<128x128xf32> to vector<1x128x128xf32>
      tpu.vector_store %arg4[%c1_32, %c0_33, %c0_34], %36 {strides = array<i32>} : memref<6x128x128xf32, #tpu.memory_space<vmem>>, vector<1x128x128xf32>,
      %c2_35 = arith.constant 2 : index
      %c0_36 = arith.constant 0 : index
      %c0_37 = arith.constant 0 : index
      %37 = vector.load %arg4[%c2_35, %c0_36, %c0_37] : memref<6x128x128xf32, #tpu.memory_space<vmem>>, vector<1x128x128xf32>
      %38 = vector.shape_cast %37 : vector<1x128x128xf32> to vector<128x128xf32>
      %39 = vector.shape_cast %4 : vector<128x128xf32> to vector<1x128x128xf32>
      tpu.vector_store %arg4[%c2_35, %c0_36, %c0_37], %39 {strides = array<i32>} : memref<6x128x128xf32, #tpu.memory_space<vmem>>, vector<1x128x128xf32>,
      %c3_38 = arith.constant 3 : index
      %c0_39 = arith.constant 0 : index
      %c0_40 = arith.constant 0 : index
      %40 = vector.load %arg4[%c3_38, %c0_39, %c0_40] : memref<6x128x128xf32, #tpu.memory_space<vmem>>, vector<1x128x128xf32>
      %41 = vector.shape_cast %40 : vector<1x128x128xf32> to vector<128x128xf32>
      %42 = vector.shape_cast %4 : vector<128x128xf32> to vector<1x128x128xf32>
      tpu.vector_store %arg4[%c3_38, %c0_39, %c0_40], %42 {strides = array<i32>} : memref<6x128x128xf32, #tpu.memory_space<vmem>>, vector<1x128x128xf32>,
      %c4_41 = arith.constant 4 : index
      %c0_42 = arith.constant 0 : index
      %c0_43 = arith.constant 0 : index
      %43 = vector.load %arg4[%c4_41, %c0_42, %c0_43] : memref<6x128x128xf32, #tpu.memory_space<vmem>>, vector<1x128x128xf32>
      %44 = vector.shape_cast %43 : vector<1x128x128xf32> to vector<128x128xf32>
      %45 = vector.shape_cast %4 : vector<128x128xf32> to vector<1x128x128xf32>
      tpu.vector_store %arg4[%c4_41, %c0_42, %c0_43], %45 {strides = array<i32>} : memref<6x128x128xf32, #tpu.memory_space<vmem>>, vector<1x128x128xf32>,
      %c5_44 = arith.constant 5 : index
      %c0_45 = arith.constant 0 : index
      %c0_46 = arith.constant 0 : index
      %46 = vector.load %arg4[%c5_44, %c0_45, %c0_46] : memref<6x128x128xf32, #tpu.memory_space<vmem>>, vector<1x128x128xf32>
      %47 = vector.shape_cast %46 : vector<1x128x128xf32> to vector<128x128xf32>
      %48 = vector.shape_cast %4 : vector<128x128xf32> to vector<1x128x128xf32>
      tpu.vector_store %arg4[%c5_44, %c0_45, %c0_46], %48 {strides = array<i32>} : memref<6x128x128xf32, #tpu.memory_space<vmem>>, vector<1x128x128xf32>,
    } else {
    }
    %c0 = arith.constant 0 : index
    %c0_1 = arith.constant 0 : index
    %c0_2 = arith.constant 0 : index
    %8 = vector.load %arg1[%c0, %c0_1, %c0_2] : memref<6x32x128xf32, #tpu.memory_space<vmem>>, vector<6x32x128xf32>
    %c0_3 = arith.constant 0 : index
    %c0_4 = arith.constant 0 : index
    %c0_5 = arith.constant 0 : index
    %9 = vector.load %arg4[%c0_3, %c0_4, %c0_5] : memref<6x128x128xf32, #tpu.memory_space<vmem>>, vector<6x32x128xf32>
    tpu.vector_store %arg4[%c0_3, %c0_4, %c0_5], %8 {strides = array<i32>} : memref<6x128x128xf32, #tpu.memory_space<vmem>>, vector<6x32x128xf32>,
    %c0_6 = arith.constant 0 : index
    %c0_7 = arith.constant 0 : index
    %c0_8 = arith.constant 0 : index
    %10 = vector.load %arg4[%c0_6, %c0_7, %c0_8] : memref<6x128x128xf32, #tpu.memory_space<vmem>>, vector<1x128x128xf32>
    %11 = vector.shape_cast %10 : vector<1x128x128xf32> to vector<128x128xf32>
    %c1 = arith.constant 1 : index
    %c0_9 = arith.constant 0 : index
    %c0_10 = arith.constant 0 : index
    %12 = vector.load %arg4[%c1, %c0_9, %c0_10] : memref<6x128x128xf32, #tpu.memory_space<vmem>>, vector<1x128x128xf32>
    %13 = vector.shape_cast %12 : vector<1x128x128xf32> to vector<128x128xf32>
    %c2 = arith.constant 2 : index
    %c0_11 = arith.constant 0 : index
    %c0_12 = arith.constant 0 : index
    %14 = vector.load %arg4[%c2, %c0_11, %c0_12] : memref<6x128x128xf32, #tpu.memory_space<vmem>>, vector<1x128x128xf32>
    %15 = vector.shape_cast %14 : vector<1x128x128xf32> to vector<128x128xf32>
    %c3 = arith.constant 3 : index
    %c0_13 = arith.constant 0 : index
    %c0_14 = arith.constant 0 : index
    %16 = vector.load %arg4[%c3, %c0_13, %c0_14] : memref<6x128x128xf32, #tpu.memory_space<vmem>>, vector<1x128x128xf32>
    %17 = vector.shape_cast %16 : vector<1x128x128xf32> to vector<128x128xf32>
    %c4 = arith.constant 4 : index
    %c0_15 = arith.constant 0 : index
    %c0_16 = arith.constant 0 : index
    %18 = vector.load %arg4[%c4, %c0_15, %c0_16] : memref<6x128x128xf32, #tpu.memory_space<vmem>>, vector<1x128x128xf32>
    %19 = vector.shape_cast %18 : vector<1x128x128xf32> to vector<128x128xf32>
    %c5 = arith.constant 5 : index
    %c0_17 = arith.constant 0 : index
    %c0_18 = arith.constant 0 : index
    %20 = vector.load %arg4[%c5, %c0_17, %c0_18] : memref<6x128x128xf32, #tpu.memory_space<vmem>>, vector<1x128x128xf32>
    %21 = vector.shape_cast %20 : vector<1x128x128xf32> to vector<128x128xf32>
    %cst = arith.constant dense<0.000000e+00> : vector<128x128xf32>
    %22 = tpu.matmul %13, %11, %cst {dimension_numbers = #tpu.dot_dimension_numbers<[1], [0], [0], [1], [0, 0, 1, 1], [], []>, precision = #tpu.contract_precision<fp32>} : vector<128x128xf32>, vector<128x128xf32>, vector<128x128xf32> -> vector<128x128xf32>
    %cst_19 = arith.constant dense<0.000000e+00> : vector<128x128xf32>
    %23 = tpu.matmul %17, %15, %cst_19 {dimension_numbers = #tpu.dot_dimension_numbers<[1], [0], [0], [1], [0, 0, 1, 1], [], []>, precision = #tpu.contract_precision<fp32>} : vector<128x128xf32>, vector<128x128xf32>, vector<128x128xf32> -> vector<128x128xf32>
    %cst_20 = arith.constant dense<0.000000e+00> : vector<128x128xf32>
    %24 = tpu.matmul %21, %19, %cst_20 {dimension_numbers = #tpu.dot_dimension_numbers<[1], [0], [0], [1], [0, 0, 1, 1], [], []>, precision = #tpu.contract_precision<fp32>} : vector<128x128xf32>, vector<128x128xf32>, vector<128x128xf32> -> vector<128x128xf32>
    %cst_21 = arith.constant dense<0.000000e+00> : vector<128x128xf32>
    %25 = tpu.matmul %23, %22, %cst_21 {dimension_numbers = #tpu.dot_dimension_numbers<[1], [0], [0], [1], [0, 0, 1, 1], [], []>, precision = #tpu.contract_precision<fp32>} : vector<128x128xf32>, vector<128x128xf32>, vector<128x128xf32> -> vector<128x128xf32>
    %cst_22 = arith.constant dense<0.000000e+00> : vector<128x128xf32>
    %26 = tpu.matmul %24, %25, %cst_22 {dimension_numbers = #tpu.dot_dimension_numbers<[1], [0], [0], [1], [0, 0, 1, 1], [], []>, precision = #tpu.contract_precision<fp32>} : vector<128x128xf32>, vector<128x128xf32>, vector<128x128xf32> -> vector<128x128xf32>
    %c0_23 = arith.constant 0 : index
    %c0_24 = arith.constant 0 : index
    %27 = vector.load %arg2[%c0_23, %c0_24] : memref<128x128xf32, #tpu.memory_space<vmem>>, vector<128x128xf32>
    %cst_25 = arith.constant dense<0.000000e+00> : vector<128x128xf32>
    %28 = tpu.matmul %26, %27, %cst_25 {dimension_numbers = #tpu.dot_dimension_numbers<[1], [0], [0], [1], [0, 0, 1, 1], [], []>, precision = #tpu.contract_precision<fp32>} : vector<128x128xf32>, vector<128x128xf32>, vector<128x128xf32> -> vector<128x128xf32>
    %cst_26 = arith.constant dense<0.000000e+00> : vector<128x128xf32>
    %29 = tpu.matmul %28, %26, %cst_26 {dimension_numbers = #tpu.dot_dimension_numbers<[1], [1], [0], [0], [0, 0, 1, 0], [], []>, precision = #tpu.contract_precision<fp32>} : vector<128x128xf32>, vector<128x128xf32>, vector<128x128xf32> -> vector<128x128xf32>
    %c0_27 = arith.constant 0 : index
    %c0_28 = arith.constant 0 : index
    %30 = vector.load %arg3[%c0_27, %c0_28] : memref<128x128xf32, #tpu.memory_space<vmem>>, vector<128x128xf32>
    tpu.vector_store %arg3[%c0_27, %c0_28], %29 {strides = array<i32>} : memref<128x128xf32, #tpu.memory_space<vmem>>, vector<128x128xf32>,
    return
  }
  func.func @transform_0(%arg0: i32) -> (i32, i32, i32) {
    %c0_i32 = arith.constant 0 : i32
    %c0_i32_0 = arith.constant 0 : i32
    %c0_i32_1 = arith.constant 0 : i32
    return %arg0, %c0_i32, %c0_i32_0 : i32, i32, i32
  }
  func.func @transform_1(%arg0: i32) -> (i32, i32) {
    %c0_i32 = arith.constant 0 : i32
    %c0_i32_0 = arith.constant 0 : i32
    %c0_i32_1 = arith.constant 0 : i32
    return %c0_i32, %c0_i32_0 : i32, i32
  }
  func.func @transform_2(%arg0: i32) -> (i32, i32) {
    %c0_i32 = arith.constant 0 : i32
    %c0_i32_0 = arith.constant 0 : i32
    %c0_i32_1 = arith.constant 0 : i32
    return %c0_i32, %c0_i32_0 : i32, i32
  }
}

</mosaic_0001>

<bundles_post_ra>
// kernel: tpu_custom_call.1
= control target key start
LH: loop header
LB: loop body
LE: loop exit
PB: predicated region body
PF: predicated region fallthrough
CT: control target
= control target key end

     0   :  { %7 = vsyncpa [#allocation4], 0  ;;  %s18896_s0 = inlined_call_operand.hbm [shape: f32[6,32,128], index: 0, kind: input, shape index: {}]   ;;  %s18897_s1 = inlined_call_operand.hbm [shape: f32[128,128], index: 1, kind: input, shape index: {}]   ;;  %s18898_s2 = inlined_call_operand.hbm [shape: f32[128,128], index: 2, kind: output, shape index: {}]  }
   0x1   :  { %8 = vsyncpa [#allocation7], 0 }
   0x2   :  { %9 = vsyncpa [#allocation5], 0  ;;  %s15325_s9 = smov [#allocation3]   ;;  %s15253_s13 = scalar_lea.hbm %s18896_s0, 3072 }
   0x3   :  { %s15_s10 = sshll.u32 %s15325_s9, 4  ;;  %p15254_p0 = scmp.ne.s32.totalorder %s18896_s0, %s15253_s13  ;;  %s16_s10 = int_to_ptr.vmem [resolvable:$true] %s15_s10 }
   0x4   :  { %p15257_p1 = scmp.lt.u32.totalorder %s15253_s13, %s18896_s0 }
   0x6   :  { %p15259_p2 = pnand %p15257_p1, %p15254_p0 }
   0x8   :  { %15262 = shalt.err (!%p15259_p2)
}
   0x9   :  { %s15263_s18 = scalar_lea.vmem %s16_s10, 3072  ;;  %p15268_p4 = scmp.lt.s32.totalorder %s16_s10, %s16_s10 }
   0xa   :  { %p15264_p3 = scmp.ne.s32.totalorder %s16_s10, %s15263_s18  ;;  %p15269_p5 = scmp.lt.s32.totalorder %s15263_s18, %s15263_s18 }
   0xc   :  { %p15270_p6 = por %p15269_p5, %p15268_p4 }
   0xe   :  { %p15271_p7 = pnand %p15270_p6, %p15264_p3 }
  0x10   :  { %15274 = shalt.err (!%p15271_p7)
}
  0x11   :  { %s15326_s19 = smov 128   ;;  %s15327_s20 = smov 8  }
  0x12   :  { %21 = dma.hbm_to_vmem [thread:$0]  %s18896_s0, 3072, %s16_s10, [#allocation4], %s15326_s19, %s15326_s19, %s15327_s20  }
  0x13   :  { %s15328_s23 = smov [#allocation6]   ;;  %s15275_s27 = scalar_lea.hbm %s18897_s1, 2048 }
  0x14   :  { %s27_s24 = sshll.u32 %s15328_s23, 4  ;;  %p15276_p8 = scmp.ne.s32.totalorder %s18897_s1, %s15275_s27  ;;  %s28_s24 = int_to_ptr.vmem [resolvable:$true] %s27_s24 }
  0x15   :  { %p15279_p9 = scmp.lt.u32.totalorder %s15275_s27, %s18897_s1 }
  0x17   :  { %p15281_p10 = pnand %p15279_p9, %p15276_p8 }
  0x19   :  { %15284 = shalt.err (!%p15281_p10)
}
  0x1a   :  { %s15285_s4 = scalar_lea.vmem %s28_s24, 2048  ;;  %p15290_p12 = scmp.lt.s32.totalorder %s28_s24, %s28_s24 }
  0x1b   :  { %p15286_p11 = scmp.ne.s32.totalorder %s28_s24, %s15285_s4  ;;  %p15291_p13 = scmp.lt.s32.totalorder %s15285_s4, %s15285_s4 }
  0x1d   :  { %p15292_p0 = por %p15291_p13, %p15290_p12 }
  0x1f   :  { %p15293_p1 = pnand %p15292_p0, %p15286_p11 }
  0x21   :  { %15296 = shalt.err (!%p15293_p1)
}
  0x22   :  { %33 = dma.hbm_to_vmem [thread:$0]  %s18897_s1, 2048, %s28_s24, [#allocation7], %s15326_s19, %s15326_s19, %s15327_s20  }
  0x23   :  { %15319 = dma.done.wait [#allocation4], 3072  }
  0x24   :  { %15320 = vsyncadd [#allocation4], 4294964224 }
  0x25   :  { %15321 = dma.done.wait [#allocation7], 2048  }
  0x26   :  { %15322 = vsyncadd [#allocation7], 4294965248  ;;  %v40_v0 = vlaneseq  ;;  %v212_v2 = vld [vmem:[#allocation3] sm:$0xff]  ;;  %v213_v3 = vld [vmem:[#allocation3 + $0x8] sm:$0xff]  ;;  %v19211_v42 = vmov 0  ;;  %v19223_v60 = vmov 0 }
  0x27   :  { %v220_v4 = vld [vmem:[#allocation3 + $0x40] sm:$0xff]  ;;  %v362_v8 = vand.u32 4294901760, %v212_v2  ;;  %v365_v9 = vand.u32 4294901760, %v213_v3  ;;  %v221_v10 = vld [vmem:[#allocation3 + $0x48] sm:$0xff]  ;;  %v15384_v12 = vld [vmem:[#allocation3 + $0x10] sm:$0xff]  ;;  %s15332_s1 = smov [#allocation8]  }
  0x28   :  { %v15378_v1 = vshrl.u32 %v40_v0, 7  ;;  %v15382_v7 = vand.u32 127, %v40_v0  ;;  %v1648_v11 = vand.u32 4294901760, %v220_v4  ;;  %v15386_v13 = vld [vmem:[#allocation3 + $0x18] sm:$0xff]  ;;  %v1651_v14 = vand.u32 4294901760, %v221_v10  ;;  %v15390_v17 = vld [vmem:[#allocation3 + $0x50] sm:$0xff] }
  0x29   :  { %v368_v15 = vand.u32 4294901760, %v15384_v12  ;;  %v371_v16 = vand.u32 4294901760, %v15386_v13  ;;  %v15392_v18 = vld [vmem:[#allocation3 + $0x58] sm:$0xff]  ;;  %v15394_v19 = vpack.c.bf16 %v365_v9, %v362_v8  ;;  %v1654_v20 = vand.u32 4294901760, %v15390_v17  ;;  %v216_v22 = vld [vmem:[#allocation3 + $0x20] sm:$0xff]  ;;  %v217_v28 = vld [vmem:[#allocation3 + $0x28] sm:$0xff] }
  0x2a   :  { %v45_v5 = vadd.s32 32, %v15378_v1  ;;  %v46_v6 = vadd.s32 40, %v15378_v1  ;;  %v1657_v21 = vand.u32 4294901760, %v15392_v18  ;;  %v224_v23 = vld [vmem:[#allocation3 + $0x60] sm:$0xff]  ;;  %v15398_v24 = vpack.c.bf16 %v1651_v14, %v1648_v11  ;;  %v225_v29 = vld [vmem:[#allocation3 + $0x68] sm:$0xff]  ;;  %v218_v59 = vld [vmem:[#allocation3 + $0x30] sm:$0xff] }
  0x2b   :  { %19202 = vst [vmem:[#allocation12_spill] sm:$0xff] %v15394_v19  ;;  %v15404_v25 = vpack.c.bf16 %v371_v16, %v368_v15  ;;  %v47_v26 = vadd.s32 48, %v15378_v1  ;;  %v48_v27 = vadd.s32 56, %v15378_v1  ;;  %13342 = vmatprep.subr.bf16.mxu0 %v15394_v19  ;;  %v15425_v33 = vand.u32 4294901760, %v216_v22  ;;  %s9400_s6 = sshll.u32 %s15332_s1, 4  ;;  %s9401_s6 = int_to_ptr.vmem [resolvable:$true] %s9400_s6 }
  0x2c   :  { %19203 = vst [vmem:[#allocation13_spill] sm:$0xff] %v15398_v24  ;;  %v15413_v30 = vpack.c.bf16 %v1657_v21, %v1654_v20  ;;  %vm15416_vm0 = vcmp.eq.s32.totalorder %v45_v5, %v15382_v7  ;;  %vm15421_vm1 = vcmp.eq.s32.totalorder %v46_v6, %v15382_v7  ;;  %13534 = vmatprep.subr.bf16.mxu1 %v15398_v24  ;;  %v49_v34 = vadd.s32 64, %v15378_v1  ;;  %s15297_s7 = scalar_lea.vmem %s9401_s6, 2048  ;;  %p15302_p3 = scmp.lt.s32.totalorder %s9401_s6, %s9401_s6 }
  0x2d   :  { %19204 = vst [vmem:[#allocation14_spill] sm:$0xff] %v15404_v25  ;;  %13344 = vmatpush3.bf16.msra.mxu0 %v15394_v19  ;;  %v15430_v35 = vand.u32 4294901760, %v224_v23  ;;  %v15432_v36 = vand.u32 4294901760, %v217_v28  ;;  %v15434_v37 = vsub.f32 %v212_v2, %v362_v8  ;;  %13536 = vmatpush3.bf16.msra.mxu1 %v15398_v24  ;;  %v50_v38 = vadd.s32 72, %v15378_v1  ;;  %vm15451_vm2 = vmpackc.low %vm15421_vm1, %vm15416_vm0  ;;  %v226_v2 = vld [vmem:[#allocation3 + $0x70] sm:$0xff]  ;;  %p15298_p2 = scmp.ne.s32.totalorder %s9401_s6, %s15297_s7  ;;  %p15303_p4 = scmp.lt.s32.totalorder %s15297_s7, %s15297_s7 }
  0x2e   :  { %19205 = vst [vmem:[#allocation15_spill] sm:$0xff] %v15413_v30  ;;  %13346 = vmatprep.subr.bf16.mxu0 %v15404_v25  ;;  %v15440_v39 = vsub.f32 %v216_v22, %v15425_v33  ;;  %v15442_v40 = vsub.f32 %v213_v3, %v365_v9  ;;  %v15444_v41 = vand.u32 4294901760, %v225_v29  ;;  %13538 = vmatprep.subr.bf16.mxu1 %v15413_v30  ;;  %v19212_v42 = vsel %vm15451_vm2, 4294967295, %v19211_v42 }
  0x2f   :  { %19213 = vst [vmem:[#allocation17_spill] sm:$0xff] %v19212_v42  ;;  %vm15456_vm3 = vcmp.eq.s32.totalorder %v47_v26, %v15382_v7  ;;  %vm15461_vm4 = vcmp.eq.s32.totalorder %v48_v27, %v15382_v7  ;;  %v15466_v45 = vsub.f32 %v224_v23, %v15430_v35  ;;  %v15469_v46 = vsub.f32 %v217_v28, %v15432_v36  ;;  %v219_v26 = vld [vmem:[#allocation3 + $0x38] sm:$0xff]  ;;  %p15304_p5 = por %p15303_p4, %p15302_p3 }
  0x30   :  { %19210 = vst [vmem:[#allocation16_spill] sm:$0xff] %v15440_v39  ;;  %v18904_v47 = vand.u32 4294901760, %v15440_v39  ;;  %v18908_v48 = vand.u32 4294901760, %v15434_v37  ;;  %v18907_v49 = vand.u32 4294901760, %v15442_v40  ;;  %v15474_v50 = vsub.f32 %v220_v4, %v1648_v11  ;;  %vm15504_vm6 = vmpackc.low %vm15461_vm4, %vm15456_vm3 }
  0x31   :  { %19218 = vst [vmem:[#allocation18_spill] sm:$0xff] %v15466_v45  ;;  %19219 = vst [vmem:[#allocation19_spill] sm:$0xff] %v15469_v46  ;;  %13348 = vmatpush3.bf16.msra.mxu0 %v15404_v25  ;;  %v18901_v51 = vand.u32 4294901760, %v15466_v45  ;;  %v15479_v52 = vsub.f32 %v225_v29, %v15444_v41  ;;  %v15481_v53 = vsub.f32 %v221_v10, %v1651_v14  ;;  %13540 = vmatpush3.bf16.msra.mxu1 %v15413_v30  ;;  %v18918_v54 = vmov 1.0|1.0   ;;  %p15305_p6 = pnand %p15304_p5, %p15298_p2 }
  0x32   :  { %13350 = vmatprep.subr.msk.bf16.mxu0 %vm15451_vm2, %v18918_v54  ;;  %vm15488_vm5 = vcmp.eq.s32.totalorder %v49_v34, %v15382_v7  ;;  %v51_v56 = vadd.s32 80, %v15378_v1  ;;  %v52_v57 = vadd.s32 88, %v15378_v1  ;;  %v445_v58 = vsub.f32 %v15440_v39, %v18904_v47  ;;  %13542 = vmatprep.subr.msk.bf16.mxu1 %vm15451_vm2, %v18918_v54 }
  0x33   :  { %19220 = vst [vmem:[#allocation20_spill] sm:$0xff] %v15479_v52  ;;  %v19224_v60 = vsel %vm15504_vm6, 4294967295, %v19223_v60  ;;  %vm15509_vm7 = vcmp.eq.s32.totalorder %v50_v38, %v15382_v7  ;;  %v53_v62 = vadd.s32 96, %v15378_v1  ;;  %v1731_v63 = vsub.f32 %v15466_v45, %v18901_v51 }
  0x34   :  { %19225 = vst [vmem:[#allocation21_spill] sm:$0xff] %v19224_v60  ;;  %v18900_v0 = vand.u32 4294901760, %v15469_v46  ;;  %v446_v3 = vand.u32 4294901760, %v445_v58  ;;  %v606_v4 = vsub.f32 %v15434_v37, %v18908_v48  ;;  %v613_v5 = vsub.f32 %v15442_v40, %v18907_v49  ;;  %vm15557_vm10 = vmpackc.low %vm15509_vm7, %vm15488_vm5 }
  0x35   :  { %v18906_v6 = vand.u32 4294901760, %v15474_v50  ;;  %13352 = vmatpush3.bf16.msk.msra.mxu0 %vm15451_vm2, %v18918_v54  ;;  %v1732_v8 = vand.u32 4294901760, %v1731_v63  ;;  %v18899_v9 = vand.u32 4294901760, %v15479_v52  ;;  %v18905_v10 = vand.u32 4294901760, %v15481_v53  ;;  %13544 = vmatpush3.bf16.msk.msra.mxu1 %vm15451_vm2, %v18918_v54  ;;  %v227_v63 = vld [vmem:[#allocation3 + $0x78] sm:$0xff] }
  0x36   :  { %v15530_v11 = vand.u32 4294901760, %v218_v59  ;;  %13354 = vmatprep.subr.msk.bf16.mxu0 %vm15504_vm6, %v18918_v54  ;;  %vm15539_vm8 = vcmp.eq.s32.totalorder %v51_v56, %v15382_v7  ;;  %vm15544_vm9 = vcmp.eq.s32.totalorder %v52_v57, %v15382_v7  ;;  %v19230_v22 = vmov 0  ;;  %13546 = vmatprep.subr.msk.bf16.mxu1 %vm15504_vm6, %v18918_v54 }
  0x37   :  { %v19231_v22 = vsel %vm15544_vm9, 4294967295, %v19230_v22  ;;  %v15548_v23 = vand.u32 4294901760, %v226_v2  ;;  %v19233_v27 = vmov 0  ;;  %v54_v28 = vadd.s32 104, %v15378_v1  ;;  %11021 = vmatprep.mubr.f32.mxu0 %v446_v3  ;;  %11357 = vmatprep.mubr.f32.mxu1 %v1732_v8  ;;  %vm15623_vm12 = vmpackc.low %vm15544_vm9, %vm15539_vm8 }
  0x38   :  { %19232 = vst [vmem:[#allocation22_spill] sm:$0xff] %v19231_v22  ;;  %v19234_v27 = vsel %vm15557_vm10, 4294967295, %v19233_v27  ;;  %vm15563_vm11 = vcmp.eq.s32.totalorder %v53_v62, %v15382_v7  ;;  %v19236_v29 = vmov 0  ;;  %v55_v34 = vadd.s32 112, %v15378_v1 }
  0x39   :  { %19235 = vst [vmem:[#allocation23_spill] sm:$0xff] %v19234_v27  ;;  %v19237_v29 = vsel %vm15563_vm11, 4294967295, %v19236_v29  ;;  %v56_v38 = vadd.s32 120, %v15378_v1  ;;  %v15572_v56 = vsub.f32 %v15469_v46, %v18900_v0  ;;  %v607_v57 = vand.u32 4294901760, %v606_v4  ;;  %13356 = vmatpush3.bf16.msk.msra.mxu0 %vm15504_vm6, %v18918_v54  ;;  %13548 = vmatpush3.bf16.msk.msra.mxu1 %vm15504_vm6, %v18918_v54 }
  0x3a   :  { %v15577_v58 = vsub.f32 %v15474_v50, %v18906_v6  ;;  %v15580_v62 = vsub.f32 %v218_v59, %v15530_v11  ;;  %v614_v1 = vand.u32 4294901760, %v613_v5  ;;  %v15588_v3 = vsub.f32 %v15479_v52, %v18899_v9  ;;  %13358 = vmatprep.subr.msk.bf16.mxu0 %vm15557_vm10, %v18918_v54  ;;  %13550 = vmatprep.subr.msk.bf16.mxu1 %vm15557_vm10, %v18918_v54 }
  0x3b   :  { %v15593_v4 = vsub.f32 %v15481_v53, %v18905_v10  ;;  %v15595_v8 = vand.u32 4294901760, %v219_v26  ;;  %v15604_v59 = vsub.f32 %v226_v2, %v15548_v23  ;;  %v15609_v5 = vsub.f32 %v15384_v12, %v368_v15 }
  0x3c   :  { %19238 = vst [vmem:[#allocation24_spill] sm:$0xff] %v15580_v62  ;;  %v15614_v9 = vsub.f32 %v15386_v13, %v371_v16  ;;  %v19240_v2 = vmov 0  ;;  %vm15628_vm13 = vcmp.eq.s32.totalorder %v54_v28, %v15382_v7  ;;  %v19243_v12 = vmov 0 }
  0x3d   :  { %19239 = vst [vmem:[#allocation25_spill] sm:$0xff] %v15604_v59  ;;  %v19241_v2 = vsel %vm15623_vm12, 4294967295, %v19240_v2  ;;  %v19244_v12 = vsel %vm15628_vm13, 4294967295, %v19243_v12  ;;  %vm15633_vm14 = vcmp.eq.s32.totalorder %v55_v34, %v15382_v7  ;;  %v19245_v13 = vmov 0  ;;  %13360 = vmatpush3.bf16.msk.msra.mxu0 %vm15557_vm10, %v18918_v54  ;;  %13552 = vmatpush3.bf16.msk.msra.mxu1 %vm15557_vm10, %v18918_v54  ;;  %vm15683_vm10 = vmpackc.low %vm15628_vm13, %vm15563_vm11 }
  0x3e   :  { %19242 = vst [vmem:[#allocation26_spill] sm:$0xff] %v19241_v2  ;;  %v19246_v13 = vsel %vm15633_vm14, 4294967295, %v19245_v13  ;;  %v15637_v15 = vand.u32 4294901760, %v227_v63  ;;  %v15642_v16 = vsub.f32 %v15390_v17, %v1654_v20  ;;  %vm15645_vm15 = vcmp.eq.s32.totalorder %v56_v38, %v15382_v7  ;;  %13362 = vmatprep.subr.msk.bf16.mxu0 %vm15623_vm12, %v18918_v54  ;;  %13554 = vmatprep.subr.msk.bf16.mxu1 %vm15623_vm12, %v18918_v54 }
  0x3f   :  { %v19247_v0 = vmov 0  ;;  %v18909_v51 = vand.u32 4294901760, %v15580_v62  ;;  %v15654_v34 = vsub.f32 %v15392_v18, %v1657_v21  ;;  %v15659_v17 = vpack.c.bf16 %v614_v1, %v607_v57 }
  0x40   :  { %v19248_v0 = vsel %vm15645_vm15, 4294967295, %v19247_v0  ;;  %v1893_v20 = vand.u32 4294901760, %v15577_v58  ;;  %v15664_v38 = vsub.f32 %v219_v26, %v15595_v8  ;;  %v1900_v18 = vand.u32 4294901760, %v15593_v4 }
  0x41   :  { %v18912_v57 = vand.u32 4294901760, %v15609_v5  ;;  %v18913_v1 = vand.u32 4294901760, %v15614_v9  ;;  %v19250_v26 = vmov 0  ;;  %v15688_v58 = vsub.f32 %v227_v63, %v15637_v15  ;;  %13364 = vmatpush3.bf16.msk.msra.mxu0 %vm15623_vm12, %v18918_v54  ;;  %13556 = vmatpush3.bf16.msk.msra.mxu1 %vm15623_vm12, %v18918_v54  ;;  %vm15744_vm12 = vmpackc.low %vm15645_vm15, %vm15633_vm14 }
  0x42   :  { %19249 = vst [vmem:[#allocation27_spill] sm:$0xff] %v15664_v38  ;;  %v19251_v26 = vsel %vm15683_vm10, 4294967295, %v19250_v26  ;;  %v18916_v47 = vmov 0.0   ;;  %v15700_v49 = vsub.f32 %v15580_v62, %v18909_v51  ;;  %13366 = vmatprep.subr.msk.bf16.mxu0 %vm15683_vm10, %v18918_v54  ;;  %13558 = vmatprep.subr.msk.bf16.mxu1 %vm15683_vm10, %v18918_v54  ;;  %v19261_v54 = vand.u32 4294901760, %v15604_v59 }
  0x43   :  { %19252 = vst [vmem:[#allocation28_spill] sm:$0xff] %v19251_v26  ;;  %19253 = vst [vmem:[#allocation29_spill] sm:$0xff] %v15688_v58  ;;  %v9417_v10 = vsel %vm15416_vm0, 1.0, %v18916_v47  ;;  %v9418_v6 = vsel %vm15421_vm1, 1.0, %v18916_v47  ;;  %v9419_v4 = vsel %vm15456_vm3, 1.0, %v18916_v47  ;;  %v9420_v51 = vsel %vm15461_vm4, 1.0, %v18916_v47 }
  0x44   :  { %v15703_v63 = vsub.f32 %v9417_v10, %v9417_v10  ;;  %v15705_v7 = vsub.f32 %v9418_v6, %v9418_v6  ;;  %v9421_v10 = vsel %vm15488_vm5, 1.0, %v18916_v47  ;;  %v620_v6 = vsub.f32 %v15609_v5, %v18912_v57 }
  0x45   :  { %v627_v28 = vsub.f32 %v15614_v9, %v18913_v1  ;;  %v15732_v48 = vsub.f32 %v9419_v4, %v9419_v4  ;;  %v9422_v21 = vsel %vm15509_vm7, 1.0, %v18916_v47  ;;  %v19256_v57 = vmov 0 }
  0x46   :  { %19254 = vst [vmem:[#allocation30_spill] sm:$0xff] %v15703_v63  ;;  %v19257_v57 = vsel %vm15744_vm12, 4294967295, %v19256_v57  ;;  %v15750_v4 = vand.u32 4294901760, %v15703_v63  ;;  %v15753_v2 = vand.u32 4294901760, %v15705_v7  ;;  %v15755_v47 = vsub.f32 %v9420_v51, %v9420_v51 }
  0x47   :  { %19255 = vst [vmem:[#allocation31_spill] sm:$0xff] %v15732_v48  ;;  %19258 = vst [vmem:[#allocation32_spill] sm:$0xff] %v19257_v57  ;;  %v1751_v27 = vsub.f32 %v15604_v59, %v19261_v54  ;;  %v19262_v60 = vand.u32 4294901760, %v15642_v16  ;;  %v19263_v30 = vand.u32 4294901760, %v15654_v34  ;;  %v15766_v25 = vsub.f32 %v9421_v10, %v9421_v10 }
  0x48   :  { %19259 = vst [vmem:[#allocation33_spill] sm:$0xff] %v15750_v4  ;;  %19260 = vst [vmem:[#allocation34_spill] sm:$0xff] %v15753_v2  ;;  %v19265_v62 = vmov 1.0|1.0   ;;  %v15772_v51 = vand.u32 4294901760, %v15732_v48  ;;  %v15775_v52 = vand.u32 4294901760, %v15755_v47  ;;  %v15777_v54 = vsub.f32 %v9422_v21, %v9422_v21 }
  0x49   :  { %v1906_v42 = vsub.f32 %v15642_v16, %v19262_v60  ;;  %v1913_v1 = vsub.f32 %v15654_v34, %v19263_v30  ;;  %19264 = vst [vmem:[#allocation35_spill] sm:$0xff] %v15766_v25  ;;  %13368 = vmatpush3.bf16.msk.msra.mxu0 %vm15683_vm10, %v19265_v62  ;;  %v19268_v59 = vmov 0.0   ;;  %13560 = vmatpush3.bf16.msk.msra.mxu1 %vm15683_vm10, %v19265_v62  ;;  %v19269_v30 = vand.u32 4294901760, %v15664_v38 }
  0x4a   :  { %19266 = vst [vmem:[#allocation36_spill] sm:$0xff] %v15772_v51  ;;  %19267 = vst [vmem:[#allocation37_spill] sm:$0xff] %v15775_v52  ;;  %v9423_v60 = vsel %vm15539_vm8, 1.0, %v19268_v59  ;;  %13370 = vmatprep.subr.msk.bf16.mxu0 %vm15744_vm12, %v19265_v62  ;;  %v621_v24 = vand.u32 4294901760, %v620_v6  ;;  %v628_v46 = vand.u32 4294901760, %v627_v28  ;;  %v9424_v21 = vsel %vm15544_vm9, 1.0, %v19268_v59  ;;  %13562 = vmatprep.subr.msk.bf16.mxu1 %vm15744_vm12, %v19265_v62 }
  0x4b   :  { %v475_v10 = vsub.f32 %v15664_v38, %v19269_v30  ;;  %v13565_v26 = vpack.c.bf16 %v1900_v18, %v1893_v20  ;;  %v19270_v19 = vand.u32 4294901760, %v15688_v58  ;;  %v485_v39 = vsub.f32 %v15703_v63, %v15750_v4 }
  0x4c   :  { %v495_v6 = vsub.f32 %v15705_v7, %v15753_v2  ;;  %v1907_v28 = vand.u32 4294901760, %v1906_v42  ;;  %v1914_v30 = vand.u32 4294901760, %v1913_v1  ;;  %v15805_v38 = vand.u32 4294901760, %v15766_v25 }
  0x4d   :  { %v1761_v45 = vsub.f32 %v15688_v58, %v19270_v19  ;;  %v15807_v22 = vsub.f32 %v9423_v60, %v9423_v60  ;;  %13372 = vmatpush3.bf16.msk.msra.mxu0 %vm15744_vm12, %v19265_v62  ;;  %v505_v19 = vsub.f32 %v15732_v48, %v15772_v51  ;;  %v515_v20 = vsub.f32 %v15755_v47, %v15775_v52 }
  0x4e   :  { %v15817_v18 = vand.u32 4294901760, %v15777_v54  ;;  %v15819_v42 = vsub.f32 %v9424_v21, %v9424_v21  ;;  %13564 = vmatpush3.bf16.msk.msra.mxu1 %vm15744_vm12, %v19265_v62  ;;  %13374 = vmatprep.subr.bf16.mxu0 %v15659_v17  ;;  %v466_v1 = vand.u32 4294901760, %v15700_v49  ;;  %v1752_v60 = vand.u32 4294901760, %v1751_v27 }
  0x4f   :  { %19271 = vst [vmem:[#allocation38_spill] sm:$0xff] %v15807_v22  ;;  %v476_v2 = vand.u32 4294901760, %v475_v10  ;;  %v13377_v4 = vpack.c.bf16 %v628_v46, %v621_v24  ;;  %13566 = vmatprep.subr.bf16.mxu1 %v13565_v26  ;;  %v1762_v51 = vand.u32 4294901760, %v1761_v45  ;;  %v15826_v58 = vand.u32 4294901760, %v485_v39 }
  0x50   :  { %19272 = vst [vmem:[#allocation39_spill] sm:$0xff] %v15817_v18  ;;  %19273 = vst [vmem:[#allocation40_spill] sm:$0xff] %v15819_v42  ;;  %v15828_v52 = vand.u32 4294901760, %v495_v6  ;;  %v9425_v21 = vsel %vm15563_vm11, 1.0, %v19268_v59  ;;  %v19275_v57 = vand.u32 4294901760, %v15572_v56  ;;  %v13569_v62 = vpack.c.bf16 %v1914_v30, %v1907_v28 }
  0x51   :  { %v525_v49 = vsub.f32 %v15766_v25, %v15805_v38  ;;  %v15838_v27 = vand.u32 4294901760, %v15807_v22  ;;  %v9426_v24 = vsel %vm15628_vm13, 1.0, %v19268_v59  ;;  %v19277_v39 = vand.u32 4294901760, %v15588_v3 }
  0x52   :  { %19274 = vst [vmem:[#allocation41_spill] sm:$0xff] %v15828_v52  ;;  %11022 = vmatmul.mubr.f32.vlgmr.msra.gmra.mrb[0].mxu0 %v19275_v57  ;;  %v15846_v45 = vand.u32 4294901760, %v505_v19  ;;  %v15848_v46 = vand.u32 4294901760, %v515_v20  ;;  %v535_v56 = vsub.f32 %v15777_v54, %v15817_v18  ;;  %v15853_v57 = vand.u32 4294901760, %v15819_v42 }
  0x53   :  { %19276 = vst [vmem:[#allocation42_spill] sm:$0xff] %v15838_v27  ;;  %11358 = vmatmul.mubr.f32.vlgmr.msra.gmra.mrb[0].mxu1 %v19277_v39  ;;  %13376 = vmatpush3.bf16.msra.mxu0 %v15659_v17  ;;  %v15855_v10 = vsub.f32 %v9425_v21, %v9425_v21  ;;  %v15859_v3 = vpack.c.bf16 %v15828_v52, %v15826_v58  ;;  %v9427_v6 = vsel %vm15633_vm14, 1.0, %v19268_v59  ;;  %v9428_v28 = vsel %vm15645_vm15, 1.0, %v19268_v59 }
  0x54   :  { %19278 = vst [vmem:[#allocation43_spill] sm:$0xff] %v15846_v45  ;;  %19279 = vst [vmem:[#allocation44_spill] sm:$0xff] %v15848_v46  ;;  %13568 = vmatpush3.bf16.msra.mxu1 %v13565_v26  ;;  %11024 = vmatprep.mubr.f32.mxu0 %v466_v1  ;;  %v15861_v17 = vsub.f32 %v9426_v24, %v9426_v24  ;;  %v545_v26 = vsub.f32 %v15807_v22, %v15838_v27  ;;  %v15875_v19 = vand.u32 4294901760, %v525_v49 }
  0x55   :  { %19280 = vst [vmem:[#allocation45_spill] sm:$0xff] %v15853_v57  ;;  %19281 = vst [vmem:[#allocation46_spill] sm:$0xff] %v15855_v10  ;;  %11360 = vmatprep.mubr.f32.mxu1 %v1752_v60  ;;  %13378 = vmatprep.subr.bf16.mxu0 %v13377_v4  ;;  %v15873_v30 = vpack.c.bf16 %v15848_v46, %v15846_v45  ;;  %v15877_v20 = vand.u32 4294901760, %v535_v56  ;;  %v15883_v1 = vand.u32 4294901760, %v15855_v10  ;;  %v19290_v21 = vand.u32 4294901760, %v15474_v50 }
  0x56   :  { %19282 = vst [vmem:[#allocation47_spill] sm:$0xff] %v15859_v3  ;;  %19283 = vst [vmem:[#allocation48_spill] sm:$0xff] %v15861_v17  ;;  %11025 = vmatmul.mubr.f32.gmra.mrb[2].mxu0 %v476_v2  ;;  %13570 = vmatprep.subr.bf16.mxu1 %v13569_v62  ;;  %v555_v2 = vsub.f32 %v15819_v42, %v15853_v57  ;;  %v15885_v59 = vsub.f32 %v9427_v6, %v9427_v6  ;;  %v19291_v49 = vand.u32 4294901760, %v15481_v53 }
  0x57   :  { %11361 = vmatmul.mubr.f32.gmra.mrb[2].mxu1 %v1762_v51  ;;  %13380 = vmatpush3.bf16.msra.mxu0 %v13377_v4  ;;  %19284 = vst [vmem:[#allocation49_spill] sm:$0xff] %v15873_v30  ;;  %19285 = vst [vmem:[#allocation50_spill] sm:$0xff] %v15875_v19  ;;  %v19288_v4 = vand.u32 4294901760, %v15434_v37  ;;  %v19289_v51 = vand.u32 4294901760, %v15442_v40  ;;  %v15904_v39 = vsub.f32 %v9428_v28, %v9428_v28  ;;  %v19294_v56 = vand.u32 4294901760, %v15609_v5 }
  0x58   :  { %13572 = vmatpush3.bf16.msra.mxu1 %v13569_v62  ;;  %11027 = vmatprep.mubr.f32.mxu0 %v15826_v58  ;;  %19286 = vst [vmem:[#allocation51_spill] sm:$0xff] %v15883_v1  ;;  %19287 = vst [vmem:[#allocation52_spill] sm:$0xff] %v15885_v59  ;;  %v15897_v24 = vpack.c.bf16 %v19291_v49, %v19290_v21  ;;  %v15902_v62 = vand.u32 4294901760, %v15861_v17  ;;  %v19295_v6 = vand.u32 4294901760, %v15614_v9  ;;  %v19297_v21 = vand.u32 4294901760, %v15654_v34 }
  0x59   :  { %v15891_v60 = vpack.c.bf16 %v19289_v51, %v19288_v4  ;;  %11363 = vmatprep.mubr.f32.mxu1 %v15826_v58  ;;  %13382 = vmatprep.subr.bf16.mxu0 %v15859_v3  ;;  %19293 = vst [vmem:[#allocation54_spill] sm:$0xff] %v15904_v39  ;;  %v19296_v51 = vand.u32 4294901760, %v15642_v16  ;;  %v15926_v28 = vpack.c.bf16 %v15877_v20, %v15875_v19 }
  0x5a   :  { %19292 = vst [vmem:[#allocation53_spill] sm:$0xff] %v15902_v62  ;;  %v15910_v4 = vpack.c.bf16 %v19295_v6, %v19294_v56  ;;  %11028 = vmatmul.mubr.f32.gmra.mrb[4].mxu0 %v15828_v52  ;;  %13574 = vmatprep.subr.bf16.mxu1 %v15859_v3  ;;  %v15928_v56 = vand.u32 4294901760, %v545_v26  ;;  %v15930_v6 = vand.u32 4294901760, %v555_v2 }
  0x5b   :  { %v15916_v49 = vpack.c.bf16 %v19297_v21, %v19296_v51  ;;  %11364 = vmatmul.mubr.f32.gmra.mrb[4].mxu1 %v15828_v52  ;;  %13384 = vmatpush3.bf16.msra.mxu0 %v15859_v3  ;;  %v565_v51 = vsub.f32 %v15855_v10, %v15883_v1  ;;  %v575_v21 = vsub.f32 %v15861_v17, %v15902_v62  ;;  %v15939_v52 = vand.u32 4294901760, %v15885_v59 }
  0x5c   :  { %13576 = vmatpush3.bf16.msra.mxu1 %v15859_v3  ;;  %11030 = vmatprep.mubr.f32.mxu0 %v15846_v45  ;;  %v15942_v3 = vand.u32 4294901760, %v15904_v39  ;;  %v15952_v26 = vpack.c.bf16 %v15930_v6, %v15928_v56 }
  0x5d   :  { %11366 = vmatprep.mubr.f32.mxu1 %v15846_v45  ;;  %13386 = vmatprep.subr.bf16.mxu0 %v15873_v30  ;;  %19298 = vst [vmem:[#allocation55_spill] sm:$0xff] %v15939_v52  ;;  %v15956_v2 = vand.u32 4294901760, %v565_v51  ;;  %v15958_v45 = vand.u32 4294901760, %v575_v21 }
  0x5e   :  { %19299 = vst [vmem:[#allocation56_spill] sm:$0xff] %v15942_v3  ;;  %11031 = vmatmul.mubr.f32.gmra.mrb[6].mxu0 %v15848_v46  ;;  %13578 = vmatprep.subr.bf16.mxu1 %v15873_v30 }
  0x5f   :  { %11367 = vmatmul.mubr.f32.gmra.mrb[6].mxu1 %v15848_v46  ;;  %13388 = vmatpush3.bf16.msra.mxu0 %v15873_v30  ;;  %19300 = vst [vmem:[#allocation57_spill] sm:$0xff] %v15956_v2  ;;  %19301 = vst [vmem:[#allocation58_spill] sm:$0xff] %v15958_v45  ;;  %v585_v46 = vsub.f32 %v15885_v59, %v15939_v52  ;;  %v15974_v51 = vpack.c.bf16 %v15958_v45, %v15956_v2 }
  0x60   :  { %13580 = vmatpush3.bf16.msra.mxu1 %v15873_v30  ;;  %11033 = vmatprep.mubr.f32.mxu0 %v15875_v19  ;;  %v595_v30 = vsub.f32 %v15904_v39, %v15942_v3 }
  0x61   :  { %11369 = vmatprep.mubr.f32.mxu1 %v15875_v19  ;;  %13390 = vmatprep.subr.bf16.mxu0 %v15926_v28  ;;  %19302 = vst [vmem:[#allocation59_spill] sm:$0xff] %v15974_v51  ;;  %v15976_v21 = vand.u32 4294901760, %v585_v46 }
  0x62   :  { %11034 = vmatmul.mubr.f32.gmra.mrb[8].mxu0 %v15877_v20  ;;  %13582 = vmatprep.subr.bf16.mxu1 %v15926_v28  ;;  %v15978_v19 = vand.u32 4294901760, %v595_v30  ;;  %v13405_v30 = vpack.c.bf16 %v15442_v40, %v15434_v37  ;;  %v13409_v37 = vpack.c.bf16 %v15614_v9, %v15609_v5  ;;  %v13601_v40 = vpack.c.bf16 %v15654_v34, %v15642_v16 }
  0x63   :  { %11370 = vmatmul.mubr.f32.gmra.mrb[8].mxu1 %v15877_v20  ;;  %13392 = vmatpush3.bf16.msra.mxu0 %v15926_v28  ;;  %19303 = vst [vmem:[#allocation60_spill] sm:$0xff] %v15976_v21  ;;  %v16034_v9 = vpack.c.bf16 %v15755_v47, %v15732_v48  ;;  %v16054_v5 = vpack.c.bf16 %v15777_v54, %v15766_v25 }
  0x64   :  { %13584 = vmatpush3.bf16.msra.mxu1 %v15926_v28  ;;  %11036 = vmatprep.mubr.f32.mxu0 %v15928_v56  ;;  %19304 = vst [vmem:[#allocation61_spill] sm:$0xff] %v15978_v19  ;;  %v15990_v46 = vpack.c.bf16 %v15978_v19, %v15976_v21  ;;  %v16074_v16 = vpack.c.bf16 %v15819_v42, %v15807_v22 }
  0x65   :  { %11372 = vmatprep.mubr.f32.mxu1 %v15928_v56  ;;  %13394 = vmatprep.subr.bf16.mxu0 %v15952_v26  ;;  %19307 = vst [vmem:[#allocation64_spill] sm:$0xff] %v16034_v9  ;;  %19308 = vst [vmem:[#allocation65_spill] sm:$0xff] %v16054_v5  ;;  %v16094_v34 = vpack.c.bf16 %v15861_v17, %v15855_v10 }
  0x66   :  { %11037 = vmatmul.mubr.f32.gmra.mrb[10].mxu0 %v15930_v6  ;;  %13586 = vmatprep.subr.bf16.mxu1 %v15952_v26  ;;  %19305 = vst [vmem:[#allocation62_spill] sm:$0xff] %v15990_v46  ;;  %19309 = vst [vmem:[#allocation66_spill] sm:$0xff] %v16074_v16 }
  0x67   :  { %11373 = vmatmul.mubr.f32.gmra.mrb[10].mxu1 %v15930_v6  ;;  %13396 = vmatpush3.bf16.msra.mxu0 %v15952_v26  ;;  %19310 = vst [vmem:[#allocation67_spill] sm:$0xff] %v16094_v34 }
  0x68   :  { %13588 = vmatpush3.bf16.msra.mxu1 %v15952_v26  ;;  %11039 = vmatprep.mubr.f32.mxu0 %v15956_v2 }
  0x69   :  { %11375 = vmatprep.mubr.f32.mxu1 %v15956_v2  ;;  %13398 = vmatprep.subr.bf16.mxu0 %v15974_v51 }
  0x6a   :  { %11040 = vmatmul.mubr.f32.gmra.mrb[12].mxu0 %v15958_v45  ;;  %13590 = vmatprep.subr.bf16.mxu1 %v15974_v51 }
  0x6b   :  { %11376 = vmatmul.mubr.f32.gmra.mrb[12].mxu1 %v15958_v45  ;;  %13400 = vmatpush3.bf16.msra.mxu0 %v15974_v51  ;;  %v13597_v45 = vpack.c.bf16 %v15481_v53, %v15474_v50  ;;  %v16021_v50 = vpack.c.bf16 %v15705_v7, %v15703_v63  ;;  %v18982_v53 = vmov 1.0  }
  0x6c   :  { %13592 = vmatpush3.bf16.msra.mxu1 %v15974_v51  ;;  %11042 = vmatprep.mubr.f32.mxu0 %v15976_v21  ;;  %v19325_v51 = vmov 1.0|1.0  }
  0x6d   :  { %11378 = vmatprep.mubr.f32.mxu1 %v15976_v21  ;;  %13402 = vmatprep.subr.bf16.mxu0 %v15990_v46  ;;  %19306 = vst [vmem:[#allocation63_spill] sm:$0xff] %v16021_v50  ;;  %v19324_v21 = vld [vmem:[#allocation29_spill] sm:$0xff] }
  0x6e   :  { %11043 = vmatmul.mubr.f32.gmra.mrb[14].mxu0 %v15978_v19  ;;  %13594 = vmatprep.subr.bf16.mxu1 %v15990_v46 }
  0x6f   :  { %11379 = vmatmul.mubr.f32.gmra.mrb[14].mxu1 %v15978_v19  ;;  %13404 = vmatpush3.bf16.msra.mxu0 %v15990_v46  ;;  %v19322_v19 = vld [vmem:[#allocation27_spill] sm:$0xff] }
  0x70   :  { %13596 = vmatpush3.bf16.msra.mxu1 %v15990_v46  ;;  %11077 = vmatprep.mubr.f32.mxu0 %v15425_v33  ;;  %v19323_v46 = vld [vmem:[#allocation15_spill] sm:$0xff] }
  0x71   :  { %11413 = vmatprep.mubr.f32.mxu1 %v15430_v35  ;;  %13406 = vmatprep.subr.bf16.mxu0 %v13405_v30 }
  0x72   :  { %11078 = vmatmul.mubr.f32.vlgmr.msra.gmra.mrb[0].mxu0 %v15432_v36  ;;  %13598 = vmatprep.subr.bf16.mxu1 %v13597_v45 }
  0x73   :  { %11414 = vmatmul.mubr.f32.vlgmr.msra.gmra.mrb[0].mxu1 %v15444_v41  ;;  %13408 = vmatpush3.bf16.msra.mxu0 %v13405_v30  ;;  %v16114_v30 = vpack.c.bf16 %v15904_v39, %v15885_v59 }
  0x74   :  { %13600 = vmatpush3.bf16.msra.mxu1 %v13597_v45  ;;  %11080 = vmatprep.mubr.f32.mxu0 %v15530_v11 }
  0x75   :  { %11416 = vmatprep.mubr.f32.mxu1 %v15548_v23  ;;  %13410 = vmatprep.subr.bf16.mxu0 %v13409_v37  ;;  %19312 = vst [vmem:[#allocation22_spill] sm:$0xff] %v16114_v30 }
  0x76   :  { %11081 = vmatmul.mubr.f32.gmra.mrb[2].mxu0 %v15595_v8  ;;  %13602 = vmatprep.subr.bf16.mxu1 %v13601_v40 }
  0x77   :  { %11417 = vmatmul.mubr.f32.gmra.mrb[2].mxu1 %v15637_v15  ;;  %13412 = vmatpush3.bf16.msra.mxu0 %v13409_v37  ;;  %v19313_v37 = vld [vmem:[#allocation16_spill] sm:$0xff] }
  0x78   :  { %13604 = vmatpush3.bf16.msra.mxu1 %v13601_v40  ;;  %11083 = vmatprep.mubr.msk.f32.mxu0 %vm15416_vm0, %v18982_v53  ;;  %v19314_v40 = vld [vmem:[#allocation18_spill] sm:$0xff] }
  0x79   :  { %11419 = vmatprep.mubr.msk.f32.mxu1 %vm15416_vm0, %v18982_v53  ;;  %13414 = vmatprep.subr.bf16.mxu0 %v16021_v50 }
  0x7a   :  { %11084 = vmatmul.mubr.msk.f32.gmra.mrb[4].mxu0 %vm15421_vm1, %v18982_v53  ;;  %13606 = vmatprep.subr.bf16.mxu1 %v16021_v50 }
  0x7b   :  { %11420 = vmatmul.mubr.msk.f32.gmra.mrb[4].mxu1 %vm15421_vm1, %v18982_v53  ;;  %13416 = vmatpush3.bf16.msra.mxu0 %v16021_v50 }
  0x7c   :  { %13608 = vmatpush3.bf16.msra.mxu1 %v16021_v50  ;;  %11086 = vmatprep.mubr.msk.f32.mxu0 %vm15456_vm3, %v18982_v53  ;;  %v19320_v50 = vld [vmem:[#allocation25_spill] sm:$0xff] }
  0x7d   :  { %11422 = vmatprep.mubr.msk.f32.mxu1 %vm15456_vm3, %v18982_v53  ;;  %13418 = vmatprep.subr.bf16.mxu0 %v16034_v9 }
  0x7e   :  { %11087 = vmatmul.mubr.msk.f32.gmra.mrb[6].mxu0 %vm15461_vm4, %v18982_v53  ;;  %13610 = vmatprep.subr.bf16.mxu1 %v16034_v9 }
  0x7f   :  { %11423 = vmatmul.mubr.msk.f32.gmra.mrb[6].mxu1 %vm15461_vm4, %v18982_v53  ;;  %13420 = vmatpush3.bf16.msra.mxu0 %v16034_v9 }
  0x80   :  { %13612 = vmatpush3.bf16.msra.mxu1 %v16034_v9  ;;  %11089 = vmatprep.mubr.msk.f32.mxu0 %vm15488_vm5, %v18982_v53  ;;  %v19318_v9 = vld [vmem:[#allocation20_spill] sm:$0xff] }
  0x81   :  { %11425 = vmatprep.mubr.msk.f32.mxu1 %vm15488_vm5, %v18982_v53  ;;  %13422 = vmatprep.subr.bf16.mxu0 %v16054_v5 }
  0x82   :  { %11090 = vmatmul.mubr.msk.f32.gmra.mrb[8].mxu0 %vm15509_vm7, %v18982_v53  ;;  %13614 = vmatprep.subr.bf16.mxu1 %v16054_v5 }
  0x83   :  { %11426 = vmatmul.mubr.msk.f32.gmra.mrb[8].mxu1 %vm15509_vm7, %v18982_v53  ;;  %13424 = vmatpush3.bf16.msra.mxu0 %v16054_v5 }
  0x84   :  { %13616 = vmatpush3.bf16.msra.mxu1 %v16054_v5  ;;  %11092 = vmatprep.mubr.msk.f32.mxu0 %vm15539_vm8, %v18982_v53  ;;  %v19317_v5 = vld [vmem:[#allocation13_spill] sm:$0xff] }
  0x85   :  { %11428 = vmatprep.mubr.msk.f32.mxu1 %vm15539_vm8, %v18982_v53  ;;  %13426 = vmatprep.subr.bf16.mxu0 %v16074_v16 }
  0x86   :  { %11093 = vmatmul.mubr.msk.f32.gmra.mrb[10].mxu0 %vm15544_vm9, %v18982_v53  ;;  %13618 = vmatprep.subr.bf16.mxu1 %v16074_v16 }
  0x87   :  { %11429 = vmatmul.mubr.msk.f32.gmra.mrb[10].mxu1 %vm15544_vm9, %v18982_v53  ;;  %13428 = vmatpush3.bf16.msra.mxu0 %v16074_v16 }
  0x88   :  { %13620 = vmatpush3.bf16.msra.mxu1 %v16074_v16  ;;  %11095 = vmatprep.mubr.msk.f32.mxu0 %vm15563_vm11, %v18982_v53  ;;  %v19316_v16 = vld [vmem:[#allocation19_spill] sm:$0xff] }
  0x89   :  { %11431 = vmatprep.mubr.msk.f32.mxu1 %vm15563_vm11, %v18982_v53  ;;  %13430 = vmatprep.subr.bf16.mxu0 %v16094_v34 }
  0x8a   :  { %11096 = vmatmul.mubr.msk.f32.gmra.mrb[12].mxu0 %vm15628_vm13, %v18982_v53  ;;  %13622 = vmatprep.subr.bf16.mxu1 %v16094_v34 }
  0x8b   :  { %11432 = vmatmul.mubr.msk.f32.gmra.mrb[12].mxu1 %vm15628_vm13, %v18982_v53  ;;  %13432 = vmatpush3.bf16.msra.mxu0 %v16094_v34 }
  0x8c   :  { %13624 = vmatpush3.bf16.msra.mxu1 %v16094_v34  ;;  %11098 = vmatprep.mubr.msk.f32.mxu0 %vm15633_vm14, %v18982_v53  ;;  %v19315_v34 = vld [vmem:[#allocation12_spill] sm:$0xff] }
  0x8d   :  { %11434 = vmatprep.mubr.msk.f32.mxu1 %vm15633_vm14, %v18982_v53  ;;  %13434 = vmatprep.subr.bf16.mxu0 %v16114_v30 }
  0x8e   :  { %11099 = vmatmul.mubr.msk.f32.gmra.mrb[14].mxu0 %vm15645_vm15, %v18982_v53  ;;  %13626 = vmatprep.subr.bf16.mxu1 %v16114_v30 }
  0x8f   :  { %11435 = vmatmul.mubr.msk.f32.gmra.mrb[14].mxu1 %vm15645_vm15, %v18982_v53  ;;  %13436 = vmatpush3.bf16.msra.mxu0 %v16114_v30  ;;  %v19319_v53 = vld [vmem:[#allocation24_spill] sm:$0xff] }
  0x90   :  { %13628 = vmatpush3.bf16.msra.mxu1 %v16114_v30  ;;  %11133 = vmatprep.mubr.f32.mxu0 %v19313_v37  ;;  %v19321_v30 = vld [vmem:[#allocation14_spill] sm:$0xff] }
  0x91   :  { %11469 = vmatprep.mubr.f32.mxu1 %v19314_v40  ;;  %13438 = vmatprep.subr.bf16.mxu0 %v19315_v34 }
  0x92   :  { %11134 = vmatmul.mubr.f32.vlgmr.msra.gmra.mrb[0].mxu0 %v19316_v16  ;;  %13630 = vmatprep.subr.bf16.mxu1 %v19317_v5 }
  0x93   :  { %11470 = vmatmul.mubr.f32.vlgmr.msra.gmra.mrb[0].mxu1 %v19318_v9  ;;  %13440 = vmatpush3.bf16.msra.mxu0 %v19315_v34 }
  0x94   :  { %13632 = vmatpush3.bf16.msra.mxu1 %v19317_v5  ;;  %11136 = vmatprep.mubr.f32.mxu0 %v19319_v53 }
  0x95   :  { %11472 = vmatprep.mubr.f32.mxu1 %v19320_v50  ;;  %13442 = vmatprep.subr.bf16.mxu0 %v19321_v30 }
  0x96   :  { %11137 = vmatmul.mubr.f32.gmra.mrb[2].mxu0 %v19322_v19  ;;  %13634 = vmatprep.subr.bf16.mxu1 %v19323_v46 }
  0x97   :  { %11473 = vmatmul.mubr.f32.gmra.mrb[2].mxu1 %v19324_v21  ;;  %13444 = vmatpush3.bf16.msra.mxu0 %v19321_v30 }
  0x98   :  { %13636 = vmatpush3.bf16.msra.mxu1 %v19323_v46  ;;  %11139 = vmatprep.mubr.f32.mxu0 %v15703_v63 }
  0x99   :  { %11475 = vmatprep.mubr.f32.mxu1 %v15703_v63  ;;  %13446 = vmatprep.subr.msk.bf16.mxu0 %vm15451_vm2, %v19325_v51  ;;  %v19327_v63 = vld [vmem:[#allocation21_spill] sm:$0xff] }
  0x9a   :  { %11140 = vmatmul.mubr.f32.gmra.mrb[4].mxu0 %v15705_v7  ;;  %13638 = vmatprep.subr.msk.bf16.mxu1 %vm15451_vm2, %v19325_v51 }
  0x9b   :  { %11476 = vmatmul.mubr.f32.gmra.mrb[4].mxu1 %v15705_v7  ;;  %13448 = vmatpush3.bf16.msk.msra.mxu0 %vm15451_vm2, %v19325_v51 }
  0x9c   :  { %13640 = vmatpush3.bf16.msk.msra.mxu1 %vm15451_vm2, %v19325_v51  ;;  %11142 = vmatprep.mubr.f32.mxu0 %v15732_v48 }
  0x9d   :  { %11478 = vmatprep.mubr.f32.mxu1 %v15732_v48  ;;  %13450 = vmatprep.subr.msk.bf16.mxu0 %vm15504_vm6, %v19325_v51  ;;  %v19328_v48 = vld [vmem:[#allocation23_spill] sm:$0xff] }
  0x9e   :  { %11143 = vmatmul.mubr.f32.gmra.mrb[6].mxu0 %v15755_v47  ;;  %13642 = vmatprep.subr.msk.bf16.mxu1 %vm15504_vm6, %v19325_v51  ;;  %vm19329_vm15 = vnez %v19328_v48 }
  0x9f   :  { %11479 = vmatmul.mubr.f32.gmra.mrb[6].mxu1 %v15755_v47  ;;  %13452 = vmatpush3.bf16.msk.msra.mxu0 %vm15504_vm6, %v19325_v51 }
  0xa0   :  { %13644 = vmatpush3.bf16.msk.msra.mxu1 %vm15504_vm6, %v19325_v51  ;;  %11145 = vmatprep.mubr.f32.mxu0 %v15766_v25 }
  0xa1   :  { %11481 = vmatprep.mubr.f32.mxu1 %v15766_v25  ;;  %13454 = vmatprep.subr.msk.bf16.mxu0 %vm19329_vm15, %v19325_v51  ;;  %v19330_v25 = vld [vmem:[#allocation26_spill] sm:$0xff] }
  0xa2   :  { %11146 = vmatmul.mubr.f32.gmra.mrb[8].mxu0 %v15777_v54  ;;  %13646 = vmatprep.subr.msk.bf16.mxu1 %vm19329_vm15, %v19325_v51  ;;  %vm19331_vm14 = vnez %v19330_v25 }
  0xa3   :  { %11482 = vmatmul.mubr.f32.gmra.mrb[8].mxu1 %v15777_v54  ;;  %13456 = vmatpush3.bf16.msk.msra.mxu0 %vm19329_vm15, %v19325_v51 }
  0xa4   :  { %13648 = vmatpush3.bf16.msk.msra.mxu1 %vm19329_vm15, %v19325_v51  ;;  %11148 = vmatprep.mubr.f32.mxu0 %v15807_v22 }
  0xa5   :  { %11484 = vmatprep.mubr.f32.mxu1 %v15807_v22  ;;  %13458 = vmatprep.subr.msk.bf16.mxu0 %vm19331_vm14, %v19325_v51 }
  0xa6   :  { %11149 = vmatmul.mubr.f32.gmra.mrb[10].mxu0 %v15819_v42  ;;  %13650 = vmatprep.subr.msk.bf16.mxu1 %vm19331_vm14, %v19325_v51 }
  0xa7   :  { %11485 = vmatmul.mubr.f32.gmra.mrb[10].mxu1 %v15819_v42  ;;  %13460 = vmatpush3.bf16.msk.msra.mxu0 %vm19331_vm14, %v19325_v51  ;;  %v19336_v42 = vand.u32 4294901760, %v19316_v16  ;;  %v19341_v16 = vld [vmem:[#allocation34_spill] sm:$0xff] }
  0xa8   :  { %13652 = vmatpush3.bf16.msk.msra.mxu1 %vm19331_vm14, %v19325_v51  ;;  %11151 = vmatprep.mubr.f32.mxu0 %v15855_v10 }
  0xa9   :  { %11487 = vmatprep.mubr.f32.mxu1 %v15855_v10  ;;  %13462 = vmatprep.subr.msk.bf16.mxu0 %vm15683_vm10, %v19325_v51 }
  0xaa   :  { %11152 = vmatmul.mubr.f32.gmra.mrb[12].mxu0 %v15861_v17  ;;  %13654 = vmatprep.subr.msk.bf16.mxu1 %vm15683_vm10, %v19325_v51 }
  0xab   :  { %11488 = vmatmul.mubr.f32.gmra.mrb[12].mxu1 %v15861_v17  ;;  %13464 = vmatpush3.bf16.msk.msra.mxu0 %vm15683_vm10, %v19325_v51  ;;  %v19335_v17 = vand.u32 4294901760, %v19314_v40  ;;  %v19342_v40 = vand.u32 4294901760, %v19322_v19  ;;  %v16298_v19 = vpack.c.bf16 %v15817_v18, %v15805_v38 }
  0xac   :  { %13656 = vmatpush3.bf16.msk.msra.mxu1 %vm15683_vm10, %v19325_v51  ;;  %11154 = vmatprep.mubr.f32.mxu0 %v15885_v59 }
  0xad   :  { %11490 = vmatprep.mubr.f32.mxu1 %v15885_v59  ;;  %13466 = vmatprep.subr.msk.bf16.mxu0 %vm15744_vm12, %v19325_v51  ;;  %v19334_v59 = vand.u32 4294901760, %v19313_v37  ;;  %v19338_v37 = vand.u32 4294901760, %v19319_v53  ;;  %v19349_v53 = vmov 1.0  }
  0xae   :  { %11155 = vmatmul.mubr.f32.gmra.mrb[14].mxu0 %v15904_v39  ;;  %13658 = vmatprep.subr.msk.bf16.mxu1 %vm15744_vm12, %v19325_v51 }
  0xaf   :  { %11491 = vmatmul.mubr.f32.gmra.mrb[14].mxu1 %v15904_v39  ;;  %13468 = vmatpush3.bf16.msk.msra.mxu0 %vm15744_vm12, %v19325_v51  ;;  %v19337_v39 = vand.u32 4294901760, %v19318_v9  ;;  %v229_v9 = vld [vmem:[#allocation3 + $0x88] sm:$0xff] }
  0xb0   :  { %13660 = vmatpush3.bf16.msk.msra.mxu1 %vm15744_vm12, %v19325_v51  ;;  %11189 = vmatprep.mubr.f32.mxu0 %v19334_v59  ;;  %v19339_v59 = vand.u32 4294901760, %v19320_v50 }
  0xb1   :  { %11525 = vmatprep.mubr.f32.mxu1 %v19335_v17  ;;  %13470 = vmatprep.subr.bf16.mxu0 %v15891_v60  ;;  %v19340_v17 = vld [vmem:[#allocation33_spill] sm:$0xff] }
  0xb2   :  { %11190 = vmatmul.mubr.f32.vlgmr.msra.gmra.mrb[0].mxu0 %v19336_v42  ;;  %13662 = vmatprep.subr.bf16.mxu1 %v15897_v24  ;;  %v16272_v42 = vpack.c.bf16 %v19341_v16, %v19340_v17 }
  0xb3   :  { %11526 = vmatmul.mubr.f32.vlgmr.msra.gmra.mrb[0].mxu1 %v19337_v39  ;;  %13472 = vmatpush3.bf16.msra.mxu0 %v15891_v60  ;;  %v19343_v60 = vand.u32 4294901760, %v19324_v21  ;;  %v19345_v39 = vld [vmem:[#allocation37_spill] sm:$0xff]  ;;  %v16334_v21 = vpack.c.bf16 %v15942_v3, %v15939_v52 }
  0xb4   :  { %13664 = vmatpush3.bf16.msra.mxu1 %v15897_v24  ;;  %11192 = vmatprep.mubr.f32.mxu0 %v19338_v37  ;;  %v19344_v24 = vld [vmem:[#allocation36_spill] sm:$0xff]  ;;  %v231_v37 = vld [vmem:[#allocation3 + $0x98] sm:$0xff] }
  0xb5   :  { %11528 = vmatprep.mubr.f32.mxu1 %v19339_v59  ;;  %13474 = vmatprep.subr.bf16.mxu0 %v15910_v4  ;;  %v16286_v50 = vpack.c.bf16 %v19345_v39, %v19344_v24  ;;  %19348 = vst [vmem:[#allocation12_spill] sm:$0xff] %v16334_v21 }
  0xb6   :  { %11193 = vmatmul.mubr.f32.gmra.mrb[2].mxu0 %v19342_v40  ;;  %13666 = vmatprep.subr.bf16.mxu1 %v15916_v49 }
  0xb7   :  { %11529 = vmatmul.mubr.f32.gmra.mrb[2].mxu1 %v19343_v60  ;;  %13476 = vmatpush3.bf16.msra.mxu0 %v15910_v4  ;;  %v16310_v4 = vpack.c.bf16 %v15853_v57, %v15838_v27  ;;  %v2943_v60 = vand.u32 4294901760, %v231_v37 }
  0xb8   :  { %13668 = vmatpush3.bf16.msra.mxu1 %v15916_v49  ;;  %11195 = vmatprep.mubr.f32.mxu0 %v19340_v17  ;;  %v16322_v49 = vpack.c.bf16 %v15902_v62, %v15883_v1 }
  0xb9   :  { %11531 = vmatprep.mubr.f32.mxu1 %v19340_v17  ;;  %13478 = vmatprep.subr.bf16.mxu0 %v16272_v42  ;;  %19346 = vst [vmem:[#allocation16_spill] sm:$0xff] %v16310_v4 }
  0xba   :  { %11196 = vmatmul.mubr.f32.gmra.mrb[4].mxu0 %v19341_v16  ;;  %13670 = vmatprep.subr.bf16.mxu1 %v16272_v42  ;;  %19347 = vst [vmem:[#allocation18_spill] sm:$0xff] %v16322_v49 }
  0xbb   :  { %11532 = vmatmul.mubr.f32.gmra.mrb[4].mxu1 %v19341_v16  ;;  %13480 = vmatpush3.bf16.msra.mxu0 %v16272_v42 }
  0xbc   :  { %13672 = vmatpush3.bf16.msra.mxu1 %v16272_v42  ;;  %11198 = vmatprep.mubr.f32.mxu0 %v19344_v24 }
  0xbd   :  { %11534 = vmatprep.mubr.f32.mxu1 %v19344_v24  ;;  %13482 = vmatprep.subr.bf16.mxu0 %v16286_v50 }
  0xbe   :  { %11199 = vmatmul.mubr.f32.gmra.mrb[6].mxu0 %v19345_v39  ;;  %13674 = vmatprep.subr.bf16.mxu1 %v16286_v50 }
  0xbf   :  { %11535 = vmatmul.mubr.f32.gmra.mrb[6].mxu1 %v19345_v39  ;;  %13484 = vmatpush3.bf16.msra.mxu0 %v16286_v50 }
  0xc0   :  { %13676 = vmatpush3.bf16.msra.mxu1 %v16286_v50  ;;  %11201 = vmatprep.mubr.f32.mxu0 %v15805_v38 }
  0xc1   :  { %11537 = vmatprep.mubr.f32.mxu1 %v15805_v38  ;;  %13486 = vmatprep.subr.bf16.mxu0 %v16298_v19 }
  0xc2   :  { %11202 = vmatmul.mubr.f32.gmra.mrb[8].mxu0 %v15817_v18  ;;  %13678 = vmatprep.subr.bf16.mxu1 %v16298_v19 }
  0xc3   :  { %11538 = vmatmul.mubr.f32.gmra.mrb[8].mxu1 %v15817_v18  ;;  %13488 = vmatpush3.bf16.msra.mxu0 %v16298_v19 }
  0xc4   :  { %13680 = vmatpush3.bf16.msra.mxu1 %v16298_v19  ;;  %11204 = vmatprep.mubr.f32.mxu0 %v15838_v27 }
  0xc5   :  { %11540 = vmatprep.mubr.f32.mxu1 %v15838_v27  ;;  %13490 = vmatprep.subr.bf16.mxu0 %v16310_v4 }
  0xc6   :  { %11205 = vmatmul.mubr.f32.gmra.mrb[10].mxu0 %v15853_v57  ;;  %13682 = vmatprep.subr.bf16.mxu1 %v16310_v4 }
  0xc7   :  { %11541 = vmatmul.mubr.f32.gmra.mrb[10].mxu1 %v15853_v57  ;;  %13492 = vmatpush3.bf16.msra.mxu0 %v16310_v4 }
  0xc8   :  { %13684 = vmatpush3.bf16.msra.mxu1 %v16310_v4  ;;  %11207 = vmatprep.mubr.f32.mxu0 %v15883_v1 }
  0xc9   :  { %11543 = vmatprep.mubr.f32.mxu1 %v15883_v1  ;;  %13494 = vmatprep.subr.bf16.mxu0 %v16322_v49 }
  0xca   :  { %11208 = vmatmul.mubr.f32.gmra.mrb[12].mxu0 %v15902_v62  ;;  %13686 = vmatprep.subr.bf16.mxu1 %v16322_v49 }
  0xcb   :  { %11544 = vmatmul.mubr.f32.gmra.mrb[12].mxu1 %v15902_v62  ;;  %13496 = vmatpush3.bf16.msra.mxu0 %v16322_v49 }
  0xcc   :  { %13688 = vmatpush3.bf16.msra.mxu1 %v16322_v49  ;;  %11210 = vmatprep.mubr.f32.mxu0 %v15939_v52 }
  0xcd   :  { %11546 = vmatprep.mubr.f32.mxu1 %v15939_v52  ;;  %13498 = vmatprep.subr.bf16.mxu0 %v16334_v21 }
  0xce   :  { %11211 = vmatmul.mubr.f32.gmra.mrb[14].mxu0 %v15942_v3  ;;  %13690 = vmatprep.subr.bf16.mxu1 %v16334_v21 }
  0xcf   :  { %11547 = vmatmul.mubr.f32.gmra.mrb[14].mxu1 %v15942_v3  ;;  %13500 = vmatpush3.bf16.msra.mxu0 %v16334_v21 }
  0xd0   :  { %13692 = vmatpush3.bf16.msra.mxu1 %v16334_v21  ;;  %11245 = vmatprep.mubr.f32.mxu0 %v15425_v33  ;;  %v16587_v21 = vsub.f32 %v231_v37, %v2943_v60 }
  0xd1   :  { %11581 = vmatprep.mubr.f32.mxu1 %v15430_v35  ;;  %13502 = vmatprep.subr.bf16.mxu0 %v19315_v34 }
  0xd2   :  { %11246 = vmatmul.mubr.f32.vlgmr.msra.gmra.mrb[0].mxu0 %v15432_v36  ;;  %13694 = vmatprep.subr.bf16.mxu1 %v19317_v5  ;;  %v19357_v1 = vand.u32 4294901760, %v16587_v21 }
  0xd3   :  { %11582 = vmatmul.mubr.f32.vlgmr.msra.gmra.mrb[0].mxu1 %v15444_v41  ;;  %13504 = vmatpush3.bf16.msra.mxu0 %v19315_v34  ;;  %v2937_v34 = vand.u32 4294901760, %v229_v9 }
  0xd4   :  { %13696 = vmatpush3.bf16.msra.mxu1 %v19317_v5  ;;  %11248 = vmatprep.mubr.f32.mxu0 %v15530_v11  ;;  %v3199_v57 = vsub.f32 %v16587_v21, %v19357_v1 }
  0xd5   :  { %11584 = vmatprep.mubr.f32.mxu1 %v15548_v23  ;;  %13506 = vmatprep.subr.bf16.mxu0 %v19321_v30 }
  0xd6   :  { %11249 = vmatmul.mubr.f32.gmra.mrb[2].mxu0 %v15595_v8  ;;  %13698 = vmatprep.subr.bf16.mxu1 %v19323_v46  ;;  %v3200_v27 = vand.u32 4294901760, %v3199_v57 }
  0xd7   :  { %11585 = vmatmul.mubr.f32.gmra.mrb[2].mxu1 %v15637_v15  ;;  %13508 = vmatpush3.bf16.msra.mxu0 %v19321_v30  ;;  %v230_v30 = vld [vmem:[#allocation3 + $0x90] sm:$0xff] }
  0xd8   :  { %13700 = vmatpush3.bf16.msra.mxu1 %v19323_v46  ;;  %11251 = vmatprep.mubr.msk.f32.mxu0 %vm15416_vm0, %v19349_v53  ;;  %v228_v46 = vld [vmem:[#allocation3 + $0x80] sm:$0xff]  ;;  %v2940_v40 = vand.u32 4294901760, %v230_v30 }
  0xd9   :  { %11587 = vmatprep.mubr.msk.f32.mxu1 %vm15416_vm0, %v19349_v53  ;;  %13510 = vmatprep.subr.msk.bf16.mxu0 %vm15451_vm2, %v19325_v51  ;;  %v2934_v5 = vand.u32 4294901760, %v228_v46 }
  0xda   :  { %11252 = vmatmul.mubr.msk.f32.gmra.mrb[4].mxu0 %vm15421_vm1, %v19349_v53  ;;  %13702 = vmatprep.subr.msk.bf16.mxu1 %vm15451_vm2, %v19325_v51  ;;  %v16514_v3 = vpack.c.bf16 %v2943_v60, %v2940_v40 }
  0xdb   :  { %11588 = vmatmul.mubr.msk.f32.gmra.mrb[4].mxu1 %vm15421_vm1, %v19349_v53  ;;  %13512 = vmatpush3.bf16.msk.msra.mxu0 %vm15451_vm2, %v19325_v51  ;;  %v16494_v59 = vpack.c.bf16 %v2937_v34, %v2934_v5 }
  0xdc   :  { %13704 = vmatpush3.bf16.msk.msra.mxu1 %vm15451_vm2, %v19325_v51  ;;  %11254 = vmatprep.mubr.msk.f32.mxu0 %vm15456_vm3, %v19349_v53 }
  0xdd   :  { %11590 = vmatprep.mubr.msk.f32.mxu1 %vm15456_vm3, %v19349_v53  ;;  %13514 = vmatprep.subr.msk.bf16.mxu0 %vm15504_vm6, %v19325_v51 }
  0xde   :  { %11255 = vmatmul.mubr.msk.f32.gmra.mrb[6].mxu0 %vm15461_vm4, %v19349_v53  ;;  %13706 = vmatprep.subr.msk.bf16.mxu1 %vm15504_vm6, %v19325_v51 }
  0xdf   :  { %11591 = vmatmul.mubr.msk.f32.gmra.mrb[6].mxu1 %vm15461_vm4, %v19349_v53  ;;  %13516 = vmatpush3.bf16.msk.msra.mxu0 %vm15504_vm6, %v19325_v51 }
  0xe0   :  { %13708 = vmatpush3.bf16.msk.msra.mxu1 %vm15504_vm6, %v19325_v51  ;;  %11257 = vmatprep.mubr.msk.f32.mxu0 %vm15488_vm5, %v19349_v53 }
  0xe1   :  { %11593 = vmatprep.mubr.msk.f32.mxu1 %vm15488_vm5, %v19349_v53  ;;  %13518 = vmatprep.subr.msk.bf16.mxu0 %vm19329_vm15, %v19325_v51 }
  0xe2   :  { %11258 = vmatmul.mubr.msk.f32.gmra.mrb[8].mxu0 %vm15509_vm7, %v19349_v53  ;;  %13710 = vmatprep.subr.msk.bf16.mxu1 %vm19329_vm15, %v19325_v51 }
  0xe3   :  { %11594 = vmatmul.mubr.msk.f32.gmra.mrb[8].mxu1 %vm15509_vm7, %v19349_v53  ;;  %13520 = vmatpush3.bf16.msk.msra.mxu0 %vm19329_vm15, %v19325_v51 }
  0xe4   :  { %13712 = vmatpush3.bf16.msk.msra.mxu1 %vm19329_vm15, %v19325_v51  ;;  %11260 = vmatprep.mubr.msk.f32.mxu0 %vm15539_vm8, %v19349_v53 }
  0xe5   :  { %11596 = vmatprep.mubr.msk.f32.mxu1 %vm15539_vm8, %v19349_v53  ;;  %13522 = vmatprep.subr.msk.bf16.mxu0 %vm19331_vm14, %v19325_v51 }
  0xe6   :  { %11261 = vmatmul.mubr.msk.f32.gmra.mrb[10].mxu0 %vm15544_vm9, %v19349_v53  ;;  %13714 = vmatprep.subr.msk.bf16.mxu1 %vm19331_vm14, %v19325_v51 }
  0xe7   :  { %11597 = vmatmul.mubr.msk.f32.gmra.mrb[10].mxu1 %vm15544_vm9, %v19349_v53  ;;  %13524 = vmatpush3.bf16.msk.msra.mxu0 %vm19331_vm14, %v19325_v51 }
  0xe8   :  { %13716 = vmatpush3.bf16.msk.msra.mxu1 %vm19331_vm14, %v19325_v51  ;;  %11263 = vmatprep.mubr.msk.f32.mxu0 %vm15563_vm11, %v19349_v53 }
  0xe9   :  { %11599 = vmatprep.mubr.msk.f32.mxu1 %vm15563_vm11, %v19349_v53  ;;  %13526 = vmatprep.subr.msk.bf16.mxu0 %vm15683_vm10, %v19325_v51  ;;  %vm19350_vm11 = vnez %v19246_v13 }
  0xea   :  { %11264 = vmatmul.mubr.msk.f32.gmra.mrb[12].mxu0 %vm15628_vm13, %v19349_v53  ;;  %13718 = vmatprep.subr.msk.bf16.mxu1 %vm15683_vm10, %v19325_v51 }
  0xeb   :  { %11600 = vmatmul.mubr.msk.f32.gmra.mrb[12].mxu1 %vm15628_vm13, %v19349_v53  ;;  %13528 = vmatpush3.bf16.msk.msra.mxu0 %vm15683_vm10, %v19325_v51  ;;  %vm19351_vm13 = vnez %v19248_v0 }
  0xec   :  { %13720 = vmatpush3.bf16.msk.msra.mxu1 %vm15683_vm10, %v19325_v51  ;;  %11266 = vmatprep.mubr.msk.f32.mxu0 %vm19350_vm11, %v19349_v53 }
  0xed   :  { %11602 = vmatprep.mubr.msk.f32.mxu1 %vm19350_vm11, %v19349_v53  ;;  %13530 = vmatprep.subr.msk.bf16.mxu0 %vm15744_vm12, %v19325_v51 }
  0xee   :  { %11267 = vmatmul.mubr.msk.f32.gmra.mrb[14].mxu0 %vm19351_vm13, %v19349_v53  ;;  %13722 = vmatprep.subr.msk.bf16.mxu1 %vm15744_vm12, %v19325_v51 }
  0xef   :  { %11603 = vmatmul.mubr.msk.f32.gmra.mrb[14].mxu1 %vm19351_vm13, %v19349_v53  ;;  %13532 = vmatpush3.bf16.msk.msra.mxu0 %vm15744_vm12, %v19325_v51 }
  0xf0   :  { %13724 = vmatpush3.bf16.msk.msra.mxu1 %vm15744_vm12, %v19325_v51  ;;  %11301 = vmatprep.mubr.f32.mxu0 %v15425_v33  ;;  %v232_v33 = vld [vmem:[#allocation3 + $0xa0] sm:$0xff] }
  0xf1   :  { %11637 = vmatprep.mubr.f32.mxu1 %v15430_v35  ;;  %13726 = vmatprep.subr.bf16.mxu0 %v16494_v59  ;;  %v16543_v35 = vand.u32 4294901760, %v232_v33 }
  0xf2   :  { %11302 = vmatmul.mubr.f32.vlgmr.msra.gmra.mrb[0].mxu0 %v15432_v36  ;;  %v233_v36 = vld [vmem:[#allocation3 + $0xa8] sm:$0xff] }
  0xf3   :  { %11638 = vmatmul.mubr.f32.vlgmr.msra.gmra.mrb[0].mxu1 %v15444_v41  ;;  %11304 = vmatprep.mubr.f32.mxu0 %v15530_v11  ;;  %v16554_v41 = vsub.f32 %v228_v46, %v2934_v5  ;;  %v16556_v11 = vsub.f32 %v229_v9, %v2937_v34  ;;  %v235_v9 = vld [vmem:[#allocation3 + $0xb8] sm:$0xff] }
  0xf4   :  { %11640 = vmatprep.mubr.f32.mxu1 %v15548_v23  ;;  %13728 = vmatpush3.bf16.msra.mxu0 %v16494_v59  ;;  %v234_v23 = vld [vmem:[#allocation3 + $0xb0] sm:$0xff] }
  0xf5   :  { %13730 = vmatprep.subr.bf16.mxu0 %v16514_v3  ;;  %v16578_v46 = vand.u32 4294901760, %v234_v23 }
  0xf6   :  { %11305 = vmatmul.mubr.f32.gmra.mrb[2].mxu0 %v15595_v8  ;;  %v16568_v8 = vsub.f32 %v232_v33, %v16543_v35  ;;  %v16585_v33 = vsub.f32 %v230_v30, %v2940_v40  ;;  %v16602_v30 = vand.u32 4294901760, %v235_v9  ;;  %v19352_v40 = vand.u32 4294901760, %v16554_v41 }
  0xf7   :  { %11641 = vmatmul.mubr.f32.gmra.mrb[2].mxu1 %v15637_v15  ;;  %11307 = vmatprep.mubr.msk.f32.mxu0 %vm15416_vm0, %v19349_v53  ;;  %v16570_v15 = vand.u32 4294901760, %v233_v36  ;;  %v16611_v37 = vsub.f32 %v234_v23, %v16578_v46 }
  0xf8   :  { %11643 = vmatprep.mubr.msk.f32.mxu1 %vm15416_vm0, %v19349_v53  ;;  %13732 = vmatpush3.bf16.msra.mxu0 %v16514_v3  ;;  %v3178_v60 = vsub.f32 %v16554_v41, %v19352_v40  ;;  %v19355_v23 = vand.u32 4294901760, %v16568_v8  ;;  %v16638_v62 = vsub.f32 %v235_v9, %v16602_v30 }
  0xf9   :  { %13734 = vmatprep.subr.msk.bf16.mxu0 %vm15451_vm2, %v19325_v51  ;;  %v16600_v34 = vsub.f32 %v233_v36, %v16570_v15  ;;  %v19353_v36 = vand.u32 4294901760, %v16556_v11  ;;  %v19360_v1 = vand.u32 4294901760, %v16611_v37 }
  0xfa   :  { %11308 = vmatmul.mubr.msk.f32.gmra.mrb[4].mxu0 %vm15421_vm1, %v19349_v53  ;;  %v3017_v40 = vsub.f32 %v16568_v8, %v19355_v23  ;;  %v3179_v23 = vand.u32 4294901760, %v3178_v60  ;;  %v19361_v18 = vand.u32 4294901760, %v16638_v62 }
  0xfb   :  { %11644 = vmatmul.mubr.msk.f32.gmra.mrb[4].mxu1 %vm15421_vm1, %v19349_v53  ;;  %11310 = vmatprep.mubr.msk.f32.mxu0 %vm15456_vm3, %v19349_v53  ;;  %v3185_v5 = vsub.f32 %v16556_v11, %v19353_v36  ;;  %v19356_v36 = vand.u32 4294901760, %v16585_v33  ;;  %v19359_v60 = vand.u32 4294901760, %v16600_v34  ;;  %v3037_v4 = vsub.f32 %v16611_v37, %v19360_v1 }
  0xfc   :  { %11646 = vmatprep.mubr.msk.f32.mxu1 %vm15456_vm3, %v19349_v53  ;;  %13736 = vmatpush3.bf16.msk.msra.mxu0 %vm15451_vm2, %v19325_v51  ;;  %v3047_v1 = vsub.f32 %v16638_v62, %v19361_v18  ;;  %v19364_v18 = vld [vmem:[#allocation43_spill] sm:$0xff] }
  0xfd   :  { %13738 = vmatprep.subr.msk.bf16.mxu0 %vm15504_vm6, %v19325_v51  ;;  %v3186_v49 = vand.u32 4294901760, %v3185_v5  ;;  %v3192_v9 = vsub.f32 %v16585_v33, %v19356_v36  ;;  %v3018_v5 = vand.u32 4294901760, %v3017_v40  ;;  %v3027_v36 = vsub.f32 %v16600_v34, %v19359_v60 }
  0xfe   :  { %11311 = vmatmul.mubr.msk.f32.gmra.mrb[6].mxu0 %vm15461_vm4, %v19349_v53 }
  0xff   :  { %11647 = vmatmul.mubr.msk.f32.gmra.mrb[6].mxu1 %vm15461_vm4, %v19349_v53  ;;  %11313 = vmatprep.mubr.msk.f32.mxu0 %vm15488_vm5, %v19349_v53  ;;  %v13757_v40 = vpack.c.bf16 %v3186_v49, %v3179_v23  ;;  %v3193_v60 = vand.u32 4294901760, %v3192_v9  ;;  %v3028_v52 = vand.u32 4294901760, %v3027_v36  ;;  %v3038_v49 = vand.u32 4294901760, %v3037_v4  ;;  %v19362_v9 = vld [vmem:[#allocation47_spill] sm:$0xff]  ;;  %v19365_v4 = vld [vmem:[#allocation49_spill] sm:$0xff] }
 0x100   :  { %11649 = vmatprep.mubr.msk.f32.mxu1 %vm15488_vm5, %v19349_v53  ;;  %13740 = vmatpush3.bf16.msk.msra.mxu0 %vm15504_vm6, %v19325_v51  ;;  %vm19358_vm6 = vnez %v19244_v12  ;;  %v3048_v23 = vand.u32 4294901760, %v3047_v1  ;;  %v19369_v36 = vld [vmem:[#allocation59_spill] sm:$0xff]  ;;  %v19375_v1 = vld [vmem:[#allocation64_spill] sm:$0xff] }
 0x101   :  { %13742 = vmatprep.subr.msk.bf16.mxu0 %vm19329_vm15, %v19325_v51  ;;  %v13761_v57 = vpack.c.bf16 %v3200_v27, %v3193_v60  ;;  %v19366_v27 = vld [vmem:[#allocation44_spill] sm:$0xff] }
 0x102   :  { %11314 = vmatmul.mubr.msk.f32.gmra.mrb[8].mxu0 %vm15509_vm7, %v19349_v53  ;;  %v19371_v60 = vld [vmem:[#allocation60_spill] sm:$0xff] }
 0x103   :  { %11650 = vmatmul.mubr.msk.f32.gmra.mrb[8].mxu1 %vm15509_vm7, %v19349_v53  ;;  %11316 = vmatprep.mubr.msk.f32.mxu0 %vm15539_vm8, %v19349_v53 }
 0x104   :  { %11652 = vmatprep.mubr.msk.f32.mxu1 %vm15539_vm8, %v19349_v53  ;;  %13744 = vmatpush3.bf16.msk.msra.mxu0 %vm19329_vm15, %v19325_v51  ;;  %vm19354_vm15 = vnez %v19237_v29 }
 0x105   :  { %13746 = vmatprep.subr.msk.bf16.mxu0 %vm19331_vm14, %v19325_v51 }
 0x106   :  { %11317 = vmatmul.mubr.msk.f32.gmra.mrb[10].mxu0 %vm15544_vm9, %v19349_v53 }
 0x107   :  { %11653 = vmatmul.mubr.msk.f32.gmra.mrb[10].mxu1 %vm15544_vm9, %v19349_v53  ;;  %11319 = vmatprep.mubr.msk.f32.mxu0 %vm19354_vm15, %v19349_v53 }
 0x108   :  { %11655 = vmatprep.mubr.msk.f32.mxu1 %vm19354_vm15, %v19349_v53  ;;  %13748 = vmatpush3.bf16.msk.msra.mxu0 %vm19331_vm14, %v19325_v51 }
 0x109   :  { %13750 = vmatprep.subr.msk.bf16.mxu0 %vm15683_vm10, %v19325_v51 }
 0x10a   :  { %11320 = vmatmul.mubr.msk.f32.gmra.mrb[12].mxu0 %vm19358_vm6, %v19349_v53 }
 0x10b   :  { %11656 = vmatmul.mubr.msk.f32.gmra.mrb[12].mxu1 %vm19358_vm6, %v19349_v53  ;;  %11322 = vmatprep.mubr.msk.f32.mxu0 %vm19350_vm11, %v19349_v53 }
 0x10c   :  { %11658 = vmatprep.mubr.msk.f32.mxu1 %vm19350_vm11, %v19349_v53  ;;  %13752 = vmatpush3.bf16.msk.msra.mxu0 %vm15683_vm10, %v19325_v51 }
 0x10d   :  { %13754 = vmatprep.subr.msk.bf16.mxu0 %vm15744_vm12, %v19325_v51 }
 0x10e   :  { %11323 = vmatmul.mubr.msk.f32.gmra.mrb[14].mxu0 %vm19351_vm13, %v19349_v53 }
 0x10f   :  { %11659 = vmatmul.mubr.msk.f32.gmra.mrb[14].mxu1 %vm19351_vm13, %v19349_v53  ;;  %11693 = vmatprep.mubr.f32.mxu0 %v3018_v5  ;;  %v19363_v5 = vld [vmem:[#allocation41_spill] sm:$0xff] }
 0x110   :  { %13756 = vmatpush3.bf16.msk.msra.mxu0 %vm15744_vm12, %v19325_v51 }
 0x111   :  { %13758 = vmatprep.subr.bf16.mxu0 %v13757_v40 }
 0x113   :  { %11694 = vmatmul.mubr.f32.vlgmr.msra.gmra.mrb[16].mxu0 %v3028_v52  ;;  %v19367_v52 = vld [vmem:[#allocation50_spill] sm:$0xff] }
 0x114   :  { %13760 = vmatpush3.bf16.msra.mxu0 %v13757_v40  ;;  %11696 = vmatprep.mubr.f32.mxu0 %v3038_v49  ;;  %v19370_v40 = vld [vmem:[#allocation58_spill] sm:$0xff]  ;;  %v19376_v49 = vld [vmem:[#allocation65_spill] sm:$0xff] }
 0x115   :  { %13762 = vmatprep.subr.bf16.mxu0 %v13761_v57 }
 0x117   :  { %11697 = vmatmul.mubr.f32.gmra.mrb[18].mxu0 %v3048_v23  ;;  %v19378_v23 = vld [vmem:[#allocation67_spill] sm:$0xff] }
 0x118   :  { %13764 = vmatpush3.bf16.msra.mxu0 %v13761_v57  ;;  %11699 = vmatprep.mubr.f32.mxu0 %v15826_v58  ;;  %v19368_v58 = vld [vmem:[#allocation57_spill] sm:$0xff]  ;;  %v19377_v57 = vld [vmem:[#allocation66_spill] sm:$0xff] }
 0x119   :  { %13766 = vmatprep.subr.bf16.mxu0 %v19362_v9 }
 0x11b   :  { %11700 = vmatmul.mubr.f32.gmra.mrb[20].mxu0 %v19363_v5  ;;  %v19380_v5 = vld [vmem:[#allocation30_spill] sm:$0xff] }
 0x11c   :  { %13768 = vmatpush3.bf16.msra.mxu0 %v19362_v9  ;;  %11702 = vmatprep.mubr.f32.mxu0 %v19364_v18  ;;  %v19379_v9 = vld [vmem:[#allocation22_spill] sm:$0xff]  ;;  %v19381_v18 = vld [vmem:[#allocation31_spill] sm:$0xff] }
 0x11d   :  { %13770 = vmatprep.subr.bf16.mxu0 %v19365_v4 }
 0x11f   :  { %11703 = vmatmul.mubr.f32.gmra.mrb[22].mxu0 %v19366_v27  ;;  %v19387_v27 = vld [vmem:[#allocation46_spill] sm:$0xff] }
 0x120   :  { %13772 = vmatpush3.bf16.msra.mxu0 %v19365_v4  ;;  %11705 = vmatprep.mubr.f32.mxu0 %v19367_v52  ;;  %v19383_v4 = vld [vmem:[#allocation35_spill] sm:$0xff]  ;;  %v19389_v52 = vld [vmem:[#allocation52_spill] sm:$0xff] }
 0x121   :  { %13774 = vmatprep.subr.bf16.mxu0 %v15926_v28 }
 0x123   :  { %11706 = vmatmul.mubr.f32.gmra.mrb[24].mxu0 %v15877_v20  ;;  %v19372_v20 = vld [vmem:[#allocation62_spill] sm:$0xff] }
 0x124   :  { %13776 = vmatpush3.bf16.msra.mxu0 %v15926_v28  ;;  %11708 = vmatprep.mubr.f32.mxu0 %v15928_v56  ;;  %v13789_v28 = vpack.c.bf16 %v16556_v11, %v16554_v41  ;;  %v19373_v56 = vld [vmem:[#allocation61_spill] sm:$0xff] }
 0x125   :  { %13778 = vmatprep.subr.bf16.mxu0 %v15952_v26 }
 0x127   :  { %11709 = vmatmul.mubr.f32.gmra.mrb[26].mxu0 %v15930_v6  ;;  %v13793_v6 = vpack.c.bf16 %v16587_v21, %v16585_v33 }
 0x128   :  { %13780 = vmatpush3.bf16.msra.mxu0 %v15952_v26  ;;  %11711 = vmatprep.mubr.f32.mxu0 %v19368_v58  ;;  %v19374_v26 = vld [vmem:[#allocation63_spill] sm:$0xff]  ;;  %v19390_v58 = vand.u32 4294901760, %v16554_v41  ;;  %v19396_v41 = vand.u32 4294901760, %v16600_v34 }
 0x129   :  { %13782 = vmatprep.subr.bf16.mxu0 %v19369_v36 }
 0x12b   :  { %11712 = vmatmul.mubr.f32.gmra.mrb[28].mxu0 %v19370_v40 }
 0x12c   :  { %13784 = vmatpush3.bf16.msra.mxu0 %v19369_v36  ;;  %11714 = vmatprep.mubr.f32.mxu0 %v19371_v60  ;;  %v19391_v36 = vand.u32 4294901760, %v16556_v11  ;;  %v19392_v60 = vld [vmem:[#allocation54_spill] sm:$0xff]  ;;  %v19397_v11 = vand.u32 4294901760, %v16611_v37 }
 0x12d   :  { %13786 = vmatprep.subr.bf16.mxu0 %v19372_v20 }
 0x12e   :  { %v13853_v40 = vpack.c.bf16 %v19391_v36, %v19390_v58 }
 0x12f   :  { %11715 = vmatmul.mubr.f32.gmra.mrb[30].mxu0 %v19373_v56  ;;  %v19395_v56 = vand.u32 4294901760, %v16587_v21  ;;  %v19407_v21 = vld [vmem:[#allocation12_spill] sm:$0xff] }
 0x130   :  { %13788 = vmatpush3.bf16.msra.mxu0 %v19372_v20  ;;  %11749 = vmatprep.mubr.f32.mxu0 %v16543_v35  ;;  %v19393_v20 = vand.u32 4294901760, %v16568_v8 }
 0x131   :  { %13790 = vmatprep.subr.bf16.mxu0 %v13789_v28 }
 0x133   :  { %11750 = vmatmul.mubr.f32.vlgmr.msra.gmra.mrb[16].mxu0 %v16570_v15 }
 0x134   :  { %13792 = vmatpush3.bf16.msra.mxu0 %v13789_v28  ;;  %11752 = vmatprep.mubr.f32.mxu0 %v16578_v46  ;;  %v19394_v28 = vand.u32 4294901760, %v16585_v33 }
 0x135   :  { %13794 = vmatprep.subr.bf16.mxu0 %v13793_v6 }
 0x137   :  { %11753 = vmatmul.mubr.f32.gmra.mrb[18].mxu0 %v16602_v30 }
 0x138   :  { %13796 = vmatpush3.bf16.msra.mxu0 %v13793_v6  ;;  %11755 = vmatprep.mubr.msk.f32.mxu0 %vm15416_vm0, %v19349_v53  ;;  %v13857_v6 = vpack.c.bf16 %v19395_v56, %v19394_v28 }
 0x139   :  { %13798 = vmatprep.subr.bf16.mxu0 %v19374_v26 }
 0x13b   :  { %11756 = vmatmul.mubr.msk.f32.gmra.mrb[20].mxu0 %vm15421_vm1, %v19349_v53 }
 0x13c   :  { %13800 = vmatpush3.bf16.msra.mxu0 %v19374_v26  ;;  %11758 = vmatprep.mubr.msk.f32.mxu0 %vm15456_vm3, %v19349_v53  ;;  %v19398_v26 = vand.u32 4294901760, %v16638_v62 }
 0x13d   :  { %13802 = vmatprep.subr.bf16.mxu0 %v19375_v1 }
 0x13f   :  { %11759 = vmatmul.mubr.msk.f32.gmra.mrb[22].mxu0 %vm15461_vm4, %v19349_v53 }
 0x140   :  { %13804 = vmatpush3.bf16.msra.mxu0 %v19375_v1  ;;  %11761 = vmatprep.mubr.msk.f32.mxu0 %vm15488_vm5, %v19349_v53 }
 0x141   :  { %13806 = vmatprep.subr.bf16.mxu0 %v19376_v49 }
 0x143   :  { %11762 = vmatmul.mubr.msk.f32.gmra.mrb[24].mxu0 %vm15509_vm7, %v19349_v53 }
 0x144   :  { %13808 = vmatpush3.bf16.msra.mxu0 %v19376_v49  ;;  %11764 = vmatprep.mubr.msk.f32.mxu0 %vm15539_vm8, %v19349_v53 }
 0x145   :  { %13810 = vmatprep.subr.bf16.mxu0 %v19377_v57 }
 0x147   :  { %11765 = vmatmul.mubr.msk.f32.gmra.mrb[26].mxu0 %vm15544_vm9, %v19349_v53 }
 0x148   :  { %13812 = vmatpush3.bf16.msra.mxu0 %v19377_v57  ;;  %11767 = vmatprep.mubr.msk.f32.mxu0 %vm19354_vm15, %v19349_v53 }
 0x149   :  { %13814 = vmatprep.subr.bf16.mxu0 %v19378_v23 }
 0x14b   :  { %11768 = vmatmul.mubr.msk.f32.gmra.mrb[28].mxu0 %vm19358_vm6, %v19349_v53 }
 0x14c   :  { %13816 = vmatpush3.bf16.msra.mxu0 %v19378_v23  ;;  %11770 = vmatprep.mubr.msk.f32.mxu0 %vm19350_vm11, %v19349_v53  ;;  %vm19384_vm11 = vnez %v19328_v48 }
 0x14d   :  { %13818 = vmatprep.subr.bf16.mxu0 %v19379_v9 }
 0x14f   :  { %11771 = vmatmul.mubr.msk.f32.gmra.mrb[30].mxu0 %vm19351_vm13, %v19349_v53  ;;  %vm19382_vm13 = vnez %v19327_v63 }
 0x150   :  { %13820 = vmatpush3.bf16.msra.mxu0 %v19379_v9  ;;  %11805 = vmatprep.mubr.f32.mxu0 %v16568_v8 }
 0x151   :  { %13822 = vmatprep.subr.bf16.mxu0 %v16494_v59 }
 0x153   :  { %11806 = vmatmul.mubr.f32.vlgmr.msra.gmra.mrb[16].mxu0 %v16600_v34 }
 0x154   :  { %13824 = vmatpush3.bf16.msra.mxu0 %v16494_v59  ;;  %11808 = vmatprep.mubr.f32.mxu0 %v16611_v37 }
 0x155   :  { %13826 = vmatprep.subr.bf16.mxu0 %v16514_v3 }
 0x157   :  { %11809 = vmatmul.mubr.f32.gmra.mrb[18].mxu0 %v16638_v62  ;;  %v19399_v62 = vld [vmem:[#allocation39_spill] sm:$0xff] }
 0x158   :  { %13828 = vmatpush3.bf16.msra.mxu0 %v16514_v3  ;;  %11811 = vmatprep.mubr.f32.mxu0 %v19380_v5 }
 0x159   :  { %13830 = vmatprep.subr.msk.bf16.mxu0 %vm15451_vm2, %v19325_v51 }
 0x15b   :  { %11812 = vmatmul.mubr.f32.gmra.mrb[20].mxu0 %v15705_v7  ;;  %v19385_v7 = vld [vmem:[#allocation38_spill] sm:$0xff] }
 0x15c   :  { %13832 = vmatpush3.bf16.msk.msra.mxu0 %vm15451_vm2, %v19325_v51  ;;  %11814 = vmatprep.mubr.f32.mxu0 %v19381_v18 }
 0x15d   :  { %13834 = vmatprep.subr.msk.bf16.mxu0 %vm19382_vm13, %v19325_v51 }
 0x15f   :  { %11815 = vmatmul.mubr.f32.gmra.mrb[22].mxu0 %v15755_v47  ;;  %v19386_v47 = vld [vmem:[#allocation40_spill] sm:$0xff] }
 0x160   :  { %13836 = vmatpush3.bf16.msk.msra.mxu0 %vm19382_vm13, %v19325_v51  ;;  %11817 = vmatprep.mubr.f32.mxu0 %v19383_v4 }
 0x161   :  { %13838 = vmatprep.subr.msk.bf16.mxu0 %vm19384_vm11, %v19325_v51 }
 0x163   :  { %11818 = vmatmul.mubr.f32.gmra.mrb[24].mxu0 %v15777_v54  ;;  %v19388_v54 = vld [vmem:[#allocation48_spill] sm:$0xff] }
 0x164   :  { %13840 = vmatpush3.bf16.msk.msra.mxu0 %vm19384_vm11, %v19325_v51  ;;  %11820 = vmatprep.mubr.f32.mxu0 %v19385_v7 }
 0x165   :  { %13842 = vmatprep.subr.msk.bf16.mxu0 %vm19331_vm14, %v19325_v51 }
 0x167   :  { %11821 = vmatmul.mubr.f32.gmra.mrb[26].mxu0 %v19386_v47 }
 0x168   :  { %13844 = vmatpush3.bf16.msk.msra.mxu0 %vm19331_vm14, %v19325_v51  ;;  %11823 = vmatprep.mubr.f32.mxu0 %v19387_v27 }
 0x169   :  { %13846 = vmatprep.subr.msk.bf16.mxu0 %vm15683_vm10, %v19325_v51 }
 0x16b   :  { %11824 = vmatmul.mubr.f32.gmra.mrb[28].mxu0 %v19388_v54 }
 0x16c   :  { %13848 = vmatpush3.bf16.msk.msra.mxu0 %vm15683_vm10, %v19325_v51  ;;  %11826 = vmatprep.mubr.f32.mxu0 %v19389_v52 }
 0x16d   :  { %13850 = vmatprep.subr.msk.bf16.mxu0 %vm15744_vm12, %v19325_v51 }
 0x16f   :  { %11827 = vmatmul.mubr.f32.gmra.mrb[30].mxu0 %v19392_v60 }
 0x170   :  { %13852 = vmatpush3.bf16.msk.msra.mxu0 %vm15744_vm12, %v19325_v51  ;;  %11861 = vmatprep.mubr.f32.mxu0 %v19393_v20 }
 0x171   :  { %13854 = vmatprep.subr.bf16.mxu0 %v13853_v40 }
 0x173   :  { %11862 = vmatmul.mubr.f32.vlgmr.msra.gmra.mrb[16].mxu0 %v19396_v41 }
 0x174   :  { %13856 = vmatpush3.bf16.msra.mxu0 %v13853_v40  ;;  %11864 = vmatprep.mubr.f32.mxu0 %v19397_v11 }
 0x175   :  { %13858 = vmatprep.subr.bf16.mxu0 %v13857_v6 }
 0x177   :  { %11865 = vmatmul.mubr.f32.gmra.mrb[18].mxu0 %v19398_v26 }
 0x178   :  { %13860 = vmatpush3.bf16.msra.mxu0 %v13857_v6  ;;  %11867 = vmatprep.mubr.f32.mxu0 %v19340_v17  ;;  %v19400_v17 = vld [vmem:[#allocation42_spill] sm:$0xff] }
 0x179   :  { %13862 = vmatprep.subr.bf16.mxu0 %v16272_v42 }
 0x17b   :  { %11868 = vmatmul.mubr.f32.gmra.mrb[20].mxu0 %v19341_v16  ;;  %v19401_v16 = vld [vmem:[#allocation16_spill] sm:$0xff] }
 0x17c   :  { %13864 = vmatpush3.bf16.msra.mxu0 %v16272_v42  ;;  %11870 = vmatprep.mubr.f32.mxu0 %v19344_v24  ;;  %v19402_v42 = vld [vmem:[#allocation45_spill] sm:$0xff]  ;;  %v19403_v24 = vld [vmem:[#allocation51_spill] sm:$0xff] }
 0x17d   :  { %13866 = vmatprep.subr.bf16.mxu0 %v16286_v50 }
 0x17f   :  { %11871 = vmatmul.mubr.f32.gmra.mrb[22].mxu0 %v19345_v39  ;;  %v19404_v39 = vld [vmem:[#allocation18_spill] sm:$0xff] }
 0x180   :  { %13868 = vmatpush3.bf16.msra.mxu0 %v16286_v50  ;;  %11873 = vmatprep.mubr.f32.mxu0 %v15805_v38  ;;  %v19405_v50 = vld [vmem:[#allocation53_spill] sm:$0xff]  ;;  %v19406_v38 = vld [vmem:[#allocation55_spill] sm:$0xff] }
 0x181   :  { %13870 = vmatprep.subr.bf16.mxu0 %v16298_v19 }
 0x183   :  { %11874 = vmatmul.mubr.f32.gmra.mrb[24].mxu0 %v19399_v62 }
 0x184   :  { %13872 = vmatpush3.bf16.msra.mxu0 %v16298_v19  ;;  %11876 = vmatprep.mubr.f32.mxu0 %v19400_v17  ;;  %v19408_v19 = vld [vmem:[#allocation56_spill] sm:$0xff] }
 0x185   :  { %13874 = vmatprep.subr.bf16.mxu0 %v19401_v16 }
 0x187   :  { %11877 = vmatmul.mubr.f32.gmra.mrb[26].mxu0 %v19402_v42 }
 0x188   :  { %13876 = vmatpush3.bf16.msra.mxu0 %v19401_v16  ;;  %11879 = vmatprep.mubr.f32.mxu0 %v19403_v24 }
 0x189   :  { %13878 = vmatprep.subr.bf16.mxu0 %v19404_v39 }
 0x18b   :  { %11880 = vmatmul.mubr.f32.gmra.mrb[28].mxu0 %v19405_v50 }
 0x18c   :  { %13880 = vmatpush3.bf16.msra.mxu0 %v19404_v39  ;;  %11882 = vmatprep.mubr.f32.mxu0 %v19406_v38 }
 0x18d   :  { %13882 = vmatprep.subr.bf16.mxu0 %v19407_v21 }
 0x18f   :  { %11883 = vmatmul.mubr.f32.gmra.mrb[30].mxu0 %v19408_v19 }
 0x190   :  { %13884 = vmatpush3.bf16.msra.mxu0 %v19407_v21  ;;  %11917 = vmatprep.mubr.f32.mxu0 %v16543_v35 }
 0x191   :  { %13886 = vmatprep.subr.bf16.mxu0 %v16494_v59 }
 0x193   :  { %11918 = vmatmul.mubr.f32.vlgmr.msra.gmra.mrb[16].mxu0 %v16570_v15 }
 0x194   :  { %13888 = vmatpush3.bf16.msra.mxu0 %v16494_v59  ;;  %11920 = vmatprep.mubr.f32.mxu0 %v16578_v46 }
 0x195   :  { %13890 = vmatprep.subr.bf16.mxu0 %v16514_v3 }
 0x197   :  { %11921 = vmatmul.mubr.f32.gmra.mrb[18].mxu0 %v16602_v30 }
 0x198   :  { %13892 = vmatpush3.bf16.msra.mxu0 %v16514_v3  ;;  %11923 = vmatprep.mubr.msk.f32.mxu0 %vm15416_vm0, %v19349_v53 }
 0x199   :  { %13894 = vmatprep.subr.msk.bf16.mxu0 %vm15451_vm2, %v19325_v51 }
 0x19b   :  { %11924 = vmatmul.mubr.msk.f32.gmra.mrb[20].mxu0 %vm15421_vm1, %v19349_v53 }
 0x19c   :  { %13896 = vmatpush3.bf16.msk.msra.mxu0 %vm15451_vm2, %v19325_v51  ;;  %11926 = vmatprep.mubr.msk.f32.mxu0 %vm15456_vm3, %v19349_v53  ;;  %vm19409_vm2 = vnez %v19246_v13 }
 0x19d   :  { %13898 = vmatprep.subr.msk.bf16.mxu0 %vm19382_vm13, %v19325_v51 }
 0x19f   :  { %11927 = vmatmul.mubr.msk.f32.gmra.mrb[22].mxu0 %vm15461_vm4, %v19349_v53 }
 0x1a0   :  { %13900 = vmatpush3.bf16.msk.msra.mxu0 %vm19382_vm13, %v19325_v51  ;;  %11929 = vmatprep.mubr.msk.f32.mxu0 %vm15488_vm5, %v19349_v53 }
 0x1a1   :  { %13902 = vmatprep.subr.msk.bf16.mxu0 %vm19384_vm11, %v19325_v51 }
 0x1a3   :  { %11930 = vmatmul.mubr.msk.f32.gmra.mrb[24].mxu0 %vm15509_vm7, %v19349_v53 }
 0x1a4   :  { %13904 = vmatpush3.bf16.msk.msra.mxu0 %vm19384_vm11, %v19325_v51  ;;  %11932 = vmatprep.mubr.msk.f32.mxu0 %vm15539_vm8, %v19349_v53  ;;  %vm19410_vm11 = vnez %v19248_v0 }
 0x1a5   :  { %13906 = vmatprep.subr.msk.bf16.mxu0 %vm19331_vm14, %v19325_v51 }
 0x1a7   :  { %11933 = vmatmul.mubr.msk.f32.gmra.mrb[26].mxu0 %vm15544_vm9, %v19349_v53 }
 0x1a8   :  { %13908 = vmatpush3.bf16.msk.msra.mxu0 %vm19331_vm14, %v19325_v51  ;;  %11935 = vmatprep.mubr.msk.f32.mxu0 %vm19354_vm15, %v19349_v53 }
 0x1a9   :  { %13910 = vmatprep.subr.msk.bf16.mxu0 %vm15683_vm10, %v19325_v51 }
 0x1ab   :  { %11936 = vmatmul.mubr.msk.f32.gmra.mrb[28].mxu0 %vm19358_vm6, %v19349_v53 }
 0x1ac   :  { %13912 = vmatpush3.bf16.msk.msra.mxu0 %vm15683_vm10, %v19325_v51  ;;  %11938 = vmatprep.mubr.msk.f32.mxu0 %vm19409_vm2, %v19349_v53 }
 0x1ad   :  { %13914 = vmatprep.subr.msk.bf16.mxu0 %vm15744_vm12, %v19325_v51 }
 0x1af   :  { %11939 = vmatmul.mubr.msk.f32.gmra.mrb[30].mxu0 %vm19410_vm11, %v19349_v53 }
 0x1b0   :  { %13916 = vmatpush3.bf16.msk.msra.mxu0 %vm15744_vm12, %v19325_v51  ;;  %11973 = vmatprep.mubr.f32.mxu0 %v16543_v35 }
 0x1b3   :  { %11974 = vmatmul.mubr.f32.vlgmr.msra.gmra.mrb[16].mxu0 %v16570_v15 }
 0x1b4   :  { %11976 = vmatprep.mubr.f32.mxu0 %v16578_v46 }
 0x1b7   :  { %11977 = vmatmul.mubr.f32.gmra.mrb[18].mxu0 %v16602_v30 }
 0x1b8   :  { %11979 = vmatprep.mubr.msk.f32.mxu0 %vm15416_vm0, %v19349_v53 }
 0x1bb   :  { %11980 = vmatmul.mubr.msk.f32.gmra.mrb[20].mxu0 %vm15421_vm1, %v19349_v53 }
 0x1bc   :  { %11982 = vmatprep.mubr.msk.f32.mxu0 %vm15456_vm3, %v19349_v53 }
 0x1bf   :  { %11983 = vmatmul.mubr.msk.f32.gmra.mrb[22].mxu0 %vm15461_vm4, %v19349_v53 }
 0x1c0   :  { %11985 = vmatprep.mubr.msk.f32.mxu0 %vm15488_vm5, %v19349_v53 }
 0x1c3   :  { %11986 = vmatmul.mubr.msk.f32.gmra.mrb[24].mxu0 %vm15509_vm7, %v19349_v53 }
 0x1c4   :  { %11988 = vmatprep.mubr.msk.f32.mxu0 %vm15539_vm8, %v19349_v53 }
 0x1c5   :  { %v11303_v25 = vpop.f32.mrb[0].mxu0 }
 0x1c6   :  { %v4223_v31 = vand.u32 4294901760, %v11303_v25  ;;  %v11639_v32 = vpop.f32.mrb[0].mxu1  ;;  %v1553_v43 = vpop.f32.mrb[1].mxu0 }
 0x1c7   :  { %v16974_v48 = vand.u32 4294901760, %v11639_v32  ;;  %v4220_v44 = vand.u32 4294901760, %v1553_v43  ;;  %v2839_v22 = vpop.f32.mrb[1].mxu1  ;;  %11989 = vmatmul.mubr.msk.f32.gmra.mrb[26].mxu0 %vm15544_vm9, %v19349_v53 }
 0x1c8   :  { %v16979_v55 = vand.u32 4294901760, %v2839_v22  ;;  %11991 = vmatprep.mubr.msk.f32.mxu0 %vm19354_vm15, %v19349_v53  ;;  %v16989_v10 = vsub.f32 %v11303_v25, %v4223_v31 }
 0x1c9   :  { %v16985_v61 = vsub.f32 %v11639_v32, %v16974_v48  ;;  %v16987_v14 = vpack.c.bf16 %v4223_v31, %v4220_v44  ;;  %v11306_v63 = vpop.f32.mrb[2].mxu0  ;;  %v16994_v59 = vsub.f32 %v1553_v43, %v4220_v44 }
 0x1ca   :  { %v16992_v3 = vsub.f32 %v2839_v22, %v16979_v55  ;;  %v4229_v2 = vand.u32 4294901760, %v11306_v63  ;;  %v11642_v51 = vpop.f32.mrb[2].mxu1  ;;  %v1565_v45 = vpop.f32.mrb[3].mxu0  ;;  %v19036_v34 = vand.u32 4294901760, %v16989_v10 }
 0x1cb   :  { %19411 = vst [vmem:[#allocation19_spill] sm:$0xff] %v16985_v61  ;;  %19412 = vst [vmem:[#allocation13_spill] sm:$0xff] %v16987_v14  ;;  %v4226_v35 = vand.u32 4294901760, %v1565_v45  ;;  %v2851_v8 = vpop.f32.mrb[3].mxu1  ;;  %13918 = vmatprep.subr.bf16.mxu1 %v16987_v14  ;;  %11992 = vmatmul.mubr.msk.f32.gmra.mrb[28].mxu0 %vm19358_vm6, %v19349_v53  ;;  %v19030_v29 = vand.u32 4294901760, %v16985_v61  ;;  %v19037_v12 = vand.u32 4294901760, %v16994_v59 }
 0x1cc   :  { %19413 = vst [vmem:[#allocation20_spill] sm:$0xff] %v16992_v3  ;;  %13920 = vmatpush3.bf16.msra.mxu1 %v16987_v14  ;;  %11994 = vmatprep.mubr.msk.f32.mxu0 %vm19409_vm2, %v19349_v53  ;;  %v19031_v33 = vand.u32 4294901760, %v16992_v3  ;;  %v17010_v49 = vsub.f32 %v11306_v63, %v4229_v2  ;;  %v17012_v57 = vand.u32 4294901760, %v11642_v51  ;;  %v17026_v18 = vand.u32 4294901760, %v2851_v8 }
 0x1cd   :  { %v17005_v15 = vpack.c.bf16 %v4229_v2, %v4226_v35  ;;  %v11309_v46 = vpop.f32.mrb[4].mxu0  ;;  %v17022_v9 = vsub.f32 %v16985_v61, %v19030_v29  ;;  %v17024_v5 = vsub.f32 %v1565_v45, %v4226_v35  ;;  %v17033_v47 = vsub.f32 %v16989_v10, %v19036_v34 }
 0x1ce   :  { %v4235_v30 = vand.u32 4294901760, %v11309_v46  ;;  %v11645_v37 = vpop.f32.mrb[4].mxu1  ;;  %v1577_v1 = vpop.f32.mrb[5].mxu0  ;;  %v4303_v27 = vsub.f32 %v16992_v3, %v19031_v33  ;;  %v17041_v52 = vsub.f32 %v16994_v59, %v19037_v12  ;;  %v19032_v58 = vand.u32 4294901760, %v17010_v49 }
 0x1cf   :  { %19414 = vst [vmem:[#allocation24_spill] sm:$0xff] %v17005_v15  ;;  %v4232_v13 = vand.u32 4294901760, %v1577_v1  ;;  %v2863_v23 = vpop.f32.mrb[5].mxu1  ;;  %13922 = vmatprep.subr.bf16.mxu1 %v17005_v15  ;;  %11995 = vmatmul.mubr.msk.f32.gmra.mrb[30].mxu0 %vm19410_vm11, %v19349_v53  ;;  %v17045_v36 = vsub.f32 %v11642_v51, %v17012_v57  ;;  %v17047_v40 = vand.u32 4294901760, %v11645_v37  ;;  %v19033_v11 = vand.u32 4294901760, %v17024_v5 }
 0x1d0   :  { %13924 = vmatpush3.bf16.msra.mxu1 %v17005_v15  ;;  %v17050_v20 = vsub.f32 %v11309_v46, %v4235_v30  ;;  %v4304_v56 = vand.u32 4294901760, %v4303_v27  ;;  %v17058_v26 = vsub.f32 %v2851_v8, %v17026_v18  ;;  %v17060_v62 = vand.u32 4294901760, %v2863_v23 }
 0x1d1   :  { %v17028_v4 = vpack.c.bf16 %v4235_v30, %v4232_v13  ;;  %v11312_v7 = vpop.f32.mrb[6].mxu0  ;;  %19416 = vst [vmem:[#allocation14_spill] sm:$0xff] %v17045_v36  ;;  %v17052_v28 = vsub.f32 %v1577_v1, %v4232_v13  ;;  %v17071_v21 = vsub.f32 %v17010_v49, %v19032_v58  ;;  %v17075_v25 = vsub.f32 %v11645_v37, %v17047_v40 }
 0x1d2   :  { %v4241_v0 = vand.u32 4294901760, %v11312_v7  ;;  %v11648_v53 = vpop.f32.mrb[6].mxu1  ;;  %v1589_v54 = vpop.f32.mrb[7].mxu0  ;;  %19417 = vst [vmem:[#allocation27_spill] sm:$0xff] %v17058_v26  ;;  %12029 = vmatprep.mubr.f32.mxu1 %v4304_v56  ;;  %v19034_v43 = vand.u32 4294901760, %v17050_v20  ;;  %v17087_v2 = vsub.f32 %v17024_v5, %v19033_v11  ;;  %v17096_v46 = vsub.f32 %v2863_v23, %v17060_v62 }
 0x1d3   :  { %19415 = vst [vmem:[#allocation25_spill] sm:$0xff] %v17028_v4  ;;  %v2875_v60 = vpop.f32.mrb[7].mxu1  ;;  %13926 = vmatprep.subr.bf16.mxu1 %v17028_v4  ;;  %v4238_v6 = vand.u32 4294901760, %v1589_v54  ;;  %v17064_v42 = vand.u32 4294901760, %v11648_v53  ;;  %v19035_v44 = vand.u32 4294901760, %v17052_v28 }
 0x1d4   :  { %13928 = vmatpush3.bf16.msra.mxu1 %v17028_v4  ;;  %v17062_v16 = vsub.f32 %v11312_v7, %v4241_v0  ;;  %v17081_v63 = vand.u32 4294901760, %v2875_v60  ;;  %19421 = vst [vmem:[#allocation21_spill] sm:$0xff] %v17096_v46  ;;  %v17111_v23 = vsub.f32 %v17050_v20, %v19034_v43 }
 0x1d5   :  { %v11315_v17 = vpop.f32.mrb[8].mxu0  ;;  %v17066_v24 = vpack.c.bf16 %v4241_v0, %v4238_v6  ;;  %v17079_v22 = vsub.f32 %v1589_v54, %v4238_v6  ;;  %v17100_v37 = vsub.f32 %v11648_v53, %v17064_v42  ;;  %v17116_v53 = vsub.f32 %v17052_v28, %v19035_v44 }
 0x1d6   :  { %v4247_v39 = vand.u32 4294901760, %v11315_v17  ;;  %v11651_v50 = vpop.f32.mrb[8].mxu1  ;;  %v1601_v38 = vpop.f32.mrb[9].mxu0  ;;  %v19038_v30 = vand.u32 4294901760, %v17062_v16 }
 0x1d7   :  { %19418 = vst [vmem:[#allocation15_spill] sm:$0xff] %v17066_v24  ;;  %v4244_v31 = vand.u32 4294901760, %v1601_v38  ;;  %v2887_v32 = vpop.f32.mrb[9].mxu1  ;;  %13930 = vmatprep.subr.bf16.mxu1 %v17066_v24  ;;  %v17090_v45 = vand.u32 4294901760, %v11651_v50  ;;  %v19043_v29 = vand.u32 4294901760, %v17079_v22 }
 0x1d8   :  { %13932 = vmatpush3.bf16.msra.mxu1 %v17066_v24  ;;  %v17103_v27 = vsub.f32 %v11315_v17, %v4247_v39  ;;  %v17105_v54 = vand.u32 4294901760, %v2887_v32  ;;  %v17120_v17 = vsub.f32 %v2875_v60, %v17081_v63  ;;  %v17136_v34 = vsub.f32 %v17062_v16, %v19038_v30 }
 0x1d9   :  { %19419 = vst [vmem:[#allocation29_spill] sm:$0xff] %v17090_v45  ;;  %v17092_v35 = vpack.c.bf16 %v4247_v39, %v4244_v31  ;;  %v11318_v8 = vpop.f32.mrb[10].mxu0  ;;  %v17123_v39 = vsub.f32 %v11651_v50, %v17090_v45  ;;  %v17125_v33 = vsub.f32 %v1601_v38, %v4244_v31  ;;  %v17149_v30 = vsub.f32 %v17079_v22, %v19043_v29 }
 0x1da   :  { %v4253_v1 = vand.u32 4294901760, %v11318_v8  ;;  %v11654_v13 = vpop.f32.mrb[10].mxu1  ;;  %v1613_v7 = vpop.f32.mrb[11].mxu0  ;;  %19422 = vst [vmem:[#allocation23_spill] sm:$0xff] %v17105_v54  ;;  %v17141_v0 = vsub.f32 %v2887_v32, %v17105_v54  ;;  %v4472_v32 = vand.u32 4294901760, %v17033_v47  ;;  %v4479_v45 = vand.u32 4294901760, %v17087_v2 }
 0x1db   :  { %19420 = vst [vmem:[#allocation17_spill] sm:$0xff] %v17092_v35  ;;  %v4250_v56 = vand.u32 4294901760, %v1613_v7  ;;  %v2899_v6 = vpop.f32.mrb[11].mxu1  ;;  %13934 = vmatprep.subr.bf16.mxu1 %v17092_v35  ;;  %v17127_v58 = vand.u32 4294901760, %v11654_v13  ;;  %v19444_v54 = vand.u32 4294901760, %v17120_v17 }
 0x1dc   :  { %13936 = vmatpush3.bf16.msra.mxu1 %v17092_v35  ;;  %v17143_v41 = vsub.f32 %v11318_v8, %v4253_v1  ;;  %v17154_v35 = vand.u32 4294901760, %v2899_v6  ;;  %v19427_v8 = vand.u32 4294901760, %v17103_v27 }
 0x1dd   :  { %19423 = vst [vmem:[#allocation26_spill] sm:$0xff] %v17127_v58  ;;  %v17129_v11 = vpack.c.bf16 %v4253_v1, %v4250_v56  ;;  %v11321_v43 = vpop.f32.mrb[12].mxu0  ;;  %v17152_v44 = vsub.f32 %v1613_v7, %v4250_v56  ;;  %v17159_v1 = vsub.f32 %v11654_v13, %v17127_v58  ;;  %v4465_v56 = vand.u32 4294901760, %v17041_v52 }
 0x1de   :  { %v4259_v50 = vand.u32 4294901760, %v11321_v43  ;;  %v11657_v12 = vpop.f32.mrb[12].mxu1  ;;  %v1625_v38 = vpop.f32.mrb[13].mxu0  ;;  %19425 = vst [vmem:[#allocation32_spill] sm:$0xff] %v17154_v35  ;;  %v4527_v13 = vsub.f32 %v17103_v27, %v19427_v8  ;;  %v19429_v8 = vand.u32 4294901760, %v17125_v33 }
 0x1df   :  { %19424 = vst [vmem:[#allocation28_spill] sm:$0xff] %v17129_v11  ;;  %v4256_v19 = vand.u32 4294901760, %v1625_v38  ;;  %v2911_v51 = vpop.f32.mrb[13].mxu1  ;;  %13938 = vmatprep.subr.bf16.mxu1 %v17129_v11  ;;  %v17189_v3 = vand.u32 4294901760, %v11657_v12 }
 0x1e0   :  { %13940 = vmatpush3.bf16.msra.mxu1 %v17129_v11  ;;  %v17164_v29 = vsub.f32 %v11321_v43, %v4259_v50  ;;  %v4520_v15 = vsub.f32 %v17125_v33, %v19429_v8  ;;  %v17191_v61 = vand.u32 4294901760, %v2911_v51  ;;  %v19434_v8 = vand.u32 4294901760, %v17058_v26 }
 0x1e1   :  { %v17161_v31 = vpack.c.bf16 %v4259_v50, %v4256_v19  ;;  %v11324_v24 = vpop.f32.mrb[14].mxu0  ;;  %v17180_v50 = vsub.f32 %v2899_v6, %v17154_v35  ;;  %v17182_v52 = vsub.f32 %v1625_v38, %v4256_v19  ;;  %19430 = vst [vmem:[#allocation36_spill] sm:$0xff] %v17189_v3  ;;  %v19433_v38 = vand.u32 4294901760, %v17143_v41 }
 0x1e2   :  { %v4265_v4 = vand.u32 4294901760, %v11324_v24  ;;  %v17166_v60 = vpop.f32.mrb[14].mxu1  ;;  %v1637_v7 = vpop.f32.mrb[15].mxu0  ;;  %19431 = vst [vmem:[#allocation37_spill] sm:$0xff] %v17191_v61  ;;  %v19435_v43 = vand.u32 4294901760, %v17152_v44  ;;  %v17219_v6 = vsub.f32 %v2911_v51, %v17191_v61 }
 0x1e3   :  { %19426 = vst [vmem:[#allocation33_spill] sm:$0xff] %v17161_v31  ;;  %v4262_v11 = vand.u32 4294901760, %v1637_v7  ;;  %v17175_v14 = vpop.f32.mrb[15].mxu1  ;;  %13942 = vmatprep.subr.bf16.mxu1 %v17161_v31  ;;  %19428 = vst [vmem:[#allocation34_spill] sm:$0xff] %v17180_v50  ;;  %v4541_v35 = vsub.f32 %v17143_v41, %v19433_v38  ;;  %v17216_v38 = vsub.f32 %v11657_v12, %v17189_v3 }
 0x1e4   :  { %v17184_v47 = vsub.f32 %v11324_v24, %v4265_v4  ;;  %13944 = vmatpush3.bf16.msra.mxu1 %v17161_v31  ;;  %v13949_v24 = vpack.c.bf16 %v4472_v32, %v4465_v56  ;;  %v4486_v31 = vand.u32 4294901760, %v17071_v21  ;;  %v4493_v21 = vand.u32 4294901760, %v17116_v53 }
 0x1e5   :  { %v17193_v58 = vpack.c.bf16 %v4265_v4, %v4262_v11  ;;  %v17198_v19 = vsub.f32 %v1637_v7, %v4262_v11  ;;  %v4323_v4 = vsub.f32 %v17058_v26, %v19434_v8  ;;  %v4534_v11 = vsub.f32 %v17152_v44, %v19435_v43 }
 0x1e6   :  { %v13953_v2 = vpack.c.bf16 %v4486_v31, %v4479_v45  ;;  %v19436_v8 = vand.u32 4294901760, %v17164_v29  ;;  %v19437_v56 = vand.u32 4294901760, %v17045_v36  ;;  %v4500_v7 = vand.u32 4294901760, %v17111_v23 }
 0x1e7   :  { %19432 = vst [vmem:[#allocation47_spill] sm:$0xff] %v17193_v58  ;;  %13946 = vmatprep.subr.bf16.mxu1 %v17193_v58  ;;  %v4324_v51 = vand.u32 4294901760, %v4323_v4  ;;  %v19438_v26 = vand.u32 4294901760, %v17096_v46  ;;  %v4507_v53 = vand.u32 4294901760, %v17149_v30  ;;  %v4514_v31 = vand.u32 4294901760, %v17136_v34 }
 0x1e8   :  { %13948 = vmatpush3.bf16.msra.mxu1 %v17193_v58  ;;  %v4555_v43 = vsub.f32 %v17164_v29, %v19436_v8  ;;  %v4333_v12 = vsub.f32 %v17045_v36, %v19437_v56  ;;  %v19439_v8 = vand.u32 4294901760, %v17182_v52  ;;  %v19440_v58 = vand.u32 4294901760, %v17184_v47 }
 0x1e9   :  { %13950 = vmatprep.subr.bf16.mxu1 %v13949_v24  ;;  %v4343_v45 = vsub.f32 %v17096_v46, %v19438_v26  ;;  %v17243_v56 = vand.u32 4294901760, %v17175_v14  ;;  %v19441_v23 = vand.u32 4294901760, %v17022_v9  ;;  %v13957_v4 = vpack.c.bf16 %v4500_v7, %v4493_v21 }
 0x1ea   :  { %v4548_v32 = vsub.f32 %v17182_v52, %v19439_v8  ;;  %v4569_v3 = vsub.f32 %v17184_v47, %v19440_v58  ;;  %v19442_v26 = vand.u32 4294901760, %v17075_v25  ;;  %v13961_v30 = vpack.c.bf16 %v4514_v31, %v4507_v53 }
 0x1eb   :  { %12030 = vmatmul.mubr.f32.vlgmr.msra.gmra.mrb[16].mxu1 %v19441_v23  ;;  %v4521_v46 = vand.u32 4294901760, %v4520_v15  ;;  %v4528_v8 = vand.u32 4294901760, %v4527_v13  ;;  %v19443_v36 = vand.u32 4294901760, %v17198_v19  ;;  %v4334_v61 = vand.u32 4294901760, %v4333_v12 }
 0x1ec   :  { %12032 = vmatprep.mubr.f32.mxu1 %v4324_v51  ;;  %13952 = vmatpush3.bf16.msra.mxu1 %v13949_v24  ;;  %v4353_v34 = vsub.f32 %v17075_v25, %v19442_v26  ;;  %v4363_v9 = vsub.f32 %v17120_v17, %v19444_v54  ;;  %v4535_v7 = vand.u32 4294901760, %v4534_v11  ;;  %v4344_v21 = vand.u32 4294901760, %v4343_v45 }
 0x1ed   :  { %v4562_v58 = vsub.f32 %v17198_v19, %v19443_v36  ;;  %13954 = vmatprep.subr.bf16.mxu1 %v13953_v2  ;;  %v19445_v24 = vand.u32 4294901760, %v17100_v37  ;;  %v13965_v23 = vpack.c.bf16 %v4528_v8, %v4521_v46  ;;  %v4542_v53 = vand.u32 4294901760, %v4541_v35 }
 0x1ee   :  { %v17261_v13 = vand.u32 4294901760, %v17166_v60  ;;  %v4549_v36 = vand.u32 4294901760, %v4548_v32  ;;  %v4556_v12 = vand.u32 4294901760, %v4555_v43  ;;  %v17265_v31 = vsub.f32 %v17175_v14, %v17243_v56 }
 0x1ef   :  { %v4373_v51 = vsub.f32 %v17100_v37, %v19445_v24  ;;  %12033 = vmatmul.mubr.f32.gmra.mrb[18].mxu1 %v4334_v61  ;;  %v4354_v54 = vand.u32 4294901760, %v4353_v34  ;;  %v19446_v11 = vand.u32 4294901760, %v17141_v0  ;;  %v13969_v35 = vpack.c.bf16 %v4542_v53, %v4535_v7 }
 0x1f0   :  { %12035 = vmatprep.mubr.f32.mxu1 %v4344_v21  ;;  %13956 = vmatpush3.bf16.msra.mxu1 %v13953_v2  ;;  %v4364_v45 = vand.u32 4294901760, %v4363_v9  ;;  %v13973_v26 = vpack.c.bf16 %v4556_v12, %v4549_v36  ;;  %v4563_v8 = vand.u32 4294901760, %v4562_v58  ;;  %v4570_v24 = vand.u32 4294901760, %v4569_v3 }
 0x1f1   :  { %v4383_v46 = vsub.f32 %v17141_v0, %v19446_v11  ;;  %13958 = vmatprep.subr.bf16.mxu1 %v13957_v4  ;;  %v4374_v61 = vand.u32 4294901760, %v4373_v51  ;;  %v19447_v32 = vand.u32 4294901760, %v17123_v39  ;;  %v13981_v14 = vpack.c.bf16 %v16989_v10, %v16994_v59 }
 0x1f2   :  { %v17277_v2 = vpack.c.bf16 %v17010_v49, %v17024_v5  ;;  %v19448_v34 = vand.u32 4294901760, %v17180_v50  ;;  %v13977_v7 = vpack.c.bf16 %v4570_v24, %v4563_v8  ;;  %v17284_v3 = vpack.c.bf16 %v17050_v20, %v17052_v28 }
 0x1f3   :  { %v4393_v43 = vsub.f32 %v17123_v39, %v19447_v32  ;;  %12036 = vmatmul.mubr.f32.gmra.mrb[20].mxu1 %v4354_v54  ;;  %v17288_v58 = vpack.c.bf16 %v17062_v16, %v17079_v22  ;;  %v4384_v21 = vand.u32 4294901760, %v4383_v46  ;;  %v17292_v51 = vpack.c.bf16 %v17103_v27, %v17125_v33 }
 0x1f4   :  { %v4403_v9 = vsub.f32 %v17180_v50, %v19448_v34  ;;  %12038 = vmatprep.mubr.f32.mxu1 %v4364_v45  ;;  %13960 = vmatpush3.bf16.msra.mxu1 %v13957_v4  ;;  %v17296_v53 = vpack.c.bf16 %v17143_v41, %v17152_v44  ;;  %v17300_v36 = vpack.c.bf16 %v17164_v29, %v17182_v52  ;;  %v19449_v4 = vand.u32 4294901760, %v16994_v59 }
 0x1f5   :  { %13962 = vmatprep.subr.bf16.mxu1 %v13961_v30  ;;  %v17304_v12 = vpack.c.bf16 %v17184_v47, %v17198_v19  ;;  %v19450_v54 = vand.u32 4294901760, %v16989_v10  ;;  %v19451_v46 = vand.u32 4294901760, %v17024_v5  ;;  %v19452_v45 = vand.u32 4294901760, %v17010_v49 }
 0x1f6   :  { %v19453_v24 = vand.u32 4294901760, %v17052_v28  ;;  %v19454_v32 = vand.u32 4294901760, %v17050_v20  ;;  %v19455_v15 = vand.u32 4294901760, %v17079_v22  ;;  %v19456_v59 = vand.u32 4294901760, %v17062_v16 }
 0x1f7   :  { %v17310_v11 = vpack.c.bf16 %v19450_v54, %v19449_v4  ;;  %v17316_v8 = vpack.c.bf16 %v19452_v45, %v19451_v46  ;;  %v19457_v10 = vand.u32 4294901760, %v17125_v33  ;;  %v19458_v5 = vand.u32 4294901760, %v17103_v27  ;;  %12039 = vmatmul.mubr.f32.gmra.mrb[22].mxu1 %v4374_v61 }
 0x1f8   :  { %v17322_v34 = vpack.c.bf16 %v19454_v32, %v19453_v24  ;;  %v17328_v50 = vpack.c.bf16 %v19456_v59, %v19455_v15  ;;  %v19459_v49 = vand.u32 4294901760, %v17152_v44  ;;  %v19460_v28 = vand.u32 4294901760, %v17143_v41  ;;  %12041 = vmatprep.mubr.f32.mxu1 %v4384_v21  ;;  %13964 = vmatpush3.bf16.msra.mxu1 %v13961_v30 }
 0x1f9   :  { %v17334_v4 = vpack.c.bf16 %v19458_v5, %v19457_v10  ;;  %v19461_v20 = vand.u32 4294901760, %v17182_v52  ;;  %v19462_v22 = vand.u32 4294901760, %v17164_v29  ;;  %v19463_v16 = vand.u32 4294901760, %v17198_v19  ;;  %13966 = vmatprep.subr.bf16.mxu1 %v13965_v23  ;;  %v19475_v10 = vld [vmem:[#allocation19_spill] sm:$0xff]  ;;  %v19477_v5 = vld [vmem:[#allocation24_spill] sm:$0xff] }
 0x1fa   :  { %v17340_v54 = vpack.c.bf16 %v19460_v28, %v19459_v49  ;;  %v19464_v33 = vand.u32 4294901760, %v17184_v47  ;;  %v4432_v44 = vand.u32 4294901760, %v17216_v38  ;;  %v17357_v41 = vsub.f32 %v17166_v60, %v17261_v13  ;;  %v19478_v49 = vld [vmem:[#allocation14_spill] sm:$0xff]  ;;  %v19480_v28 = vld [vmem:[#allocation25_spill] sm:$0xff] }
 0x1fb   :  { %v17346_v46 = vpack.c.bf16 %v19462_v22, %v19461_v20  ;;  %v4394_v52 = vand.u32 4294901760, %v4393_v43  ;;  %v19465_v29 = vand.u32 4294901760, %v17159_v1  ;;  %v4442_v19 = vand.u32 4294901760, %v17265_v31  ;;  %v19482_v20 = vld [vmem:[#allocation17_spill] sm:$0xff]  ;;  %v19483_v22 = vld [vmem:[#allocation34_spill] sm:$0xff] }
 0x1fc   :  { %v17352_v27 = vpack.c.bf16 %v19464_v33, %v19463_v16  ;;  %v4404_v61 = vand.u32 4294901760, %v4403_v9  ;;  %v19466_v47 = vand.u32 4294901760, %v17219_v6  ;;  %13968 = vmatpush3.bf16.msra.mxu1 %v13965_v23  ;;  %v4452_v30 = vand.u32 4294901760, %v17357_v41  ;;  %v19484_v16 = vld [vmem:[#allocation28_spill] sm:$0xff]  ;;  %v19485_v33 = vld [vmem:[#allocation33_spill] sm:$0xff] }
 0x1fd   :  { %v4413_v15 = vsub.f32 %v17159_v1, %v19465_v29  ;;  %12042 = vmatmul.mubr.f32.gmra.mrb[24].mxu1 %v4394_v52  ;;  %13970 = vmatprep.subr.bf16.mxu1 %v13969_v35  ;;  %v4433_v43 = vsub.f32 %v17216_v38, %v4432_v44  ;;  %v4443_v9 = vsub.f32 %v17265_v31, %v4442_v19  ;;  %v19486_v52 = vld [vmem:[#allocation47_spill] sm:$0xff] }
 0x1fe   :  { %v4423_v21 = vsub.f32 %v17219_v6, %v19466_v47  ;;  %12044 = vmatprep.mubr.f32.mxu1 %v4404_v61  ;;  %v4453_v23 = vsub.f32 %v17357_v41, %v4452_v30  ;;  %v19490_v47 = vand.u32 4294901760, %v19478_v49 }
 0x1ff   :  { %v4414_v60 = vand.u32 4294901760, %v4413_v15  ;;  %v4434_v24 = vand.u32 4294901760, %v4433_v43  ;;  %v4444_v32 = vand.u32 4294901760, %v4443_v9  ;;  %v19488_v15 = vand.u32 4294901760, %v19475_v10 }
 0x200   :  { %v4424_v45 = vand.u32 4294901760, %v4423_v21  ;;  %13972 = vmatpush3.bf16.msra.mxu1 %v13969_v35  ;;  %v4454_v59 = vand.u32 4294901760, %v4453_v23  ;;  %v19467_v35 = vld [vmem:[#allocation23_spill] sm:$0xff]  ;;  %v19493_v43 = vand.u32 4294901760, %v17120_v17 }
 0x201   :  { %12045 = vmatmul.mubr.f32.gmra.mrb[26].mxu1 %v4414_v60  ;;  %13974 = vmatprep.subr.bf16.mxu1 %v13973_v26  ;;  %v19492_v60 = vand.u32 4294901760, %v17075_v25 }
 0x202   :  { %12047 = vmatprep.mubr.f32.mxu1 %v4424_v45  ;;  %v19495_v45 = vand.u32 4294901760, %v17141_v0 }
 0x204   :  { %13976 = vmatpush3.bf16.msra.mxu1 %v13973_v26  ;;  %v19468_v26 = vld [vmem:[#allocation29_spill] sm:$0xff] }
 0x205   :  { %12048 = vmatmul.mubr.f32.gmra.mrb[28].mxu1 %v4434_v24  ;;  %13978 = vmatprep.subr.bf16.mxu1 %v13977_v7 }
 0x206   :  { %12050 = vmatprep.mubr.f32.mxu1 %v4444_v32 }
 0x208   :  { %13980 = vmatpush3.bf16.msra.mxu1 %v13977_v7  ;;  %v19471_v7 = vld [vmem:[#allocation37_spill] sm:$0xff] }
 0x209   :  { %12051 = vmatmul.mubr.f32.gmra.mrb[30].mxu1 %v4454_v59  ;;  %13982 = vmatprep.subr.bf16.mxu1 %v13981_v14 }
 0x20a   :  { %12085 = vmatprep.mubr.f32.mxu1 %v16979_v55 }
 0x20d   :  { %12086 = vmatmul.mubr.f32.vlgmr.msra.gmra.mrb[16].mxu1 %v16974_v48 }
 0x20e   :  { %12088 = vmatprep.mubr.f32.mxu1 %v17026_v18  ;;  %13984 = vmatpush3.bf16.msra.mxu1 %v13981_v14  ;;  %v19469_v14 = vld [vmem:[#allocation32_spill] sm:$0xff] }
 0x20f   :  { %13986 = vmatprep.subr.bf16.mxu1 %v17277_v2 }
 0x211   :  { %12089 = vmatmul.mubr.f32.gmra.mrb[18].mxu1 %v17012_v57 }
 0x212   :  { %12091 = vmatprep.mubr.f32.mxu1 %v17060_v62  ;;  %13988 = vmatpush3.bf16.msra.mxu1 %v17277_v2  ;;  %v19470_v2 = vld [vmem:[#allocation26_spill] sm:$0xff] }
 0x213   :  { %13990 = vmatprep.subr.bf16.mxu1 %v17284_v3 }
 0x215   :  { %12092 = vmatmul.mubr.f32.gmra.mrb[20].mxu1 %v17047_v40 }
 0x216   :  { %12094 = vmatprep.mubr.f32.mxu1 %v17081_v63  ;;  %13992 = vmatpush3.bf16.msra.mxu1 %v17284_v3  ;;  %v19472_v3 = vld [vmem:[#allocation36_spill] sm:$0xff] }
 0x217   :  { %13994 = vmatprep.subr.bf16.mxu1 %v17288_v58 }
 0x219   :  { %12095 = vmatmul.mubr.f32.gmra.mrb[22].mxu1 %v17064_v42 }
 0x21a   :  { %12097 = vmatprep.mubr.f32.mxu1 %v19467_v35  ;;  %13996 = vmatpush3.bf16.msra.mxu1 %v17288_v58  ;;  %v19473_v58 = vld [vmem:[#allocation20_spill] sm:$0xff] }
 0x21b   :  { %13998 = vmatprep.subr.bf16.mxu1 %v17292_v51  ;;  %v19487_v29 = vand.u32 4294901760, %v19473_v58 }
 0x21d   :  { %12098 = vmatmul.mubr.f32.gmra.mrb[24].mxu1 %v19468_v26 }
 0x21e   :  { %12100 = vmatprep.mubr.f32.mxu1 %v19469_v14  ;;  %14000 = vmatpush3.bf16.msra.mxu1 %v17292_v51  ;;  %v19474_v51 = vld [vmem:[#allocation13_spill] sm:$0xff] }
 0x21f   :  { %14002 = vmatprep.subr.bf16.mxu1 %v17296_v53 }
 0x221   :  { %12101 = vmatmul.mubr.f32.gmra.mrb[26].mxu1 %v19470_v2 }
 0x222   :  { %12103 = vmatprep.mubr.f32.mxu1 %v19471_v7  ;;  %14004 = vmatpush3.bf16.msra.mxu1 %v17296_v53  ;;  %v19476_v53 = vld [vmem:[#allocation27_spill] sm:$0xff] }
 0x223   :  { %14006 = vmatprep.subr.bf16.mxu1 %v17300_v36  ;;  %v19489_v61 = vand.u32 4294901760, %v19476_v53 }
 0x225   :  { %12104 = vmatmul.mubr.f32.gmra.mrb[28].mxu1 %v19472_v3 }
 0x226   :  { %12106 = vmatprep.mubr.f32.mxu1 %v17243_v56  ;;  %14008 = vmatpush3.bf16.msra.mxu1 %v17300_v36  ;;  %v19479_v36 = vld [vmem:[#allocation21_spill] sm:$0xff] }
 0x227   :  { %14010 = vmatprep.subr.bf16.mxu1 %v17304_v12  ;;  %v19491_v21 = vand.u32 4294901760, %v19479_v36 }
 0x229   :  { %12107 = vmatmul.mubr.f32.gmra.mrb[30].mxu1 %v17261_v13 }
 0x22a   :  { %14012 = vmatpush3.bf16.msra.mxu1 %v17304_v12  ;;  %12141 = vmatprep.mubr.f32.mxu1 %v19473_v58  ;;  %v19481_v12 = vld [vmem:[#allocation15_spill] sm:$0xff] }
 0x22b   :  { %14014 = vmatprep.subr.bf16.mxu1 %v19474_v51 }
 0x22d   :  { %12142 = vmatmul.mubr.f32.vlgmr.msra.gmra.mrb[16].mxu1 %v19475_v10 }
 0x22e   :  { %12144 = vmatprep.mubr.f32.mxu1 %v19476_v53  ;;  %14016 = vmatpush3.bf16.msra.mxu1 %v19474_v51 }
 0x22f   :  { %14018 = vmatprep.subr.bf16.mxu1 %v19477_v5 }
 0x231   :  { %12145 = vmatmul.mubr.f32.gmra.mrb[18].mxu1 %v19478_v49 }
 0x232   :  { %12147 = vmatprep.mubr.f32.mxu1 %v19479_v36  ;;  %14020 = vmatpush3.bf16.msra.mxu1 %v19477_v5 }
 0x233   :  { %14022 = vmatprep.subr.bf16.mxu1 %v19480_v28 }
 0x235   :  { %12148 = vmatmul.mubr.f32.gmra.mrb[20].mxu1 %v17075_v25  ;;  %v19496_v25 = vand.u32 4294901760, %v17123_v39 }
 0x236   :  { %12150 = vmatprep.mubr.f32.mxu1 %v17120_v17  ;;  %14024 = vmatpush3.bf16.msra.mxu1 %v19480_v28  ;;  %v19497_v17 = vand.u32 4294901760, %v19483_v22 }
 0x237   :  { %14026 = vmatprep.subr.bf16.mxu1 %v19481_v12 }
 0x239   :  { %12151 = vmatmul.mubr.f32.gmra.mrb[22].mxu1 %v17100_v37 }
 0x23a   :  { %12153 = vmatprep.mubr.f32.mxu1 %v17141_v0  ;;  %14028 = vmatpush3.bf16.msra.mxu1 %v19481_v12  ;;  %v19499_v0 = vand.u32 4294901760, %v17219_v6 }
 0x23b   :  { %14030 = vmatprep.subr.bf16.mxu1 %v19482_v20 }
 0x23d   :  { %12154 = vmatmul.mubr.f32.gmra.mrb[24].mxu1 %v17123_v39 }
 0x23e   :  { %12156 = vmatprep.mubr.f32.mxu1 %v19483_v22  ;;  %14032 = vmatpush3.bf16.msra.mxu1 %v19482_v20 }
 0x23f   :  { %14034 = vmatprep.subr.bf16.mxu1 %v19484_v16 }
 0x241   :  { %12157 = vmatmul.mubr.f32.gmra.mrb[26].mxu1 %v17159_v1 }
 0x242   :  { %12159 = vmatprep.mubr.f32.mxu1 %v17219_v6  ;;  %14036 = vmatpush3.bf16.msra.mxu1 %v19484_v16 }
 0x243   :  { %14038 = vmatprep.subr.bf16.mxu1 %v19485_v33 }
 0x245   :  { %12160 = vmatmul.mubr.f32.gmra.mrb[28].mxu1 %v17216_v38 }
 0x246   :  { %12162 = vmatprep.mubr.f32.mxu1 %v17265_v31  ;;  %14040 = vmatpush3.bf16.msra.mxu1 %v19485_v33 }
 0x247   :  { %14042 = vmatprep.subr.bf16.mxu1 %v19486_v52 }
 0x249   :  { %12163 = vmatmul.mubr.f32.gmra.mrb[30].mxu1 %v17357_v41 }
 0x24a   :  { %14044 = vmatpush3.bf16.msra.mxu1 %v19486_v52  ;;  %12197 = vmatprep.mubr.f32.mxu1 %v19487_v29 }
 0x24b   :  { %14046 = vmatprep.subr.bf16.mxu1 %v17310_v11 }
 0x24d   :  { %12198 = vmatmul.mubr.f32.vlgmr.msra.gmra.mrb[16].mxu1 %v19488_v15 }
 0x24e   :  { %12200 = vmatprep.mubr.f32.mxu1 %v19489_v61  ;;  %14048 = vmatpush3.bf16.msra.mxu1 %v17310_v11  ;;  %v19494_v11 = vand.u32 4294901760, %v17100_v37  ;;  %v19498_v37 = vand.u32 4294901760, %v17159_v1 }
 0x24f   :  { %14050 = vmatprep.subr.bf16.mxu1 %v17316_v8 }
 0x251   :  { %12201 = vmatmul.mubr.f32.gmra.mrb[18].mxu1 %v19490_v47 }
 0x252   :  { %12203 = vmatprep.mubr.f32.mxu1 %v19491_v21  ;;  %14052 = vmatpush3.bf16.msra.mxu1 %v17316_v8 }
 0x253   :  { %14054 = vmatprep.subr.bf16.mxu1 %v17322_v34 }
 0x255   :  { %12204 = vmatmul.mubr.f32.gmra.mrb[20].mxu1 %v19492_v60 }
 0x256   :  { %12206 = vmatprep.mubr.f32.mxu1 %v19493_v43  ;;  %14056 = vmatpush3.bf16.msra.mxu1 %v17322_v34 }
 0x257   :  { %14058 = vmatprep.subr.bf16.mxu1 %v17328_v50 }
 0x259   :  { %12207 = vmatmul.mubr.f32.gmra.mrb[22].mxu1 %v19494_v11 }
 0x25a   :  { %12209 = vmatprep.mubr.f32.mxu1 %v19495_v45  ;;  %14060 = vmatpush3.bf16.msra.mxu1 %v17328_v50 }
 0x25b   :  { %14062 = vmatprep.subr.bf16.mxu1 %v17334_v4 }
 0x25d   :  { %12210 = vmatmul.mubr.f32.gmra.mrb[24].mxu1 %v19496_v25 }
 0x25e   :  { %12212 = vmatprep.mubr.f32.mxu1 %v19497_v17  ;;  %14064 = vmatpush3.bf16.msra.mxu1 %v17334_v4 }
 0x25f   :  { %14066 = vmatprep.subr.bf16.mxu1 %v17340_v54 }
 0x261   :  { %12213 = vmatmul.mubr.f32.gmra.mrb[26].mxu1 %v19498_v37 }
 0x262   :  { %12215 = vmatprep.mubr.f32.mxu1 %v19499_v0  ;;  %14068 = vmatpush3.bf16.msra.mxu1 %v17340_v54 }
 0x263   :  { %14070 = vmatprep.subr.bf16.mxu1 %v17346_v46 }
 0x265   :  { %12216 = vmatmul.mubr.f32.gmra.mrb[28].mxu1 %v4432_v44 }
 0x266   :  { %12218 = vmatprep.mubr.f32.mxu1 %v4442_v19  ;;  %14072 = vmatpush3.bf16.msra.mxu1 %v17346_v46 }
 0x267   :  { %14074 = vmatprep.subr.bf16.mxu1 %v17352_v27 }
 0x269   :  { %12219 = vmatmul.mubr.f32.gmra.mrb[30].mxu1 %v4452_v30 }
 0x26a   :  { %14076 = vmatpush3.bf16.msra.mxu1 %v17352_v27  ;;  %12253 = vmatprep.mubr.f32.mxu1 %v16979_v55 }
 0x26b   :  { %14078 = vmatprep.subr.bf16.mxu1 %v19474_v51 }
 0x26d   :  { %12254 = vmatmul.mubr.f32.vlgmr.msra.gmra.mrb[16].mxu1 %v16974_v48 }
 0x26e   :  { %12256 = vmatprep.mubr.f32.mxu1 %v17026_v18  ;;  %14080 = vmatpush3.bf16.msra.mxu1 %v19474_v51 }
 0x26f   :  { %14082 = vmatprep.subr.bf16.mxu1 %v19477_v5 }
 0x271   :  { %12257 = vmatmul.mubr.f32.gmra.mrb[18].mxu1 %v17012_v57 }
 0x272   :  { %12259 = vmatprep.mubr.f32.mxu1 %v17060_v62  ;;  %14084 = vmatpush3.bf16.msra.mxu1 %v19477_v5 }
 0x273   :  { %14086 = vmatprep.subr.bf16.mxu1 %v19480_v28 }
 0x275   :  { %12260 = vmatmul.mubr.f32.gmra.mrb[20].mxu1 %v17047_v40 }
 0x276   :  { %12262 = vmatprep.mubr.f32.mxu1 %v17081_v63  ;;  %14088 = vmatpush3.bf16.msra.mxu1 %v19480_v28 }
 0x277   :  { %14090 = vmatprep.subr.bf16.mxu1 %v19481_v12 }
 0x279   :  { %12263 = vmatmul.mubr.f32.gmra.mrb[22].mxu1 %v17064_v42 }
 0x27a   :  { %12265 = vmatprep.mubr.f32.mxu1 %v19467_v35  ;;  %14092 = vmatpush3.bf16.msra.mxu1 %v19481_v12 }
 0x27b   :  { %14094 = vmatprep.subr.bf16.mxu1 %v19482_v20 }
 0x27d   :  { %12266 = vmatmul.mubr.f32.gmra.mrb[24].mxu1 %v19468_v26 }
 0x27e   :  { %12268 = vmatprep.mubr.f32.mxu1 %v19469_v14  ;;  %14096 = vmatpush3.bf16.msra.mxu1 %v19482_v20 }
 0x27f   :  { %14098 = vmatprep.subr.bf16.mxu1 %v19484_v16 }
 0x281   :  { %12269 = vmatmul.mubr.f32.gmra.mrb[26].mxu1 %v19470_v2 }
 0x282   :  { %12271 = vmatprep.mubr.f32.mxu1 %v19471_v7  ;;  %14100 = vmatpush3.bf16.msra.mxu1 %v19484_v16 }
 0x283   :  { %14102 = vmatprep.subr.bf16.mxu1 %v19485_v33 }
 0x285   :  { %12272 = vmatmul.mubr.f32.gmra.mrb[28].mxu1 %v19472_v3 }
 0x286   :  { %12274 = vmatprep.mubr.f32.mxu1 %v17243_v56  ;;  %14104 = vmatpush3.bf16.msra.mxu1 %v19485_v33  ;;  %v11975_v39 = vpop.f32.mrb[16].mxu0 }
 0x287   :  { %14106 = vmatprep.subr.bf16.mxu1 %v19486_v52  ;;  %v4125_v1 = vpop.f32.mrb[17].mxu0  ;;  %v17567_v41 = vand.u32 4294901760, %v11975_v39 }
 0x288   :  { %v17517_v50 = vand.u32 4294901760, %v4125_v1 }
 0x289   :  { %12275 = vmatmul.mubr.f32.gmra.mrb[30].mxu1 %v17261_v13  ;;  %v17570_v19 = vsub.f32 %v11975_v39, %v17567_v41 }
 0x28a   :  { %14108 = vmatpush3.bf16.msra.mxu1 %v19486_v52  ;;  %12309 = vmatprep.mubr.f32.mxu1 %v16979_v55  ;;  %v17522_v6 = vsub.f32 %v4125_v1, %v17517_v50  ;;  %v11978_v38 = vpop.f32.mrb[18].mxu0 }
 0x28b   :  { %v4137_v31 = vpop.f32.mrb[19].mxu0  ;;  %v19080_v9 = vand.u32 4294901760, %v17570_v19  ;;  %v17573_v59 = vand.u32 4294901760, %v11978_v38 }
 0x28c   :  { %v19082_v8 = vand.u32 4294901760, %v17522_v6 }
 0x28d   :  { %12310 = vmatmul.mubr.f32.vlgmr.msra.gmra.mrb[16].mxu1 %v16974_v48  ;;  %v17588_v5 = vsub.f32 %v11978_v38, %v17573_v59 }
 0x28e   :  { %12312 = vmatprep.mubr.f32.mxu1 %v17026_v18  ;;  %v17527_v34 = vpop.f32.mrb[20].mxu0  ;;  %v5589_v4 = vsub.f32 %v17522_v6, %v19082_v8 }
 0x28f   :  { %v17532_v54 = vpop.f32.mrb[21].mxu0  ;;  %v19081_v45 = vand.u32 4294901760, %v17588_v5  ;;  %v17604_v25 = vand.u32 4294901760, %v17527_v34 }
 0x290   :  { %v5590_v55 = vand.u32 4294901760, %v5589_v4 }
 0x291   :  { %12313 = vmatmul.mubr.f32.gmra.mrb[18].mxu1 %v17012_v57 }
 0x292   :  { %12315 = vmatprep.mubr.f32.mxu1 %v17060_v62  ;;  %v17536_v46 = vpop.f32.mrb[22].mxu0  ;;  %12365 = vmatprep.mubr.f32.mxu0 %v5590_v55 }
 0x293   :  { %v17538_v48 = vpop.f32.mrb[23].mxu0 }
 0x295   :  { %12316 = vmatmul.mubr.f32.gmra.mrb[20].mxu1 %v17047_v40 }
 0x296   :  { %12318 = vmatprep.mubr.f32.mxu1 %v17081_v63  ;;  %v17542_v18 = vpop.f32.mrb[24].mxu0 }
 0x297   :  { %v17544_v27 = vpop.f32.mrb[25].mxu0 }
 0x299   :  { %12319 = vmatmul.mubr.f32.gmra.mrb[22].mxu1 %v17064_v42 }
 0x29a   :  { %12321 = vmatprep.mubr.f32.mxu1 %v19467_v35  ;;  %v17548_v57 = vpop.f32.mrb[26].mxu0  ;;  %v17575_v35 = vand.u32 4294901760, %v4137_v31 }
 0x29b   :  { %v17550_v62 = vpop.f32.mrb[27].mxu0 }
 0x29c   :  { %v17591_v49 = vsub.f32 %v4137_v31, %v17575_v35 }
 0x29d   :  { %12322 = vmatmul.mubr.f32.gmra.mrb[24].mxu1 %v19468_v26 }
 0x29e   :  { %12324 = vmatprep.mubr.f32.mxu1 %v19469_v14  ;;  %v17554_v44 = vpop.f32.mrb[28].mxu0 }
 0x29f   :  { %v17556_v40 = vpop.f32.mrb[29].mxu0 }
 0x2a1   :  { %12325 = vmatmul.mubr.f32.gmra.mrb[26].mxu1 %v19470_v2  ;;  %v17582_v2 = vsub.f32 %v17570_v19, %v19080_v9 }
 0x2a2   :  { %12327 = vmatprep.mubr.f32.mxu1 %v19471_v7  ;;  %v17560_v63 = vpop.f32.mrb[30].mxu0 }
 0x2a3   :  { %v17562_v42 = vpop.f32.mrb[31].mxu0 }
 0x2a5   :  { %12328 = vmatmul.mubr.f32.gmra.mrb[28].mxu1 %v19472_v3 }
 0x2a6   :  { %12330 = vmatprep.mubr.f32.mxu1 %v17243_v56 }
 0x2a9   :  { %12331 = vmatmul.mubr.f32.gmra.mrb[30].mxu1 %v17261_v13 }
 0x360   :  { %v12311_v30 = vpop.f32.mrb[16].mxu1 }
 0x361   :  { %v5509_v24 = vand.u32 4294901760, %v12311_v30  ;;  %v5411_v23 = vpop.f32.mrb[17].mxu1 }
 0x362   :  { %v5506_v32 = vand.u32 4294901760, %v5411_v23 }
 0x363   :  { %v5755_v26 = vsub.f32 %v12311_v30, %v5509_v24 }
 0x364   :  { %v17577_v14 = vpack.c.bf16 %v5509_v24, %v5506_v32  ;;  %v5748_v56 = vsub.f32 %v5411_v23, %v5506_v32  ;;  %v12314_v13 = vpop.f32.mrb[18].mxu1 }
 0x365   :  { %v5756_v7 = vand.u32 4294901760, %v5755_v26  ;;  %v5515_v3 = vand.u32 4294901760, %v12314_v13  ;;  %v5423_v58 = vpop.f32.mrb[19].mxu1 }
 0x366   :  { %v5749_v51 = vand.u32 4294901760, %v5748_v56  ;;  %v5512_v10 = vand.u32 4294901760, %v5423_v58  ;;  %14110 = vmatprep.subr.bf16.mxu0 %v17577_v14  ;;  %v17585_v53 = vpack.c.bf16 %v5755_v26, %v5748_v56 }
 0x367   :  { %v5757_v36 = vsub.f32 %v5755_v26, %v5756_v7  ;;  %v5769_v28 = vsub.f32 %v12314_v13, %v5515_v3  ;;  %14112 = vmatpush3.bf16.msra.mxu0 %v17577_v14 }
 0x368   :  { %v5750_v12 = vsub.f32 %v5748_v56, %v5749_v51  ;;  %v17594_v20 = vpack.c.bf16 %v5515_v3, %v5512_v10  ;;  %v5762_v22 = vsub.f32 %v5423_v58, %v5512_v10  ;;  %v12317_v16 = vpop.f32.mrb[20].mxu1  ;;  %v17596_v33 = vpack.c.bf16 %v5756_v7, %v5749_v51 }
 0x369   :  { %v5770_v29 = vand.u32 4294901760, %v5769_v28  ;;  %v5521_v15 = vand.u32 4294901760, %v12317_v16  ;;  %v5435_v61 = vpop.f32.mrb[21].mxu1  ;;  %v5758_v47 = vand.u32 4294901760, %v5757_v36  ;;  %v19085_v7 = vand.u32 4294901760, %v17591_v49 }
 0x36a   :  { %19500 = vst [vmem:[#allocation41_spill] sm:$0xff] %v17596_v33  ;;  %v5763_v21 = vand.u32 4294901760, %v5762_v22  ;;  %v5518_v60 = vand.u32 4294901760, %v5435_v61  ;;  %14114 = vmatprep.subr.bf16.mxu0 %v17594_v20  ;;  %v5751_v43 = vand.u32 4294901760, %v5750_v12  ;;  %v17600_v11 = vpack.c.bf16 %v5769_v28, %v5762_v22 }
 0x36b   :  { %v5771_v17 = vsub.f32 %v5769_v28, %v5770_v29  ;;  %v5783_v37 = vsub.f32 %v12317_v16, %v5521_v15  ;;  %14116 = vmatpush3.bf16.msra.mxu0 %v17594_v20  ;;  %v17618_v3 = vand.u32 4294901760, %v17532_v54 }
 0x36c   :  { %v5764_v0 = vsub.f32 %v5762_v22, %v5763_v21  ;;  %v17607_v39 = vpack.c.bf16 %v5521_v15, %v5518_v60  ;;  %v5776_v1 = vsub.f32 %v5435_v61, %v5518_v60  ;;  %v12320_v38 = vpop.f32.mrb[22].mxu1  ;;  %v17609_v31 = vpack.c.bf16 %v5758_v47, %v5751_v43 }
 0x36d   :  { %v5784_v4 = vand.u32 4294901760, %v5783_v37  ;;  %v5527_v55 = vand.u32 4294901760, %v12320_v38  ;;  %v5447_v30 = vpop.f32.mrb[23].mxu1  ;;  %v5772_v24 = vand.u32 4294901760, %v5771_v17  ;;  %v17611_v23 = vpack.c.bf16 %v5770_v29, %v5763_v21 }
 0x36e   :  { %19501 = vst [vmem:[#allocation43_spill] sm:$0xff] %v17607_v39  ;;  %v5777_v32 = vand.u32 4294901760, %v5776_v1  ;;  %v5524_v26 = vand.u32 4294901760, %v5447_v30  ;;  %14118 = vmatprep.subr.bf16.mxu0 %v17607_v39  ;;  %v5765_v56 = vand.u32 4294901760, %v5764_v0  ;;  %v17614_v13 = vpack.c.bf16 %v5783_v37, %v5776_v1 }
 0x36f   :  { %19502 = vst [vmem:[#allocation49_spill] sm:$0xff] %v17611_v23  ;;  %v5785_v58 = vsub.f32 %v5783_v37, %v5784_v4  ;;  %v5797_v51 = vsub.f32 %v12320_v38, %v5527_v55  ;;  %14120 = vmatpush3.bf16.msra.mxu0 %v17607_v39  ;;  %v17632_v37 = vsub.f32 %v17527_v34, %v17604_v25 }
 0x370   :  { %v5778_v10 = vsub.f32 %v5776_v1, %v5777_v32  ;;  %v17621_v36 = vpack.c.bf16 %v5527_v55, %v5524_v26  ;;  %v5790_v28 = vsub.f32 %v5447_v30, %v5524_v26  ;;  %v12323_v12 = vpop.f32.mrb[24].mxu1  ;;  %v17623_v22 = vpack.c.bf16 %v5772_v24, %v5765_v56 }
 0x371   :  { %v5798_v16 = vand.u32 4294901760, %v5797_v51  ;;  %v5533_v29 = vand.u32 4294901760, %v12323_v12  ;;  %v5459_v15 = vpop.f32.mrb[25].mxu1  ;;  %v5786_v61 = vand.u32 4294901760, %v5785_v58  ;;  %v17625_v47 = vpack.c.bf16 %v5784_v4, %v5777_v32 }
 0x372   :  { %19503 = vst [vmem:[#allocation44_spill] sm:$0xff] %v17621_v36  ;;  %v5791_v21 = vand.u32 4294901760, %v5790_v28  ;;  %v5530_v60 = vand.u32 4294901760, %v5459_v15  ;;  %14122 = vmatprep.subr.bf16.mxu0 %v17621_v36  ;;  %v5779_v43 = vand.u32 4294901760, %v5778_v10  ;;  %v17628_v17 = vpack.c.bf16 %v5797_v51, %v5790_v28 }
 0x373   :  { %19504 = vst [vmem:[#allocation50_spill] sm:$0xff] %v17625_v47  ;;  %v5799_v0 = vsub.f32 %v5797_v51, %v5798_v16  ;;  %v5811_v1 = vsub.f32 %v12323_v12, %v5533_v29  ;;  %14124 = vmatpush3.bf16.msra.mxu0 %v17621_v36  ;;  %v17638_v38 = vsub.f32 %v17588_v5, %v19081_v45 }
 0x374   :  { %v5792_v4 = vsub.f32 %v5790_v28, %v5791_v21  ;;  %v17640_v55 = vpack.c.bf16 %v5533_v29, %v5530_v60  ;;  %v5804_v30 = vsub.f32 %v5459_v15, %v5530_v60  ;;  %v12326_v24 = vpop.f32.mrb[26].mxu1  ;;  %v17642_v32 = vpack.c.bf16 %v5786_v61, %v5779_v43 }
 0x375   :  { %v5812_v26 = vand.u32 4294901760, %v5811_v1  ;;  %v5539_v56 = vand.u32 4294901760, %v12326_v24  ;;  %v5471_v34 = vpop.f32.mrb[27].mxu1  ;;  %v5800_v58 = vand.u32 4294901760, %v5799_v0  ;;  %v17644_v51 = vpack.c.bf16 %v5798_v16, %v5791_v21 }
 0x376   :  { %19505 = vst [vmem:[#allocation57_spill] sm:$0xff] %v17640_v55  ;;  %v5805_v10 = vand.u32 4294901760, %v5804_v30  ;;  %v5536_v12 = vand.u32 4294901760, %v5471_v34  ;;  %14126 = vmatprep.subr.bf16.mxu0 %v17640_v55  ;;  %v5793_v9 = vand.u32 4294901760, %v5792_v4  ;;  %v17647_v45 = vpack.c.bf16 %v5811_v1, %v5804_v30 }
 0x377   :  { %19506 = vst [vmem:[#allocation59_spill] sm:$0xff] %v17644_v51  ;;  %v17651_v28 = vsub.f32 %v17532_v54, %v17618_v3  ;;  %v5813_v29 = vsub.f32 %v5811_v1, %v5812_v26  ;;  %v5825_v15 = vsub.f32 %v12326_v24, %v5539_v56  ;;  %14128 = vmatpush3.bf16.msra.mxu0 %v17640_v55 }
 0x378   :  { %v17657_v16 = vsub.f32 %v17591_v49, %v19085_v7  ;;  %v5806_v61 = vsub.f32 %v5804_v30, %v5805_v10  ;;  %v17659_v21 = vpack.c.bf16 %v5539_v56, %v5536_v12  ;;  %v5818_v60 = vsub.f32 %v5471_v34, %v5536_v12  ;;  %v12329_v43 = vpop.f32.mrb[28].mxu1 }
 0x379   :  { %v17661_v0 = vpack.c.bf16 %v5800_v58, %v5793_v9  ;;  %v5826_v4 = vand.u32 4294901760, %v5825_v15  ;;  %v5545_v8 = vand.u32 4294901760, %v12329_v43  ;;  %v5483_v54 = vpop.f32.mrb[29].mxu1  ;;  %v5814_v52 = vand.u32 4294901760, %v5813_v29 }
 0x37a   :  { %19507 = vst [vmem:[#allocation58_spill] sm:$0xff] %v17659_v21  ;;  %v17663_v1 = vpack.c.bf16 %v5812_v26, %v5805_v10  ;;  %v5819_v24 = vand.u32 4294901760, %v5818_v60  ;;  %v5542_v51 = vand.u32 4294901760, %v5483_v54  ;;  %14130 = vmatprep.subr.bf16.mxu0 %v17659_v21  ;;  %v5807_v47 = vand.u32 4294901760, %v5806_v61 }
 0x37b   :  { %v17666_v7 = vpack.c.bf16 %v5825_v15, %v5818_v60  ;;  %v17669_v30 = vand.u32 4294901760, %v17536_v46  ;;  %v17672_v56 = vand.u32 4294901760, %v17538_v48  ;;  %v5827_v9 = vsub.f32 %v5825_v15, %v5826_v4  ;;  %14132 = vmatpush3.bf16.msra.mxu0 %v17659_v21 }
 0x37c   :  { %19508 = vst [vmem:[#allocation60_spill] sm:$0xff] %v17663_v1  ;;  %v5839_v34 = vsub.f32 %v12329_v43, %v5545_v8  ;;  %v5820_v58 = vsub.f32 %v5818_v60, %v5819_v24  ;;  %v17675_v26 = vpack.c.bf16 %v5545_v8, %v5542_v51  ;;  %v5832_v10 = vsub.f32 %v5483_v54, %v5542_v51  ;;  %v12332_v12 = vpop.f32.mrb[30].mxu1 }
 0x37d   :  { %v17677_v29 = vpack.c.bf16 %v5814_v52, %v5807_v47  ;;  %v5551_v1 = vand.u32 4294901760, %v12332_v12  ;;  %v5495_v23 = vpop.f32.mrb[31].mxu1  ;;  %v5828_v33 = vand.u32 4294901760, %v5827_v9  ;;  %v17679_v55 = vpack.c.bf16 %v5826_v4, %v5819_v24 }
 0x37e   :  { %v5840_v61 = vand.u32 4294901760, %v5839_v34  ;;  %v5833_v36 = vand.u32 4294901760, %v5832_v10  ;;  %v5548_v39 = vand.u32 4294901760, %v5495_v23  ;;  %14134 = vmatprep.subr.bf16.mxu0 %v17675_v26  ;;  %v5821_v15 = vand.u32 4294901760, %v5820_v58 }
 0x37f   :  { %19509 = vst [vmem:[#allocation62_spill] sm:$0xff] %v17679_v55  ;;  %v17682_v43 = vpack.c.bf16 %v5839_v34, %v5832_v10  ;;  %v17687_v51 = vsub.f32 %v17538_v48, %v17672_v56  ;;  %v5853_v47 = vsub.f32 %v12332_v12, %v5551_v1  ;;  %14136 = vmatpush3.bf16.msra.mxu0 %v17675_v26  ;;  %v17695_v9 = vand.u32 4294901760, %v17544_v27 }
 0x380   :  { %v5841_v52 = vsub.f32 %v5839_v34, %v5840_v61  ;;  %v5834_v60 = vsub.f32 %v5832_v10, %v5833_v36  ;;  %v17690_v4 = vpack.c.bf16 %v5551_v1, %v5548_v39  ;;  %v5846_v54 = vsub.f32 %v5495_v23, %v5548_v39 }
 0x381   :  { %v17692_v24 = vpack.c.bf16 %v5828_v33, %v5821_v15  ;;  %v5854_v58 = vand.u32 4294901760, %v5853_v47  ;;  %v17697_v8 = vpack.c.bf16 %v5840_v61, %v5833_v36  ;;  %v19117_v48 = vand.u32 4294901760, %v17632_v37 }
 0x382   :  { %v5842_v55 = vand.u32 4294901760, %v5841_v52  ;;  %v5847_v21 = vand.u32 4294901760, %v5846_v54  ;;  %14138 = vmatprep.subr.bf16.mxu0 %v17690_v4  ;;  %v5835_v34 = vand.u32 4294901760, %v5834_v60  ;;  %v17701_v12 = vpack.c.bf16 %v5853_v47, %v5846_v54 }
 0x383   :  { %v17705_v39 = vsub.f32 %v17536_v46, %v17669_v30  ;;  %v17708_v33 = vand.u32 4294901760, %v17542_v18  ;;  %v5855_v23 = vsub.f32 %v5853_v47, %v5854_v58  ;;  %14140 = vmatpush3.bf16.msra.mxu0 %v17690_v4  ;;  %v5610_v36 = vand.u32 4294901760, %v17657_v16 }
 0x384   :  { %v5848_v10 = vsub.f32 %v5846_v54, %v5847_v21  ;;  %14142 = vmatprep.subr.bf16.mxu0 %v17609_v31  ;;  %v17714_v61 = vpack.c.bf16 %v5842_v55, %v5835_v34  ;;  %v17716_v15 = vpack.c.bf16 %v5854_v58, %v5847_v21  ;;  %v17720_v46 = vsub.f32 %v17544_v27, %v17695_v9 }
 0x385   :  { %v17723_v52 = vand.u32 4294901760, %v17550_v62  ;;  %v19510_v47 = vand.u32 4294901760, %v17651_v28  ;;  %v5856_v60 = vand.u32 4294901760, %v5855_v23  ;;  %v19511_v54 = vand.u32 4294901760, %v17582_v2 }
 0x386   :  { %v5849_v1 = vand.u32 4294901760, %v5848_v10  ;;  %v19100_v55 = vand.u32 4294901760, %v17705_v39  ;;  %v5620_v27 = vand.u32 4294901760, %v17638_v38  ;;  %v5639_v21 = vsub.f32 %v17632_v37, %v19117_v48 }
 0x387   :  { %v5629_v16 = vsub.f32 %v17651_v28, %v19510_v47  ;;  %12366 = vmatmul.mubr.f32.vlgmr.msra.gmra.mrb[32].mxu0 %v19511_v54  ;;  %v17738_v58 = vsub.f32 %v17542_v18, %v17708_v33  ;;  %v17741_v34 = vand.u32 4294901760, %v17548_v57  ;;  %v19512_v2 = vand.u32 4294901760, %v17687_v51 }
 0x388   :  { %12368 = vmatprep.mubr.f32.mxu0 %v5610_v36  ;;  %14144 = vmatpush3.bf16.msra.mxu0 %v17609_v31  ;;  %v17747_v31 = vpack.c.bf16 %v5856_v60, %v5849_v1  ;;  %v19098_v38 = vand.u32 4294901760, %v17720_v46  ;;  %v17752_v36 = vsub.f32 %v17550_v62, %v17723_v52  ;;  %v17755_v18 = vand.u32 4294901760, %v17556_v40 }
 0x389   :  { %14146 = vmatprep.subr.bf16.mxu0 %v17623_v22  ;;  %v5649_v23 = vsub.f32 %v17687_v51, %v19512_v2  ;;  %v5630_v10 = vand.u32 4294901760, %v5629_v16  ;;  %v5640_v47 = vand.u32 4294901760, %v5639_v21  ;;  %v5659_v1 = vsub.f32 %v17705_v39, %v19100_v55 }
 0x38a   :  { %v19099_v60 = vand.u32 4294901760, %v17738_v58  ;;  %v17764_v54 = vsub.f32 %v17548_v57, %v17741_v34  ;;  %v17767_v62 = vand.u32 4294901760, %v17554_v44  ;;  %v17776_v21 = vand.u32 4294901760, %v17562_v42 }
 0x38b   :  { %12369 = vmatmul.mubr.f32.gmra.mrb[34].mxu0 %v5620_v27  ;;  %v5650_v16 = vand.u32 4294901760, %v5649_v23  ;;  %v19101_v27 = vand.u32 4294901760, %v17752_v36  ;;  %v5669_v57 = vsub.f32 %v17720_v46, %v19098_v38  ;;  %v5660_v2 = vand.u32 4294901760, %v5659_v1 }
 0x38c   :  { %12371 = vmatprep.mubr.f32.mxu0 %v5630_v10  ;;  %14148 = vmatpush3.bf16.msra.mxu0 %v17623_v22  ;;  %v17773_v22 = vsub.f32 %v17556_v40, %v17755_v18  ;;  %v19116_v23 = vand.u32 4294901760, %v17764_v54  ;;  %v17785_v10 = vsub.f32 %v17554_v44, %v17767_v62  ;;  %v17788_v40 = vand.u32 4294901760, %v17560_v63 }
 0x38d   :  { %14150 = vmatprep.subr.bf16.mxu0 %v17642_v32  ;;  %v5679_v38 = vsub.f32 %v17738_v58, %v19099_v60  ;;  %v5670_v1 = vand.u32 4294901760, %v5669_v57  ;;  %v5689_v44 = vsub.f32 %v17752_v36, %v19101_v27  ;;  %v19523_v48 = vand.u32 4294901760, %v17651_v28 }
 0x38e   :  { %v17806_v60 = vsub.f32 %v17560_v63, %v17788_v40 }
 0x38f   :  { %12372 = vmatmul.mubr.f32.gmra.mrb[36].mxu0 %v5640_v47  ;;  %v19115_v47 = vand.u32 4294901760, %v17773_v22  ;;  %v5680_v55 = vand.u32 4294901760, %v5679_v38  ;;  %v5690_v27 = vand.u32 4294901760, %v5689_v44 }
 0x390   :  { %12374 = vmatprep.mubr.f32.mxu0 %v5650_v16  ;;  %14152 = vmatpush3.bf16.msra.mxu0 %v17642_v32  ;;  %v17797_v32 = vsub.f32 %v17562_v42, %v17776_v21  ;;  %v19114_v16 = vand.u32 4294901760, %v17785_v10  ;;  %v5699_v42 = vsub.f32 %v17764_v54, %v19116_v23  ;;  %v19110_v63 = vand.u32 4294901760, %v17806_v60 }
 0x391   :  { %14154 = vmatprep.subr.bf16.mxu0 %v17661_v0  ;;  %v19522_v23 = vand.u32 4294901760, %v17588_v5 }
 0x392   :  { %v19113_v57 = vand.u32 4294901760, %v17797_v32  ;;  %v5700_v38 = vand.u32 4294901760, %v5699_v42 }
 0x393   :  { %12375 = vmatmul.mubr.f32.gmra.mrb[38].mxu0 %v5660_v2  ;;  %v5719_v2 = vsub.f32 %v17785_v10, %v19114_v16  ;;  %v19520_v16 = vand.u32 4294901760, %v17591_v49 }
 0x394   :  { %12377 = vmatprep.mubr.f32.mxu0 %v5670_v1  ;;  %14156 = vmatpush3.bf16.msra.mxu0 %v17661_v0  ;;  %v5709_v0 = vsub.f32 %v17773_v22, %v19115_v47  ;;  %v5729_v44 = vsub.f32 %v17797_v32, %v19113_v57  ;;  %v19519_v57 = vand.u32 4294901760, %v17570_v19  ;;  %v19521_v47 = vld [vmem:[#allocation49_spill] sm:$0xff] }
 0x395   :  { %14158 = vmatprep.subr.bf16.mxu0 %v17677_v29 }
 0x396   :  { %v5710_v1 = vand.u32 4294901760, %v5709_v0 }
 0x397   :  { %12378 = vmatmul.mubr.f32.gmra.mrb[40].mxu0 %v5680_v55  ;;  %v5739_v55 = vsub.f32 %v17806_v60, %v19110_v63  ;;  %v19516_v63 = vld [vmem:[#allocation58_spill] sm:$0xff] }
 0x398   :  { %12380 = vmatprep.mubr.f32.mxu0 %v5690_v27  ;;  %14160 = vmatpush3.bf16.msra.mxu0 %v17677_v29  ;;  %v5720_v29 = vand.u32 4294901760, %v5719_v2  ;;  %v5730_v27 = vand.u32 4294901760, %v5729_v44  ;;  %v17902_v44 = vld [vmem:[#allocation6 + $0x38] sm:$0xff] }
 0x399   :  { %14162 = vmatprep.subr.bf16.mxu0 %v17692_v24  ;;  %v5740_v42 = vand.u32 4294901760, %v5739_v55 }
 0x39b   :  { %12381 = vmatmul.mubr.f32.gmra.mrb[42].mxu0 %v5700_v38 }
 0x39c   :  { %12383 = vmatprep.mubr.f32.mxu0 %v5710_v1  ;;  %14164 = vmatpush3.bf16.msra.mxu0 %v17692_v24  ;;  %v17877_v24 = vld [vmem:[#allocation6 + $0x20] sm:$0xff]  ;;  %v17900_v1 = vld [vmem:[#allocation6 + $0x30] sm:$0xff] }
 0x39d   :  { %14166 = vmatprep.subr.bf16.mxu0 %v17714_v61  ;;  %v19105_v38 = vand.u32 4294901760, %v17877_v24  ;;  %v19109_v55 = vand.u32 4294901760, %v17900_v1 }
 0x39f   :  { %12384 = vmatmul.mubr.f32.gmra.mrb[44].mxu0 %v5720_v29 }
 0x3a0   :  { %12386 = vmatprep.mubr.f32.mxu0 %v5730_v27  ;;  %14168 = vmatpush3.bf16.msra.mxu0 %v17714_v61  ;;  %v17879_v61 = vld [vmem:[#allocation6 + $0x28] sm:$0xff]  ;;  %v19108_v27 = vand.u32 4294901760, %v17902_v44 }
 0x3a1   :  { %14170 = vmatprep.subr.bf16.mxu0 %v17747_v31  ;;  %v19104_v2 = vand.u32 4294901760, %v17879_v61 }
 0x3a3   :  { %12387 = vmatmul.mubr.f32.gmra.mrb[46].mxu0 %v5740_v42  ;;  %v17913_v29 = vpack.c.bf16 %v19104_v2, %v19105_v38  ;;  %v17919_v42 = vld [vmem:[#allocation6 + $0x40] sm:$0xff]  ;;  %v17931_v2 = vpack.c.bf16 %v19108_v27, %v19109_v55  ;;  %v19515_v55 = vld [vmem:[#allocation57_spill] sm:$0xff] }
 0x3a4   :  { %14172 = vmatpush3.bf16.msra.mxu0 %v17747_v31  ;;  %12421 = vmatprep.mubr.f32.mxu0 %v17517_v50  ;;  %v19112_v38 = vand.u32 4294901760, %v17919_v42 }
 0x3a5   :  { %14174 = vmatprep.subr.bf16.mxu0 %v17585_v53 }
 0x3a7   :  { %12422 = vmatmul.mubr.f32.vlgmr.msra.gmra.mrb[32].mxu0 %v17567_v41 }
 0x3a8   :  { %12424 = vmatprep.mubr.f32.mxu0 %v17575_v35  ;;  %14176 = vmatpush3.bf16.msra.mxu0 %v17585_v53  ;;  %v17864_v53 = vld [vmem:[#allocation6] sm:$0xff] }
 0x3a9   :  { %14178 = vmatprep.subr.bf16.mxu0 %v17600_v11 }
 0x3ab   :  { %12425 = vmatmul.mubr.f32.gmra.mrb[34].mxu0 %v17573_v59 }
 0x3ac   :  { %12427 = vmatprep.mubr.f32.mxu0 %v17618_v3  ;;  %14180 = vmatpush3.bf16.msra.mxu0 %v17600_v11  ;;  %v17866_v11 = vld [vmem:[#allocation6 + $0x8] sm:$0xff] }
 0x3ad   :  { %14182 = vmatprep.subr.bf16.mxu0 %v17614_v13 }
 0x3af   :  { %12428 = vmatmul.mubr.f32.gmra.mrb[36].mxu0 %v17604_v25 }
 0x3b0   :  { %12430 = vmatprep.mubr.f32.mxu0 %v17672_v56  ;;  %14184 = vmatpush3.bf16.msra.mxu0 %v17614_v13  ;;  %v19107_v13 = vand.u32 4294901760, %v17864_v53 }
 0x3b1   :  { %14186 = vmatprep.subr.bf16.mxu0 %v17628_v17 }
 0x3b3   :  { %12431 = vmatmul.mubr.f32.gmra.mrb[38].mxu0 %v17669_v30 }
 0x3b4   :  { %12433 = vmatprep.mubr.f32.mxu0 %v17695_v9  ;;  %14188 = vmatpush3.bf16.msra.mxu0 %v17628_v17  ;;  %v17874_v17 = vld [vmem:[#allocation6 + $0x18] sm:$0xff] }
 0x3b5   :  { %14190 = vmatprep.subr.bf16.mxu0 %v17647_v45  ;;  %v19102_v31 = vand.u32 4294901760, %v17874_v17 }
 0x3b7   :  { %12434 = vmatmul.mubr.f32.gmra.mrb[40].mxu0 %v17708_v33 }
 0x3b8   :  { %12436 = vmatprep.mubr.f32.mxu0 %v17723_v52  ;;  %14192 = vmatpush3.bf16.msra.mxu0 %v17647_v45  ;;  %v17868_v45 = vld [vmem:[#allocation6 + $0x10] sm:$0xff] }
 0x3b9   :  { %14194 = vmatprep.subr.bf16.mxu0 %v17666_v7 }
 0x3bb   :  { %12437 = vmatmul.mubr.f32.gmra.mrb[42].mxu0 %v17741_v34 }
 0x3bc   :  { %12439 = vmatprep.mubr.f32.mxu0 %v17755_v18  ;;  %14196 = vmatpush3.bf16.msra.mxu0 %v17666_v7  ;;  %v19106_v7 = vand.u32 4294901760, %v17866_v11 }
 0x3bd   :  { %14198 = vmatprep.subr.bf16.mxu0 %v17682_v43 }
 0x3bf   :  { %12440 = vmatmul.mubr.f32.gmra.mrb[44].mxu0 %v17767_v62 }
 0x3c0   :  { %12442 = vmatprep.mubr.f32.mxu0 %v17776_v21  ;;  %14200 = vmatpush3.bf16.msra.mxu0 %v17682_v43  ;;  %v19103_v43 = vand.u32 4294901760, %v17868_v45 }
 0x3c1   :  { %14202 = vmatprep.subr.bf16.mxu0 %v17701_v12 }
 0x3c2   :  { %v17894_v0 = vpack.c.bf16 %v19102_v31, %v19103_v43  ;;  %v17921_v31 = vld [vmem:[#allocation6 + $0x48] sm:$0xff]  ;;  %v19513_v43 = vld [vmem:[#allocation43_spill] sm:$0xff] }
 0x3c3   :  { %12443 = vmatmul.mubr.f32.gmra.mrb[46].mxu0 %v17788_v40 }
 0x3c4   :  { %14204 = vmatpush3.bf16.msra.mxu0 %v17701_v12  ;;  %12477 = vmatprep.mubr.f32.mxu0 %v17522_v6  ;;  %v17887_v12 = vpack.c.bf16 %v19106_v7, %v19107_v13  ;;  %v19111_v7 = vand.u32 4294901760, %v17921_v31  ;;  %v19514_v13 = vld [vmem:[#allocation44_spill] sm:$0xff] }
 0x3c5   :  { %14206 = vmatprep.subr.bf16.mxu0 %v17577_v14 }
 0x3c6   :  { %14302 = vmatprep.subr.bf16.mxu1 %v17887_v12  ;;  %v17945_v27 = vpack.c.bf16 %v19111_v7, %v19112_v38  ;;  %v19517_v7 = vand.u32 4294901760, %v17522_v6  ;;  %v19518_v38 = vld [vmem:[#allocation41_spill] sm:$0xff]  ;;  %v19524_v6 = vld [vmem:[#allocation50_spill] sm:$0xff] }
 0x3c7   :  { %12478 = vmatmul.mubr.f32.vlgmr.msra.gmra.mrb[32].mxu0 %v17570_v19  ;;  %14304 = vmatpush3.bf16.msra.mxu1 %v17887_v12  ;;  %v19525_v19 = vand.u32 4294901760, %v17632_v37 }
 0x3c8   :  { %12480 = vmatprep.mubr.f32.mxu0 %v17591_v49  ;;  %14208 = vmatpush3.bf16.msra.mxu0 %v17577_v14  ;;  %v19526_v49 = vand.u32 4294901760, %v17687_v51 }
 0x3c9   :  { %14210 = vmatprep.subr.bf16.mxu0 %v17594_v20  ;;  %14306 = vmatprep.subr.bf16.mxu1 %v17894_v0 }
 0x3cb   :  { %12481 = vmatmul.mubr.f32.gmra.mrb[34].mxu0 %v17588_v5  ;;  %14308 = vmatpush3.bf16.msra.mxu1 %v17894_v0  ;;  %v19528_v5 = vand.u32 4294901760, %v17705_v39 }
 0x3cc   :  { %12483 = vmatprep.mubr.f32.mxu0 %v17651_v28  ;;  %14212 = vmatpush3.bf16.msra.mxu0 %v17594_v20  ;;  %v19529_v28 = vand.u32 4294901760, %v17720_v46 }
 0x3cd   :  { %14214 = vmatprep.subr.bf16.mxu0 %v19513_v43  ;;  %14310 = vmatprep.subr.bf16.mxu1 %v17913_v29 }
 0x3cf   :  { %12484 = vmatmul.mubr.f32.gmra.mrb[36].mxu0 %v17632_v37  ;;  %14312 = vmatpush3.bf16.msra.mxu1 %v17913_v29  ;;  %v19531_v37 = vand.u32 4294901760, %v17738_v58 }
 0x3d0   :  { %12486 = vmatprep.mubr.f32.mxu0 %v17687_v51  ;;  %14216 = vmatpush3.bf16.msra.mxu0 %v19513_v43  ;;  %v19532_v51 = vand.u32 4294901760, %v17752_v36 }
 0x3d1   :  { %14218 = vmatprep.subr.bf16.mxu0 %v19514_v13  ;;  %14314 = vmatprep.subr.bf16.mxu1 %v17931_v2 }
 0x3d3   :  { %12487 = vmatmul.mubr.f32.gmra.mrb[38].mxu0 %v17705_v39  ;;  %14316 = vmatpush3.bf16.msra.mxu1 %v17931_v2  ;;  %v19534_v39 = vand.u32 4294901760, %v17764_v54 }
 0x3d4   :  { %12489 = vmatprep.mubr.f32.mxu0 %v17720_v46  ;;  %14220 = vmatpush3.bf16.msra.mxu0 %v19514_v13  ;;  %v19535_v46 = vand.u32 4294901760, %v17773_v22 }
 0x3d5   :  { %14222 = vmatprep.subr.bf16.mxu0 %v19515_v55  ;;  %14318 = vmatprep.subr.bf16.mxu1 %v17945_v27 }
 0x3d7   :  { %12490 = vmatmul.mubr.f32.gmra.mrb[40].mxu0 %v17738_v58  ;;  %14320 = vmatpush3.bf16.msra.mxu1 %v17945_v27  ;;  %v19536_v58 = vand.u32 4294901760, %v17785_v10 }
 0x3d8   :  { %12492 = vmatprep.mubr.f32.mxu0 %v17752_v36  ;;  %14224 = vmatpush3.bf16.msra.mxu0 %v19515_v55  ;;  %v19537_v36 = vand.u32 4294901760, %v17797_v32 }
 0x3d9   :  { %14226 = vmatprep.subr.bf16.mxu0 %v19516_v63 }
 0x3db   :  { %12493 = vmatmul.mubr.f32.gmra.mrb[42].mxu0 %v17764_v54  ;;  %v19538_v54 = vand.u32 4294901760, %v17806_v60 }
 0x3dc   :  { %12495 = vmatprep.mubr.f32.mxu0 %v17773_v22  ;;  %14228 = vmatpush3.bf16.msra.mxu0 %v19516_v63 }
 0x3dd   :  { %14230 = vmatprep.subr.bf16.mxu0 %v17675_v26 }
 0x3df   :  { %12496 = vmatmul.mubr.f32.gmra.mrb[44].mxu0 %v17785_v10 }
 0x3e0   :  { %12498 = vmatprep.mubr.f32.mxu0 %v17797_v32  ;;  %14232 = vmatpush3.bf16.msra.mxu0 %v17675_v26 }
 0x3e1   :  { %14234 = vmatprep.subr.bf16.mxu0 %v17690_v4 }
 0x3e3   :  { %12499 = vmatmul.mubr.f32.gmra.mrb[46].mxu0 %v17806_v60 }
 0x3e4   :  { %14236 = vmatpush3.bf16.msra.mxu0 %v17690_v4  ;;  %12533 = vmatprep.mubr.f32.mxu0 %v19517_v7 }
 0x3e5   :  { %14238 = vmatprep.subr.bf16.mxu0 %v19518_v38 }
 0x3e7   :  { %12534 = vmatmul.mubr.f32.vlgmr.msra.gmra.mrb[32].mxu0 %v19519_v57 }
 0x3e8   :  { %12536 = vmatprep.mubr.f32.mxu0 %v19520_v16  ;;  %14240 = vmatpush3.bf16.msra.mxu0 %v19518_v38  ;;  %v19527_v16 = vld [vmem:[#allocation59_spill] sm:$0xff] }
 0x3e9   :  { %14242 = vmatprep.subr.bf16.mxu0 %v19521_v47 }
 0x3eb   :  { %12537 = vmatmul.mubr.f32.gmra.mrb[34].mxu0 %v19522_v23  ;;  %v19533_v23 = vld [vmem:[#allocation62_spill] sm:$0xff] }
 0x3ec   :  { %12539 = vmatprep.mubr.f32.mxu0 %v19523_v48  ;;  %14244 = vmatpush3.bf16.msra.mxu0 %v19521_v47  ;;  %v19530_v48 = vld [vmem:[#allocation60_spill] sm:$0xff] }
 0x3ed   :  { %14246 = vmatprep.subr.bf16.mxu0 %v19524_v6 }
 0x3ef   :  { %12540 = vmatmul.mubr.f32.gmra.mrb[36].mxu0 %v19525_v19 }
 0x3f0   :  { %12542 = vmatprep.mubr.f32.mxu0 %v19526_v49  ;;  %14248 = vmatpush3.bf16.msra.mxu0 %v19524_v6 }
 0x3f1   :  { %14250 = vmatprep.subr.bf16.mxu0 %v19527_v16 }
 0x3f3   :  { %12543 = vmatmul.mubr.f32.gmra.mrb[38].mxu0 %v19528_v5 }
 0x3f4   :  { %12545 = vmatprep.mubr.f32.mxu0 %v19529_v28  ;;  %14252 = vmatpush3.bf16.msra.mxu0 %v19527_v16 }
 0x3f5   :  { %14254 = vmatprep.subr.bf16.mxu0 %v19530_v48 }
 0x3f7   :  { %12546 = vmatmul.mubr.f32.gmra.mrb[40].mxu0 %v19531_v37 }
 0x3f8   :  { %12548 = vmatprep.mubr.f32.mxu0 %v19532_v51  ;;  %14256 = vmatpush3.bf16.msra.mxu0 %v19530_v48 }
 0x3f9   :  { %14258 = vmatprep.subr.bf16.mxu0 %v19533_v23 }
 0x3fb   :  { %12549 = vmatmul.mubr.f32.gmra.mrb[42].mxu0 %v19534_v39 }
 0x3fc   :  { %12551 = vmatprep.mubr.f32.mxu0 %v19535_v46  ;;  %14260 = vmatpush3.bf16.msra.mxu0 %v19533_v23 }
 0x3fd   :  { %14262 = vmatprep.subr.bf16.mxu0 %v17697_v8 }
 0x3ff   :  { %12552 = vmatmul.mubr.f32.gmra.mrb[44].mxu0 %v19536_v58 }
 0x400   :  { %12554 = vmatprep.mubr.f32.mxu0 %v19537_v36  ;;  %14264 = vmatpush3.bf16.msra.mxu0 %v17697_v8 }
 0x401   :  { %14266 = vmatprep.subr.bf16.mxu0 %v17716_v15 }
 0x403   :  { %12555 = vmatmul.mubr.f32.gmra.mrb[46].mxu0 %v19538_v54 }
 0x404   :  { %14268 = vmatpush3.bf16.msra.mxu0 %v17716_v15  ;;  %12589 = vmatprep.mubr.f32.mxu0 %v17517_v50 }
 0x405   :  { %14270 = vmatprep.subr.bf16.mxu0 %v17577_v14 }
 0x407   :  { %12590 = vmatmul.mubr.f32.vlgmr.msra.gmra.mrb[32].mxu0 %v17567_v41 }
 0x408   :  { %12592 = vmatprep.mubr.f32.mxu0 %v17575_v35  ;;  %14272 = vmatpush3.bf16.msra.mxu0 %v17577_v14 }
 0x409   :  { %14274 = vmatprep.subr.bf16.mxu0 %v17594_v20 }
 0x40b   :  { %12593 = vmatmul.mubr.f32.gmra.mrb[34].mxu0 %v17573_v59 }
 0x40c   :  { %12595 = vmatprep.mubr.f32.mxu0 %v17618_v3  ;;  %14276 = vmatpush3.bf16.msra.mxu0 %v17594_v20  ;;  %v6804_v20 = vld [vmem:[#allocation6 + $0x68] sm:$0xff] }
 0x40d   :  { %14278 = vmatprep.subr.bf16.mxu0 %v19513_v43 }
 0x40f   :  { %12596 = vmatmul.mubr.f32.gmra.mrb[36].mxu0 %v17604_v25 }
 0x410   :  { %12598 = vmatprep.mubr.f32.mxu0 %v17672_v56  ;;  %14280 = vmatpush3.bf16.msra.mxu0 %v19513_v43 }
 0x411   :  { %14282 = vmatprep.subr.bf16.mxu0 %v19514_v13 }
 0x413   :  { %12599 = vmatmul.mubr.f32.gmra.mrb[38].mxu0 %v17669_v30 }
 0x414   :  { %12601 = vmatprep.mubr.f32.mxu0 %v17695_v9  ;;  %14284 = vmatpush3.bf16.msra.mxu0 %v19514_v13 }
 0x415   :  { %14286 = vmatprep.subr.bf16.mxu0 %v19515_v55 }
 0x417   :  { %12602 = vmatmul.mubr.f32.gmra.mrb[40].mxu0 %v17708_v33 }
 0x418   :  { %12604 = vmatprep.mubr.f32.mxu0 %v17723_v52  ;;  %14288 = vmatpush3.bf16.msra.mxu0 %v19515_v55 }
 0x419   :  { %14290 = vmatprep.subr.bf16.mxu0 %v19516_v63 }
 0x41b   :  { %12605 = vmatmul.mubr.f32.gmra.mrb[42].mxu0 %v17741_v34 }
 0x41c   :  { %12607 = vmatprep.mubr.f32.mxu0 %v17755_v18  ;;  %14292 = vmatpush3.bf16.msra.mxu0 %v19516_v63 }
 0x41d   :  { %14294 = vmatprep.subr.bf16.mxu0 %v17675_v26 }
 0x41f   :  { %12608 = vmatmul.mubr.f32.gmra.mrb[44].mxu0 %v17767_v62 }
 0x420   :  { %12610 = vmatprep.mubr.f32.mxu0 %v17776_v21  ;;  %14296 = vmatpush3.bf16.msra.mxu0 %v17675_v26 }
 0x421   :  { %14298 = vmatprep.subr.bf16.mxu0 %v17690_v4 }
 0x423   :  { %12611 = vmatmul.mubr.f32.gmra.mrb[46].mxu0 %v17788_v40 }
 0x424   :  { %14300 = vmatpush3.bf16.msra.mxu0 %v17690_v4  ;;  %12645 = vmatprep.mubr.f32.mxu0 %v17517_v50  ;;  %v6801_v50 = vld [vmem:[#allocation6 + $0x50] sm:$0xff] }
 0x427   :  { %12646 = vmatmul.mubr.f32.vlgmr.msra.gmra.mrb[32].mxu0 %v17567_v41  ;;  %v6802_v41 = vld [vmem:[#allocation6 + $0x58] sm:$0xff] }
 0x428   :  { %12648 = vmatprep.mubr.f32.mxu0 %v17575_v35  ;;  %v6838_v35 = vand.u32 4294901760, %v6801_v50  ;;  %v6841_v14 = vand.u32 4294901760, %v6802_v41 }
 0x42a   :  { %v18063_v26 = vpack.c.bf16 %v6841_v14, %v6838_v35  ;;  %v18096_v32 = vsub.f32 %v6801_v50, %v6838_v35  ;;  %v18098_v57 = vsub.f32 %v6802_v41, %v6841_v14 }
 0x42b   :  { %12649 = vmatmul.mubr.f32.gmra.mrb[34].mxu0 %v17573_v59  ;;  %v6803_v59 = vld [vmem:[#allocation6 + $0x60] sm:$0xff] }
 0x42c   :  { %12651 = vmatprep.mubr.f32.mxu0 %v17618_v3  ;;  %v6847_v3 = vand.u32 4294901760, %v6804_v20  ;;  %19539 = vst [vmem:[#allocation61_spill] sm:$0xff] %v18063_v26  ;;  %14322 = vmatprep.subr.bf16.mxu1 %v18063_v26  ;;  %19546 = vst [vmem:[#allocation67_spill] sm:$0xff] %v18096_v32  ;;  %v19123_v63 = vand.u32 4294901760, %v18096_v32  ;;  %v18144_v35 = vpack.c.bf16 %v18098_v57, %v18096_v32 }
 0x42d   :  { %14324 = vmatpush3.bf16.msra.mxu1 %v18063_v26  ;;  %19547 = vst [vmem:[#allocation22_spill] sm:$0xff] %v18098_v57 }
 0x42e   :  { %v18110_v43 = vsub.f32 %v6804_v20, %v6847_v3 }
 0x42f   :  { %12652 = vmatmul.mubr.f32.gmra.mrb[36].mxu0 %v17604_v25  ;;  %v6844_v25 = vand.u32 4294901760, %v6803_v59 }
 0x430   :  { %12654 = vmatprep.mubr.f32.mxu0 %v17672_v56  ;;  %v6806_v56 = vld [vmem:[#allocation6 + $0x78] sm:$0xff]  ;;  %19549 = vst [vmem:[#allocation31_spill] sm:$0xff] %v18110_v43  ;;  %v19120_v19 = vand.u32 4294901760, %v18110_v43 }
 0x431   :  { %v6853_v4 = vand.u32 4294901760, %v6806_v56  ;;  %v18108_v7 = vsub.f32 %v6803_v59, %v6844_v25 }
 0x432   :  { %v7143_v5 = vsub.f32 %v18110_v43, %v19120_v19 }
 0x433   :  { %12655 = vmatmul.mubr.f32.gmra.mrb[38].mxu0 %v17669_v30  ;;  %v6805_v30 = vld [vmem:[#allocation6 + $0x70] sm:$0xff]  ;;  %19548 = vst [vmem:[#allocation30_spill] sm:$0xff] %v18108_v7  ;;  %v19121_v6 = vand.u32 4294901760, %v18108_v7  ;;  %v18124_v48 = vsub.f32 %v6806_v56, %v6853_v4  ;;  %v18148_v14 = vpack.c.bf16 %v18110_v43, %v18108_v7 }
 0x434   :  { %12657 = vmatprep.mubr.f32.mxu0 %v17695_v9  ;;  %v6850_v8 = vand.u32 4294901760, %v6805_v30  ;;  %v18065_v9 = vpack.c.bf16 %v6847_v3, %v6844_v25  ;;  %v7144_v51 = vand.u32 4294901760, %v7143_v5  ;;  %v19552_v25 = vand.u32 4294901760, %v17868_v45 }
 0x435   :  { %v7136_v16 = vsub.f32 %v18108_v7, %v19121_v6  ;;  %19551 = vst [vmem:[#allocation38_spill] sm:$0xff] %v18124_v48  ;;  %v19118_v46 = vand.u32 4294901760, %v18124_v48 }
 0x436   :  { %19540 = vst [vmem:[#allocation63_spill] sm:$0xff] %v18065_v9  ;;  %14326 = vmatprep.subr.bf16.mxu1 %v18065_v9  ;;  %v18122_v28 = vsub.f32 %v6805_v30, %v6850_v8  ;;  %v18157_v3 = vsub.f32 %v17868_v45, %v19552_v25  ;;  %v19553_v30 = vand.u32 4294901760, %v17874_v17 }
 0x437   :  { %12658 = vmatmul.mubr.f32.gmra.mrb[40].mxu0 %v17708_v33  ;;  %v19541_v33 = vand.u32 4294901760, %v17864_v53  ;;  %14328 = vmatpush3.bf16.msra.mxu1 %v18065_v9  ;;  %v7137_v37 = vand.u32 4294901760, %v7136_v16  ;;  %v7157_v54 = vsub.f32 %v18124_v48, %v19118_v46 }
 0x438   :  { %12660 = vmatprep.mubr.f32.mxu0 %v17723_v52  ;;  %v19543_v52 = vand.u32 4294901760, %v17866_v11  ;;  %19550 = vst [vmem:[#allocation35_spill] sm:$0xff] %v18122_v28  ;;  %v19119_v23 = vand.u32 4294901760, %v18122_v28  ;;  %v18152_v20 = vpack.c.bf16 %v18124_v48, %v18122_v28  ;;  %v18162_v56 = vsub.f32 %v17874_v17, %v19553_v30 }
 0x439   :  { %v18072_v15 = vsub.f32 %v17864_v53, %v19541_v33  ;;  %v19122_v53 = vand.u32 4294901760, %v18098_v57  ;;  %v18132_v58 = vpack.c.bf16 %v7144_v51, %v7137_v37  ;;  %v7158_v41 = vand.u32 4294901760, %v7157_v54 }
 0x43a   :  { %v7150_v36 = vsub.f32 %v18122_v28, %v19119_v23  ;;  %v19554_v33 = vand.u32 4294901760, %v17877_v24 }
 0x43b   :  { %12661 = vmatmul.mubr.f32.gmra.mrb[42].mxu0 %v17741_v34  ;;  %19542 = vst [vmem:[#allocation64_spill] sm:$0xff] %v18072_v15  ;;  %v18077_v34 = vsub.f32 %v17866_v11, %v19543_v52  ;;  %v19131_v60 = vand.u32 4294901760, %v18072_v15  ;;  %v7122_v11 = vsub.f32 %v18096_v32, %v19123_v63  ;;  %v7129_v13 = vsub.f32 %v18098_v57, %v19122_v53 }
 0x43c   :  { %12663 = vmatprep.mubr.f32.mxu0 %v17755_v18  ;;  %v18080_v18 = vpack.c.bf16 %v6853_v4, %v6850_v8  ;;  %v7151_v50 = vand.u32 4294901760, %v7150_v36  ;;  %v19128_v8 = vand.u32 4294901760, %v18157_v3  ;;  %v19127_v4 = vand.u32 4294901760, %v18162_v56 }
 0x43d   :  { %19544 = vst [vmem:[#allocation65_spill] sm:$0xff] %v18077_v34  ;;  %v7052_v22 = vsub.f32 %v18072_v15, %v19131_v60  ;;  %v7123_v38 = vand.u32 4294901760, %v7122_v11  ;;  %v7130_v55 = vand.u32 4294901760, %v7129_v13  ;;  %v18129_v39 = vpack.c.bf16 %v18077_v34, %v18072_v15 }
 0x43e   :  { %19545 = vst [vmem:[#allocation66_spill] sm:$0xff] %v18080_v18  ;;  %14330 = vmatprep.subr.bf16.mxu1 %v18080_v18  ;;  %v18140_v59 = vpack.c.bf16 %v7158_v41, %v7151_v50  ;;  %v18169_v52 = vsub.f32 %v17877_v24, %v19554_v33  ;;  %v7066_v45 = vsub.f32 %v18157_v3, %v19128_v8  ;;  %v19556_v24 = vand.u32 4294901760, %v17900_v1 }
 0x43f   :  { %12664 = vmatmul.mubr.f32.gmra.mrb[44].mxu0 %v17767_v62  ;;  %v19130_v62 = vand.u32 4294901760, %v18077_v34  ;;  %v7053_v10 = vand.u32 4294901760, %v7052_v22  ;;  %14332 = vmatpush3.bf16.msra.mxu1 %v18080_v18  ;;  %v18114_v49 = vpack.c.bf16 %v7130_v55, %v7123_v38  ;;  %v19555_v22 = vand.u32 4294901760, %v17879_v61 }
 0x440   :  { %12666 = vmatprep.mubr.f32.mxu0 %v17776_v21  ;;  %v7073_v17 = vsub.f32 %v18162_v56, %v19127_v4  ;;  %v18187_v11 = vsub.f32 %v17900_v1, %v19556_v24  ;;  %v7067_v5 = vand.u32 4294901760, %v7066_v45  ;;  %v19559_v24 = vand.u32 4294901760, %v17919_v42 }
 0x441   :  { %v7059_v21 = vsub.f32 %v18077_v34, %v19130_v62 }
 0x442   :  { %v7074_v37 = vand.u32 4294901760, %v7073_v17 }
 0x443   :  { %12667 = vmatmul.mubr.f32.gmra.mrb[46].mxu0 %v17788_v40  ;;  %v7060_v40 = vand.u32 4294901760, %v7059_v21  ;;  %v18174_v21 = vsub.f32 %v17879_v61, %v19555_v22  ;;  %v19557_v61 = vand.u32 4294901760, %v17902_v44 }
 0x444   :  { %v18221_v17 = vpack.c.bf16 %v7074_v37, %v7067_v5  ;;  %v19560_v37 = vand.u32 4294901760, %v17921_v31 }
 0x445   :  { %v18093_v47 = vpack.c.bf16 %v7060_v40, %v7053_v10  ;;  %v19126_v10 = vand.u32 4294901760, %v18169_v52  ;;  %v19125_v40 = vand.u32 4294901760, %v18174_v21  ;;  %v18192_v38 = vsub.f32 %v17902_v44, %v19557_v61 }
 0x446   :  { %v19124_v44 = vand.u32 4294901760, %v18187_v11 }
 0x447   :  { %14334 = vmatprep.subr.bf16.mxu1 %v18093_v47  ;;  %v7080_v36 = vsub.f32 %v18169_v52, %v19126_v10  ;;  %v7087_v1 = vsub.f32 %v18174_v21, %v19125_v40  ;;  %v19129_v30 = vand.u32 4294901760, %v18192_v38 }
 0x449   :  { %v7081_v46 = vand.u32 4294901760, %v7080_v36  ;;  %v7088_v23 = vand.u32 4294901760, %v7087_v1  ;;  %v7101_v53 = vsub.f32 %v18192_v38, %v19129_v30 }
 0x44b   :  { %v14341_v8 = vpack.c.bf16 %v7088_v23, %v7081_v46  ;;  %v7102_v48 = vand.u32 4294901760, %v7101_v53 }
 0x4fa   :  { %v12647_v13 = vpop.f32.mrb[32].mxu0 }
 0x4fb   :  { %v18194_v55 = vand.u32 4294901760, %v12647_v13  ;;  %v6697_v16 = vpop.f32.mrb[33].mxu0 }
 0x4fc   :  { %v18196_v51 = vand.u32 4294901760, %v6697_v16 }
 0x4fd   :  { %v18205_v54 = vsub.f32 %v12647_v13, %v18194_v55  ;;  %v18226_v13 = vsub.f32 %v17919_v42, %v19559_v24  ;;  %v7094_v42 = vsub.f32 %v18187_v11, %v19124_v44  ;;  %v18246_v24 = vsub.f32 %v17921_v31, %v19560_v37 }
 0x4fe   :  { %v18209_v50 = vsub.f32 %v6697_v16, %v18196_v51  ;;  %v18213_v41 = vpack.c.bf16 %v18194_v55, %v18196_v51  ;;  %v12650_v25 = vpop.f32.mrb[34].mxu0 }
 0x4ff   :  { %v18217_v33 = vand.u32 4294901760, %v18205_v54  ;;  %v18219_v22 = vand.u32 4294901760, %v12650_v25  ;;  %v6709_v45 = vpop.f32.mrb[35].mxu0  ;;  %v7095_v62 = vand.u32 4294901760, %v7094_v42  ;;  %v19566_v60 = vand.u32 4294901760, %v18226_v13 }
 0x500   :  { %19558 = vst [vmem:[#allocation40_spill] sm:$0xff] %v18213_v41  ;;  %v18228_v61 = vand.u32 4294901760, %v6709_v45  ;;  %14590 = vmatprep.subr.bf16.mxu0 %v18213_v41  ;;  %v18232_v16 = vand.u32 4294901760, %v18209_v50 }
 0x501   :  { %v6901_v19 = vsub.f32 %v18205_v54, %v18217_v33  ;;  %v18237_v5 = vsub.f32 %v12650_v25, %v18219_v22  ;;  %14592 = vmatpush3.bf16.xpose.msra.mxu0 %v18213_v41  ;;  %v14345_v34 = vpack.c.bf16 %v7102_v48, %v7095_v62 }
 0x502   :  { %v18249_v36 = vsub.f32 %v6709_v45, %v18228_v61  ;;  %v18253_v1 = vpack.c.bf16 %v18219_v22, %v18228_v61  ;;  %v12653_v25 = vpop.f32.mrb[36].mxu0  ;;  %v6891_v6 = vsub.f32 %v18209_v50, %v18232_v16 }
 0x503   :  { %v6902_v63 = vand.u32 4294901760, %v6901_v19  ;;  %v18260_v44 = vand.u32 4294901760, %v12653_v25  ;;  %v6721_v31 = vpop.f32.mrb[37].mxu0  ;;  %v18263_v37 = vand.u32 4294901760, %v18237_v5 }
 0x504   :  { %19561 = vst [vmem:[#allocation46_spill] sm:$0xff] %v18253_v1  ;;  %v18266_v40 = vand.u32 4294901760, %v6721_v31  ;;  %14594 = vmatprep.subr.bf16.mxu0 %v18253_v1  ;;  %v6892_v10 = vand.u32 4294901760, %v6891_v6  ;;  %v18270_v4 = vand.u32 4294901760, %v18249_v36 }
 0x505   :  { %19562 = vst [vmem:[#allocation48_spill] sm:$0xff] %v18263_v37  ;;  %v18273_v30 = vsub.f32 %v12653_v25, %v18260_v44  ;;  %v6921_v19 = vsub.f32 %v18237_v5, %v18263_v37 }
 0x506   :  { %19563 = vst [vmem:[#allocation52_spill] sm:$0xff] %v18270_v4  ;;  %v18279_v45 = vsub.f32 %v6721_v31, %v18266_v40  ;;  %v12656_v41 = vpop.f32.mrb[38].mxu0  ;;  %12701 = vmatprep.mubr.f32.mxu1 %v6892_v10  ;;  %v6911_v6 = vsub.f32 %v18249_v36, %v18270_v4  ;;  %v18283_v28 = vpack.c.bf16 %v6902_v63, %v6892_v10 }
 0x507   :  { %v18285_v23 = vand.u32 4294901760, %v12656_v41  ;;  %v6733_v46 = vpop.f32.mrb[39].mxu0  ;;  %12702 = vmatmul.mubr.f32.vlgmr.msra.gmra.mrb[32].mxu1 %v6902_v63  ;;  %v6922_v25 = vand.u32 4294901760, %v6921_v19  ;;  %v18288_v42 = vand.u32 4294901760, %v18273_v30  ;;  %v7108_v31 = vsub.f32 %v18226_v13, %v19566_v60 }
 0x508   :  { %19564 = vst [vmem:[#allocation54_spill] sm:$0xff] %v18283_v28  ;;  %v18295_v43 = vpack.c.bf16 %v18260_v44, %v18266_v40  ;;  %v18297_v7 = vand.u32 4294901760, %v6733_v46  ;;  %14336 = vmatpush3.bf16.msra.mxu1 %v18093_v47  ;;  %v6912_v53 = vand.u32 4294901760, %v6911_v6  ;;  %v18301_v10 = vand.u32 4294901760, %v18279_v45 }
 0x509   :  { %19565 = vst [vmem:[#allocation39_spill] sm:$0xff] %v18288_v42  ;;  %v18304_v63 = vsub.f32 %v12656_v41, %v18285_v23  ;;  %14596 = vmatpush3.bf16.xpose.msra.mxu0 %v18253_v1  ;;  %14338 = vmatprep.subr.bf16.mxu1 %v18221_v17  ;;  %v6941_v60 = vsub.f32 %v18273_v30, %v18288_v42  ;;  %v19570_v19 = vand.u32 4294901760, %v18246_v24  ;;  %v7109_v15 = vand.u32 4294901760, %v7108_v31 }
 0x50a   :  { %19567 = vst [vmem:[#allocation42_spill] sm:$0xff] %v18295_v43  ;;  %19568 = vst [vmem:[#allocation16_spill] sm:$0xff] %v18301_v10  ;;  %v18314_v47 = vsub.f32 %v6733_v46, %v18297_v7  ;;  %v12659_v6 = vpop.f32.mrb[40].mxu0  ;;  %12704 = vmatprep.mubr.f32.mxu1 %v6912_v53  ;;  %14598 = vmatprep.subr.bf16.mxu0 %v18295_v43  ;;  %v6931_v41 = vsub.f32 %v18279_v45, %v18301_v10 }
 0x50b   :  { %19569 = vst [vmem:[#allocation45_spill] sm:$0xff] %v18304_v63  ;;  %v7115_v28 = vsub.f32 %v18246_v24, %v19570_v19  ;;  %v18319_v1 = vand.u32 4294901760, %v12659_v6  ;;  %v6745_v57 = vpop.f32.mrb[41].mxu0  ;;  %12705 = vmatmul.mubr.f32.gmra.mrb[34].mxu1 %v6922_v25  ;;  %v6942_v32 = vand.u32 4294901760, %v6941_v60  ;;  %v18322_v42 = vand.u32 4294901760, %v18304_v63 }
 0x50c   :  { %v18324_v37 = vpack.c.bf16 %v6922_v25, %v6912_v53  ;;  %v18326_v19 = vand.u32 4294901760, %v6745_v57  ;;  %14340 = vmatpush3.bf16.msra.mxu1 %v18221_v17  ;;  %v6932_v46 = vand.u32 4294901760, %v6931_v41  ;;  %v18330_v4 = vand.u32 4294901760, %v18314_v47 }
 0x50d   :  { %19571 = vst [vmem:[#allocation51_spill] sm:$0xff] %v18322_v42  ;;  %v18333_v10 = vsub.f32 %v12659_v6, %v18319_v1  ;;  %14342 = vmatprep.subr.bf16.mxu1 %v14341_v8  ;;  %v6961_v60 = vsub.f32 %v18304_v63, %v18322_v42  ;;  %v7116_v18 = vand.u32 4294901760, %v7115_v28  ;;  %v18351_v28 = vpack.c.bf16 %v18285_v23, %v18297_v7 }
 0x50e   :  { %19572 = vst [vmem:[#allocation18_spill] sm:$0xff] %v18324_v37  ;;  %19573 = vst [vmem:[#allocation53_spill] sm:$0xff] %v18330_v4  ;;  %v18338_v25 = vsub.f32 %v6745_v57, %v18326_v19  ;;  %v12662_v53 = vpop.f32.mrb[42].mxu0  ;;  %12707 = vmatprep.mubr.f32.mxu1 %v6932_v46  ;;  %v6951_v17 = vsub.f32 %v18314_v47, %v18330_v4  ;;  %v18342_v41 = vpack.c.bf16 %v6942_v32, %v6932_v46 }
 0x50f   :  { %19574 = vst [vmem:[#allocation55_spill] sm:$0xff] %v18333_v10  ;;  %v18344_v62 = vand.u32 4294901760, %v12662_v53  ;;  %v6757_v48 = vpop.f32.mrb[43].mxu0  ;;  %12708 = vmatmul.mubr.f32.gmra.mrb[36].mxu1 %v6942_v32  ;;  %v6962_v6 = vand.u32 4294901760, %v6961_v60  ;;  %v18347_v37 = vand.u32 4294901760, %v18333_v10  ;;  %19578 = vst [vmem:[#allocation29_spill] sm:$0xff] %v18351_v28  ;;  %v14349_v32 = vpack.c.bf16 %v7116_v18, %v7109_v15 }
 0x510   :  { %19575 = vst [vmem:[#allocation12_spill] sm:$0xff] %v18338_v25  ;;  %19576 = vst [vmem:[#allocation56_spill] sm:$0xff] %v18342_v41  ;;  %v18353_v57 = vand.u32 4294901760, %v6757_v48  ;;  %14344 = vmatpush3.bf16.msra.mxu1 %v14341_v8  ;;  %v6952_v31 = vand.u32 4294901760, %v6951_v17  ;;  %v18356_v42 = vand.u32 4294901760, %v18338_v25 }
 0x511   :  { %19577 = vst [vmem:[#allocation23_spill] sm:$0xff] %v18347_v37  ;;  %v18359_v46 = vsub.f32 %v12662_v53, %v18344_v62  ;;  %14600 = vmatpush3.bf16.xpose.msra.mxu0 %v18295_v43  ;;  %14346 = vmatprep.subr.bf16.mxu1 %v14345_v34  ;;  %v6981_v60 = vsub.f32 %v18333_v10, %v18347_v37 }
 0x512   :  { %19579 = vst [vmem:[#allocation32_spill] sm:$0xff] %v18356_v42  ;;  %v18365_v41 = vsub.f32 %v6757_v48, %v18353_v57  ;;  %v12665_v4 = vpop.f32.mrb[44].mxu0  ;;  %12710 = vmatprep.mubr.f32.mxu1 %v6952_v31  ;;  %14602 = vmatprep.subr.bf16.mxu0 %v18351_v28  ;;  %v6971_v8 = vsub.f32 %v18338_v25, %v18356_v42 }
 0x513   :  { %19580 = vst [vmem:[#allocation26_spill] sm:$0xff] %v18359_v46  ;;  %v18370_v17 = vand.u32 4294901760, %v12665_v4  ;;  %v6769_v53 = vpop.f32.mrb[45].mxu0  ;;  %12711 = vmatmul.mubr.f32.gmra.mrb[38].mxu1 %v6962_v6  ;;  %v6982_v43 = vand.u32 4294901760, %v6981_v60  ;;  %v18373_v15 = vand.u32 4294901760, %v18359_v46  ;;  %v18375_v18 = vpack.c.bf16 %v6962_v6, %v6952_v31 }
 0x514   :  { %19581 = vst [vmem:[#allocation37_spill] sm:$0xff] %v18365_v41  ;;  %v18377_v37 = vand.u32 4294901760, %v6769_v53  ;;  %14348 = vmatpush3.bf16.msra.mxu1 %v14345_v34  ;;  %v6972_v48 = vand.u32 4294901760, %v6971_v8  ;;  %v18380_v9 = vand.u32 4294901760, %v18365_v41 }
 0x515   :  { %19582 = vst [vmem:[#allocation36_spill] sm:$0xff] %v18373_v15  ;;  %19583 = vst [vmem:[#allocation20_spill] sm:$0xff] %v18375_v18  ;;  %v18383_v26 = vsub.f32 %v12665_v4, %v18370_v17  ;;  %14350 = vmatprep.subr.bf16.mxu1 %v14349_v32  ;;  %v7001_v42 = vsub.f32 %v18359_v46, %v18373_v15  ;;  %v18401_v15 = vpack.c.bf16 %v18319_v1, %v18326_v19 }
 0x516   :  { %19584 = vst [vmem:[#allocation13_spill] sm:$0xff] %v18380_v9  ;;  %v18388_v60 = vsub.f32 %v6769_v53, %v18377_v37  ;;  %v12668_v10 = vpop.f32.mrb[46].mxu0  ;;  %12713 = vmatprep.mubr.f32.mxu1 %v6972_v48  ;;  %v6991_v6 = vsub.f32 %v18365_v41, %v18380_v9  ;;  %v18392_v34 = vpack.c.bf16 %v6982_v43, %v6972_v48 }
 0x517   :  { %19585 = vst [vmem:[#allocation19_spill] sm:$0xff] %v18383_v26  ;;  %v18394_v31 = vand.u32 4294901760, %v12668_v10  ;;  %v6781_v8 = vpop.f32.mrb[47].mxu0  ;;  %12714 = vmatmul.mubr.f32.gmra.mrb[40].mxu1 %v6982_v43  ;;  %v7002_v4 = vand.u32 4294901760, %v7001_v42  ;;  %v18397_v18 = vand.u32 4294901760, %v18383_v26 }
 0x518   :  { %19586 = vst [vmem:[#allocation27_spill] sm:$0xff] %v18388_v60  ;;  %19587 = vst [vmem:[#allocation24_spill] sm:$0xff] %v18392_v34  ;;  %v18403_v53 = vand.u32 4294901760, %v6781_v8  ;;  %14352 = vmatpush3.bf16.msra.mxu1 %v14349_v32  ;;  %v6992_v46 = vand.u32 4294901760, %v6991_v6  ;;  %v18406_v9 = vand.u32 4294901760, %v18388_v60 }
 0x519   :  { %19588 = vst [vmem:[#allocation14_spill] sm:$0xff] %v18397_v18  ;;  %v18409_v48 = vsub.f32 %v12668_v10, %v18394_v31  ;;  %14604 = vmatpush3.bf16.xpose.msra.mxu0 %v18351_v28  ;;  %14354 = vmatprep.subr.bf16.mxu1 %v18114_v49  ;;  %v7021_v43 = vsub.f32 %v18383_v26, %v18397_v18 }
 0x51a   :  { %19589 = vst [vmem:[#allocation21_spill] sm:$0xff] %v18406_v9  ;;  %v18416_v42 = vsub.f32 %v6781_v8, %v18403_v53  ;;  %12716 = vmatprep.mubr.f32.mxu1 %v6992_v46  ;;  %14606 = vmatprep.subr.bf16.mxu0 %v18401_v15  ;;  %v7011_v32 = vsub.f32 %v18388_v60, %v18406_v9 }
 0x51b   :  { %19590 = vst [vmem:[#allocation25_spill] sm:$0xff] %v18409_v48  ;;  %12717 = vmatmul.mubr.f32.gmra.mrb[42].mxu1 %v7002_v4  ;;  %v7022_v6 = vand.u32 4294901760, %v7021_v43  ;;  %v18422_v10 = vand.u32 4294901760, %v18409_v48  ;;  %v18424_v34 = vpack.c.bf16 %v7002_v4, %v6992_v46 }
 0x51c   :  { %19591 = vst [vmem:[#allocation15_spill] sm:$0xff] %v18416_v42  ;;  %14356 = vmatpush3.bf16.msra.mxu1 %v18114_v49  ;;  %v7012_v28 = vand.u32 4294901760, %v7011_v32  ;;  %v18428_v18 = vand.u32 4294901760, %v18416_v42  ;;  %v18439_v49 = vpack.c.bf16 %v18344_v62, %v18353_v57 }
 0x51d   :  { %14358 = vmatprep.subr.bf16.mxu1 %v18132_v58  ;;  %v7041_v8 = vsub.f32 %v18409_v48, %v18422_v10 }
 0x51e   :  { %12719 = vmatprep.mubr.f32.mxu1 %v7012_v28  ;;  %v7031_v43 = vsub.f32 %v18416_v42, %v18428_v18  ;;  %v18435_v9 = vpack.c.bf16 %v7022_v6, %v7012_v28  ;;  %v18455_v28 = vpack.c.bf16 %v18370_v17, %v18377_v37 }
 0x51f   :  { %12720 = vmatmul.mubr.f32.gmra.mrb[44].mxu1 %v7022_v6  ;;  %v7042_v46 = vand.u32 4294901760, %v7041_v8  ;;  %v14377_v6 = vpack.c.bf16 %v18192_v38, %v18187_v11  ;;  %v14381_v8 = vpack.c.bf16 %v18246_v24, %v18226_v13 }
 0x520   :  { %14360 = vmatpush3.bf16.msra.mxu1 %v18132_v58  ;;  %v7032_v4 = vand.u32 4294901760, %v7031_v43  ;;  %v14369_v58 = vpack.c.bf16 %v18162_v56, %v18157_v3  ;;  %v18483_v43 = vpack.c.bf16 %v18217_v33, %v18232_v16 }
 0x521   :  { %14608 = vmatpush3.bf16.xpose.msra.mxu0 %v18401_v15  ;;  %14362 = vmatprep.subr.bf16.mxu1 %v18140_v59 }
 0x522   :  { %12722 = vmatprep.mubr.f32.mxu1 %v7032_v4  ;;  %14610 = vmatprep.subr.bf16.mxu0 %v18439_v49  ;;  %v18445_v32 = vpack.c.bf16 %v7042_v46, %v7032_v4  ;;  %v19596_v4 = vld [vmem:[#allocation66_spill] sm:$0xff] }
 0x523   :  { %12723 = vmatmul.mubr.f32.gmra.mrb[46].mxu1 %v7042_v46  ;;  %v19595_v46 = vld [vmem:[#allocation63_spill] sm:$0xff] }
 0x524   :  { %14364 = vmatpush3.bf16.msra.mxu1 %v18140_v59  ;;  %12757 = vmatprep.mubr.f32.mxu1 %v18196_v51  ;;  %v14373_v59 = vpack.c.bf16 %v18174_v21, %v18169_v52 }
 0x525   :  { %14366 = vmatprep.subr.bf16.mxu1 %v18129_v39 }
 0x527   :  { %12758 = vmatmul.mubr.f32.vlgmr.msra.gmra.mrb[32].mxu1 %v18194_v55 }
 0x528   :  { %14368 = vmatpush3.bf16.msra.mxu1 %v18129_v39  ;;  %12760 = vmatprep.mubr.f32.mxu1 %v18228_v61  ;;  %v18470_v39 = vpack.c.bf16 %v18394_v31, %v18403_v53 }
 0x529   :  { %14612 = vmatpush3.bf16.xpose.msra.mxu0 %v18439_v49  ;;  %14370 = vmatprep.subr.bf16.mxu1 %v14369_v58 }
 0x52a   :  { %14614 = vmatprep.subr.bf16.mxu0 %v18455_v28 }
 0x52b   :  { %12761 = vmatmul.mubr.f32.gmra.mrb[34].mxu1 %v18219_v22 }
 0x52c   :  { %14372 = vmatpush3.bf16.msra.mxu1 %v14369_v58  ;;  %12763 = vmatprep.mubr.f32.mxu1 %v18266_v40  ;;  %v19597_v58 = vld [vmem:[#allocation64_spill] sm:$0xff] }
 0x52d   :  { %14374 = vmatprep.subr.bf16.mxu1 %v14373_v59 }
 0x52f   :  { %12764 = vmatmul.mubr.f32.gmra.mrb[36].mxu1 %v18260_v44 }
 0x530   :  { %14376 = vmatpush3.bf16.msra.mxu1 %v14373_v59  ;;  %12766 = vmatprep.mubr.f32.mxu1 %v18297_v7  ;;  %v19598_v59 = vand.u32 4294901760, %v19597_v58  ;;  %v19604_v58 = vand.u32 4294901760, %v18169_v52  ;;  %v19612_v52 = vand.u32 4294901760, %v18226_v13  ;;  %v19622_v13 = vld [vmem:[#allocation30_spill] sm:$0xff] }
 0x531   :  { %14616 = vmatpush3.bf16.xpose.msra.mxu0 %v18455_v28  ;;  %14378 = vmatprep.subr.bf16.mxu1 %v14377_v6 }
 0x532   :  { %14618 = vmatprep.subr.bf16.mxu0 %v18470_v39 }
 0x533   :  { %12767 = vmatmul.mubr.f32.gmra.mrb[38].mxu1 %v18285_v23 }
 0x534   :  { %14380 = vmatpush3.bf16.msra.mxu1 %v14377_v6  ;;  %12769 = vmatprep.mubr.f32.mxu1 %v18326_v19  ;;  %v19599_v6 = vld [vmem:[#allocation65_spill] sm:$0xff] }
 0x535   :  { %14382 = vmatprep.subr.bf16.mxu1 %v14381_v8 }
 0x537   :  { %12770 = vmatmul.mubr.f32.gmra.mrb[40].mxu1 %v18319_v1 }
 0x538   :  { %14384 = vmatpush3.bf16.msra.mxu1 %v14381_v8  ;;  %12772 = vmatprep.mubr.f32.mxu1 %v18353_v57  ;;  %v19600_v8 = vand.u32 4294901760, %v19599_v6 }
 0x539   :  { %14620 = vmatpush3.bf16.xpose.msra.mxu0 %v18470_v39  ;;  %14386 = vmatprep.subr.bf16.mxu1 %v18144_v35 }
 0x53a   :  { %14622 = vmatprep.subr.bf16.mxu0 %v18483_v43 }
 0x53b   :  { %12773 = vmatmul.mubr.f32.gmra.mrb[42].mxu1 %v18344_v62 }
 0x53c   :  { %14388 = vmatpush3.bf16.msra.mxu1 %v18144_v35  ;;  %12775 = vmatprep.mubr.f32.mxu1 %v18377_v37  ;;  %v19592_v35 = vld [vmem:[#allocation55_spill] sm:$0xff] }
 0x53d   :  { %14390 = vmatprep.subr.bf16.mxu1 %v18148_v14 }
 0x53f   :  { %12776 = vmatmul.mubr.f32.gmra.mrb[44].mxu1 %v18370_v17 }
 0x540   :  { %14392 = vmatpush3.bf16.msra.mxu1 %v18148_v14  ;;  %12778 = vmatprep.mubr.f32.mxu1 %v18403_v53  ;;  %v19593_v14 = vld [vmem:[#allocation61_spill] sm:$0xff] }
 0x541   :  { %14394 = vmatprep.subr.bf16.mxu1 %v18152_v20 }
 0x543   :  { %12779 = vmatmul.mubr.f32.gmra.mrb[46].mxu1 %v18394_v31 }
 0x544   :  { %14396 = vmatpush3.bf16.msra.mxu1 %v18152_v20  ;;  %12813 = vmatprep.mubr.f32.mxu1 %v18209_v50  ;;  %v19594_v20 = vld [vmem:[#allocation26_spill] sm:$0xff] }
 0x545   :  { %14398 = vmatprep.subr.bf16.mxu1 %v17887_v12 }
 0x547   :  { %12814 = vmatmul.mubr.f32.vlgmr.msra.gmra.mrb[32].mxu1 %v18205_v54 }
 0x548   :  { %14400 = vmatpush3.bf16.msra.mxu1 %v17887_v12  ;;  %12816 = vmatprep.mubr.f32.mxu1 %v18249_v36 }
 0x549   :  { %14402 = vmatprep.subr.bf16.mxu1 %v17894_v0 }
 0x54b   :  { %12817 = vmatmul.mubr.f32.gmra.mrb[34].mxu1 %v18237_v5 }
 0x54c   :  { %14404 = vmatpush3.bf16.msra.mxu1 %v17894_v0  ;;  %12819 = vmatprep.mubr.f32.mxu1 %v18279_v45 }
 0x54d   :  { %14406 = vmatprep.subr.bf16.mxu1 %v17913_v29 }
 0x54f   :  { %12820 = vmatmul.mubr.f32.gmra.mrb[36].mxu1 %v18273_v30 }
 0x550   :  { %14408 = vmatpush3.bf16.msra.mxu1 %v17913_v29  ;;  %12822 = vmatprep.mubr.f32.mxu1 %v18314_v47 }
 0x551   :  { %14410 = vmatprep.subr.bf16.mxu1 %v17931_v2 }
 0x553   :  { %12823 = vmatmul.mubr.f32.gmra.mrb[38].mxu1 %v18304_v63 }
 0x554   :  { %14412 = vmatpush3.bf16.msra.mxu1 %v17931_v2  ;;  %12825 = vmatprep.mubr.f32.mxu1 %v18338_v25  ;;  %v19627_v25 = vld [vmem:[#allocation21_spill] sm:$0xff] }
 0x555   :  { %14414 = vmatprep.subr.bf16.mxu1 %v17945_v27 }
 0x557   :  { %12826 = vmatmul.mubr.f32.gmra.mrb[40].mxu1 %v19592_v35 }
 0x558   :  { %14416 = vmatpush3.bf16.msra.mxu1 %v17945_v27  ;;  %12828 = vmatprep.mubr.f32.mxu1 %v18365_v41  ;;  %v14429_v41 = vpack.c.bf16 %v19600_v8, %v19598_v59  ;;  %v19605_v59 = vand.u32 4294901760, %v18174_v21  ;;  %v19606_v8 = vld [vmem:[#allocation48_spill] sm:$0xff]  ;;  %v19613_v21 = vand.u32 4294901760, %v18246_v24  ;;  %v19623_v24 = vand.u32 4294901760, %v19622_v13 }
 0x559   :  { %14418 = vmatprep.subr.bf16.mxu1 %v19593_v14 }
 0x55a   :  { %v14437_v6 = vpack.c.bf16 %v19605_v59, %v19604_v58  ;;  %v19615_v58 = vld [vmem:[#allocation32_spill] sm:$0xff]  ;;  %v19618_v59 = vld [vmem:[#allocation22_spill] sm:$0xff] }
 0x55b   :  { %12829 = vmatmul.mubr.f32.gmra.mrb[42].mxu1 %v19594_v20 }
 0x55c   :  { %14420 = vmatpush3.bf16.msra.mxu1 %v19593_v14  ;;  %12831 = vmatprep.mubr.f32.mxu1 %v18388_v60  ;;  %v19602_v60 = vand.u32 4294901760, %v18162_v56 }
 0x55d   :  { %14422 = vmatprep.subr.bf16.mxu1 %v19595_v46 }
 0x55f   :  { %12832 = vmatmul.mubr.f32.gmra.mrb[44].mxu1 %v18383_v26  ;;  %v19601_v26 = vand.u32 4294901760, %v18157_v3  ;;  %v19608_v3 = vand.u32 4294901760, %v18187_v11  ;;  %v19616_v11 = vld [vmem:[#allocation67_spill] sm:$0xff] }
 0x560   :  { %14424 = vmatpush3.bf16.msra.mxu1 %v19595_v46  ;;  %12834 = vmatprep.mubr.f32.mxu1 %v18416_v42  ;;  %v19603_v42 = vld [vmem:[#allocation52_spill] sm:$0xff] }
 0x561   :  { %14426 = vmatprep.subr.bf16.mxu1 %v19596_v4  ;;  %v14433_v20 = vpack.c.bf16 %v19602_v60, %v19601_v26  ;;  %v19609_v26 = vand.u32 4294901760, %v18192_v38  ;;  %v14445_v60 = vpack.c.bf16 %v19613_v21, %v19612_v52  ;;  %v19617_v38 = vand.u32 4294901760, %v19616_v11  ;;  %v19624_v52 = vld [vmem:[#allocation31_spill] sm:$0xff] }
 0x562   :  { %v19625_v21 = vand.u32 4294901760, %v19624_v52  ;;  %v19628_v11 = vld [vmem:[#allocation35_spill] sm:$0xff] }
 0x563   :  { %12835 = vmatmul.mubr.f32.gmra.mrb[46].mxu1 %v18409_v48  ;;  %v14441_v56 = vpack.c.bf16 %v19609_v26, %v19608_v3  ;;  %v19619_v3 = vand.u32 4294901760, %v19618_v59  ;;  %v19621_v48 = vld [vmem:[#allocation13_spill] sm:$0xff]  ;;  %v19629_v59 = vand.u32 4294901760, %v19628_v11 }
 0x564   :  { %14428 = vmatpush3.bf16.msra.mxu1 %v19596_v4  ;;  %12869 = vmatprep.mubr.f32.mxu1 %v18232_v16  ;;  %v19607_v16 = vld [vmem:[#allocation16_spill] sm:$0xff]  ;;  %v14453_v35 = vpack.c.bf16 %v19625_v21, %v19623_v24 }
 0x565   :  { %14430 = vmatprep.subr.bf16.mxu1 %v14429_v41  ;;  %v14449_v26 = vpack.c.bf16 %v19619_v3, %v19617_v38  ;;  %v19630_v38 = vld [vmem:[#allocation38_spill] sm:$0xff] }
 0x566   :  { %v19631_v3 = vand.u32 4294901760, %v19630_v38 }
 0x567   :  { %12870 = vmatmul.mubr.f32.vlgmr.msra.gmra.mrb[32].mxu1 %v18217_v33  ;;  %v19610_v33 = vld [vmem:[#allocation39_spill] sm:$0xff] }
 0x568   :  { %14432 = vmatpush3.bf16.msra.mxu1 %v14429_v41  ;;  %12872 = vmatprep.mubr.f32.mxu1 %v19603_v42  ;;  %v19611_v41 = vld [vmem:[#allocation53_spill] sm:$0xff]  ;;  %v14457_v63 = vpack.c.bf16 %v19631_v3, %v19629_v59 }
 0x569   :  { %14434 = vmatprep.subr.bf16.mxu1 %v14433_v20 }
 0x56b   :  { %12873 = vmatmul.mubr.f32.gmra.mrb[34].mxu1 %v19606_v8 }
 0x56c   :  { %14436 = vmatpush3.bf16.msra.mxu1 %v14433_v20  ;;  %12875 = vmatprep.mubr.f32.mxu1 %v19607_v16  ;;  %v19614_v20 = vld [vmem:[#allocation51_spill] sm:$0xff] }
 0x56d   :  { %14438 = vmatprep.subr.bf16.mxu1 %v14437_v6 }
 0x56f   :  { %12876 = vmatmul.mubr.f32.gmra.mrb[36].mxu1 %v19610_v33 }
 0x570   :  { %14440 = vmatpush3.bf16.msra.mxu1 %v14437_v6  ;;  %12878 = vmatprep.mubr.f32.mxu1 %v19611_v41  ;;  %v19620_v6 = vld [vmem:[#allocation23_spill] sm:$0xff] }
 0x571   :  { %14442 = vmatprep.subr.bf16.mxu1 %v14441_v56 }
 0x573   :  { %12879 = vmatmul.mubr.f32.gmra.mrb[38].mxu1 %v19614_v20 }
 0x574   :  { %14444 = vmatpush3.bf16.msra.mxu1 %v14441_v56  ;;  %12881 = vmatprep.mubr.f32.mxu1 %v19615_v58  ;;  %v19626_v56 = vld [vmem:[#allocation36_spill] sm:$0xff] }
 0x575   :  { %14446 = vmatprep.subr.bf16.mxu1 %v14445_v60 }
 0x577   :  { %12882 = vmatmul.mubr.f32.gmra.mrb[40].mxu1 %v19620_v6 }
 0x578   :  { %14448 = vmatpush3.bf16.msra.mxu1 %v14445_v60  ;;  %12884 = vmatprep.mubr.f32.mxu1 %v19621_v48  ;;  %v19632_v60 = vld [vmem:[#allocation14_spill] sm:$0xff] }
 0x579   :  { %14450 = vmatprep.subr.bf16.mxu1 %v14449_v26 }
 0x57b   :  { %12885 = vmatmul.mubr.f32.gmra.mrb[42].mxu1 %v19626_v56 }
 0x57c   :  { %14452 = vmatpush3.bf16.msra.mxu1 %v14449_v26  ;;  %12887 = vmatprep.mubr.f32.mxu1 %v19627_v25 }
 0x57d   :  { %14454 = vmatprep.subr.bf16.mxu1 %v14453_v35 }
 0x57f   :  { %12888 = vmatmul.mubr.f32.gmra.mrb[44].mxu1 %v19632_v60 }
 0x580   :  { %14456 = vmatpush3.bf16.msra.mxu1 %v14453_v35  ;;  %12890 = vmatprep.mubr.f32.mxu1 %v18428_v18 }
 0x581   :  { %14458 = vmatprep.subr.bf16.mxu1 %v14457_v63 }
 0x583   :  { %12891 = vmatmul.mubr.f32.gmra.mrb[46].mxu1 %v18422_v10 }
 0x584   :  { %14460 = vmatpush3.bf16.msra.mxu1 %v14457_v63  ;;  %12925 = vmatprep.mubr.f32.mxu1 %v18196_v51 }
 0x585   :  { %14462 = vmatprep.subr.bf16.mxu1 %v17887_v12 }
 0x587   :  { %12926 = vmatmul.mubr.f32.vlgmr.msra.gmra.mrb[32].mxu1 %v18194_v55 }
 0x588   :  { %14464 = vmatpush3.bf16.msra.mxu1 %v17887_v12  ;;  %12928 = vmatprep.mubr.f32.mxu1 %v18228_v61  ;;  %v19633_v12 = vld [vmem:[#allocation40_spill] sm:$0xff] }
 0x589   :  { %14466 = vmatprep.subr.bf16.mxu1 %v17894_v0 }
 0x58b   :  { %12929 = vmatmul.mubr.f32.gmra.mrb[34].mxu1 %v18219_v22 }
 0x58c   :  { %14468 = vmatpush3.bf16.msra.mxu1 %v17894_v0  ;;  %12931 = vmatprep.mubr.f32.mxu1 %v18266_v40  ;;  %v19634_v0 = vld [vmem:[#allocation46_spill] sm:$0xff] }
 0x58d   :  { %14470 = vmatprep.subr.bf16.mxu1 %v17913_v29 }
 0x58f   :  { %12932 = vmatmul.mubr.f32.gmra.mrb[36].mxu1 %v18260_v44 }
 0x590   :  { %14472 = vmatpush3.bf16.msra.mxu1 %v17913_v29  ;;  %12934 = vmatprep.mubr.f32.mxu1 %v18297_v7  ;;  %v19636_v29 = vld [vmem:[#allocation29_spill] sm:$0xff] }
 0x591   :  { %14474 = vmatprep.subr.bf16.mxu1 %v17931_v2 }
 0x593   :  { %12935 = vmatmul.mubr.f32.gmra.mrb[38].mxu1 %v18285_v23 }
 0x594   :  { %14476 = vmatpush3.bf16.msra.mxu1 %v17931_v2  ;;  %12937 = vmatprep.mubr.f32.mxu1 %v18326_v19  ;;  %v19635_v2 = vld [vmem:[#allocation42_spill] sm:$0xff] }
 0x595   :  { %14478 = vmatprep.subr.bf16.mxu1 %v17945_v27 }
 0x597   :  { %12938 = vmatmul.mubr.f32.gmra.mrb[40].mxu1 %v18319_v1 }
 0x598   :  { %14480 = vmatpush3.bf16.msra.mxu1 %v17945_v27  ;;  %12940 = vmatprep.mubr.f32.mxu1 %v18353_v57  ;;  %v19637_v27 = vld [vmem:[#allocation54_spill] sm:$0xff] }
 0x599   :  { %14482 = vmatprep.subr.bf16.mxu1 %v19593_v14 }
 0x59b   :  { %12941 = vmatmul.mubr.f32.gmra.mrb[42].mxu1 %v18344_v62 }
 0x59c   :  { %14484 = vmatpush3.bf16.msra.mxu1 %v19593_v14  ;;  %12943 = vmatprep.mubr.f32.mxu1 %v18377_v37 }
 0x59d   :  { %14486 = vmatprep.subr.bf16.mxu1 %v19595_v46 }
 0x59f   :  { %12944 = vmatmul.mubr.f32.gmra.mrb[44].mxu1 %v18370_v17 }
 0x5a0   :  { %14488 = vmatpush3.bf16.msra.mxu1 %v19595_v46  ;;  %12946 = vmatprep.mubr.f32.mxu1 %v18403_v53  ;;  %v14625_v46 = vpack.c.bf16 %v19606_v8, %v19603_v42 }
 0x5a1   :  { %14490 = vmatprep.subr.bf16.mxu1 %v19596_v4 }
 0x5a3   :  { %12947 = vmatmul.mubr.f32.gmra.mrb[46].mxu1 %v18394_v31 }
 0x5a4   :  { %14492 = vmatpush3.bf16.msra.mxu1 %v19596_v4  ;;  %12981 = vmatprep.mubr.f32.mxu1 %v18196_v51 }
 0x5a5   :  { %14494 = vmatprep.subr.bf16.mxu1 %v19633_v12 }
 0x5a7   :  { %12982 = vmatmul.mubr.f32.vlgmr.msra.gmra.mrb[32].mxu1 %v18194_v55 }
 0x5a8   :  { %12984 = vmatprep.mubr.f32.mxu1 %v18228_v61 }
 0x5ab   :  { %12985 = vmatmul.mubr.f32.gmra.mrb[34].mxu1 %v18219_v22 }
 0x5ac   :  { %12987 = vmatprep.mubr.f32.mxu1 %v18266_v40 }
 0x5ad   :  { %14496 = vmatpush3.bf16.xpose.msra.mxu1 %v19633_v12 }
 0x5ae   :  { %14498 = vmatprep.subr.bf16.mxu1 %v19634_v0 }
 0x5af   :  { %12988 = vmatmul.mubr.f32.gmra.mrb[36].mxu1 %v18260_v44 }
 0x5b0   :  { %12990 = vmatprep.mubr.f32.mxu1 %v18297_v7 }
 0x5b3   :  { %12991 = vmatmul.mubr.f32.gmra.mrb[38].mxu1 %v18285_v23 }
 0x5b4   :  { %12993 = vmatprep.mubr.f32.mxu1 %v18326_v19 }
 0x5b5   :  { %14500 = vmatpush3.bf16.xpose.msra.mxu1 %v19634_v0 }
 0x5b6   :  { %14502 = vmatprep.subr.bf16.mxu1 %v19635_v2 }
 0x5b7   :  { %12994 = vmatmul.mubr.f32.gmra.mrb[40].mxu1 %v18319_v1 }
 0x5b8   :  { %12996 = vmatprep.mubr.f32.mxu1 %v18353_v57 }
 0x5bb   :  { %12997 = vmatmul.mubr.f32.gmra.mrb[42].mxu1 %v18344_v62 }
 0x5bc   :  { %12999 = vmatprep.mubr.f32.mxu1 %v18377_v37 }
 0x5bd   :  { %14504 = vmatpush3.bf16.xpose.msra.mxu1 %v19635_v2 }
 0x5be   :  { %14506 = vmatprep.subr.bf16.mxu1 %v19636_v29 }
 0x5bf   :  { %13000 = vmatmul.mubr.f32.gmra.mrb[44].mxu1 %v18370_v17 }
 0x5c0   :  { %13002 = vmatprep.mubr.f32.mxu1 %v18403_v53 }
 0x5c3   :  { %13003 = vmatmul.mubr.f32.gmra.mrb[46].mxu1 %v18394_v31 }
 0x5c5   :  { %14508 = vmatpush3.bf16.xpose.msra.mxu1 %v19636_v29 }
 0x5c6   :  { %14510 = vmatprep.subr.bf16.mxu1 %v18401_v15 }
 0x5cd   :  { %14512 = vmatpush3.bf16.xpose.msra.mxu1 %v18401_v15 }
 0x5ce   :  { %14514 = vmatprep.subr.bf16.mxu1 %v18439_v49 }
 0x5d5   :  { %14516 = vmatpush3.bf16.xpose.msra.mxu1 %v18439_v49 }
 0x5d6   :  { %14518 = vmatprep.subr.bf16.mxu1 %v18455_v28 }
 0x5dd   :  { %14520 = vmatpush3.bf16.xpose.msra.mxu1 %v18455_v28 }
 0x5de   :  { %14522 = vmatprep.subr.bf16.mxu1 %v18470_v39 }
 0x5e5   :  { %14524 = vmatpush3.bf16.xpose.msra.mxu1 %v18470_v39 }
 0x5e6   :  { %14526 = vmatprep.subr.bf16.mxu1 %v19637_v27 }
 0x67a   :  { %v12983_v7 = vpop.f32.mrb[32].mxu1 }
 0x67b   :  { %v18643_v40 = vand.u32 4294901760, %v12983_v7  ;;  %v7999_v55 = vpop.f32.mrb[33].mxu1 }
 0x67c   :  { %v18645_v51 = vand.u32 4294901760, %v7999_v55 }
 0x67d   :  { %v18648_v44 = vsub.f32 %v12983_v7, %v18643_v40 }
 0x67e   :  { %v18651_v22 = vsub.f32 %v7999_v55, %v18645_v51  ;;  %v12986_v61 = vpop.f32.mrb[34].mxu1 }
 0x67f   :  { %v8186_v1 = vand.u32 4294901760, %v18648_v44  ;;  %v18654_v37 = vand.u32 4294901760, %v12986_v61  ;;  %v8011_v23 = vpop.f32.mrb[35].mxu1 }
 0x680   :  { %v18656_v63 = vand.u32 4294901760, %v8011_v23  ;;  %v8176_v19 = vand.u32 4294901760, %v18651_v22 }
 0x681   :  { %v8187_v62 = vsub.f32 %v18648_v44, %v8186_v1  ;;  %v18661_v57 = vsub.f32 %v12986_v61, %v18654_v37 }
 0x682   :  { %v18664_v17 = vsub.f32 %v8011_v23, %v18656_v63  ;;  %v12989_v31 = vpop.f32.mrb[36].mxu1  ;;  %13205 = vmatprep.mubr.f32.mxu0 %v8176_v19  ;;  %v8177_v53 = vsub.f32 %v18651_v22, %v8176_v19  ;;  %v19640_v23 = vld [vmem:[#allocation18_spill] sm:$0xff] }
 0x683   :  { %v18667_v35 = vand.u32 4294901760, %v12989_v31  ;;  %v8023_v14 = vpop.f32.mrb[37].mxu1  ;;  %13206 = vmatmul.mubr.f32.vlgmr.msra.gmra.mrb[48].mxu0 %v8186_v1  ;;  %v8206_v4 = vand.u32 4294901760, %v18661_v57  ;;  %v8188_v52 = vand.u32 4294901760, %v8187_v62 }
 0x684   :  { %v18672_v26 = vand.u32 4294901760, %v8023_v14  ;;  %14624 = vmatpush3.bf16.xpose.msra.mxu0 %v18483_v43  ;;  %v8178_v13 = vand.u32 4294901760, %v8177_v53  ;;  %v8196_v24 = vand.u32 4294901760, %v18664_v17 }
 0x685   :  { %v18677_v21 = vsub.f32 %v12989_v31, %v18667_v35  ;;  %14626 = vmatprep.subr.bf16.mxu0 %v14625_v46  ;;  %v8207_v11 = vsub.f32 %v18661_v57, %v8206_v4 }
 0x686   :  { %v18681_v59 = vsub.f32 %v8023_v14, %v18672_v26  ;;  %v12992_v42 = vpop.f32.mrb[38].mxu1  ;;  %13037 = vmatprep.mubr.f32.mxu1 %v8178_v13  ;;  %13208 = vmatprep.mubr.f32.mxu0 %v8196_v24  ;;  %v8197_v8 = vsub.f32 %v18664_v17, %v8196_v24  ;;  %v14629_v13 = vpack.c.bf16 %v19610_v33, %v19607_v16 }
 0x687   :  { %19638 = vst [vmem:[#allocation17_spill] sm:$0xff] %v18677_v21  ;;  %v18684_v38 = vand.u32 4294901760, %v12992_v42  ;;  %v8035_v43 = vpop.f32.mrb[39].mxu1  ;;  %13038 = vmatmul.mubr.f32.vlgmr.msra.gmra.mrb[48].mxu1 %v8188_v52  ;;  %13209 = vmatmul.mubr.f32.gmra.mrb[50].mxu0 %v8206_v4  ;;  %v8226_v3 = vand.u32 4294901760, %v18677_v21  ;;  %v8208_v19 = vand.u32 4294901760, %v8207_v11 }
 0x688   :  { %v18687_v7 = vand.u32 4294901760, %v8035_v43  ;;  %14528 = vmatpush3.bf16.xpose.msra.mxu1 %v19637_v27  ;;  %v8198_v55 = vand.u32 4294901760, %v8197_v8  ;;  %v8216_v61 = vand.u32 4294901760, %v18681_v59 }
 0x689   :  { %v18692_v1 = vsub.f32 %v12992_v42, %v18684_v38  ;;  %14530 = vmatprep.subr.bf16.mxu1 %v19640_v23  ;;  %v8227_v62 = vsub.f32 %v18677_v21, %v8226_v3 }
 0x68a   :  { %v18697_v31 = vsub.f32 %v8035_v43, %v18687_v7  ;;  %v12995_v53 = vpop.f32.mrb[40].mxu1  ;;  %13040 = vmatprep.mubr.f32.mxu1 %v8198_v55  ;;  %13211 = vmatprep.mubr.f32.mxu0 %v8216_v61  ;;  %v8217_v14 = vsub.f32 %v18681_v59, %v8216_v61 }
 0x68b   :  { %19639 = vst [vmem:[#allocation34_spill] sm:$0xff] %v18692_v1  ;;  %v18700_v27 = vand.u32 4294901760, %v12995_v53  ;;  %v8047_v4 = vpop.f32.mrb[41].mxu1  ;;  %13041 = vmatmul.mubr.f32.gmra.mrb[50].mxu1 %v8208_v19  ;;  %13212 = vmatmul.mubr.f32.gmra.mrb[52].mxu0 %v8226_v3  ;;  %v8246_v24 = vand.u32 4294901760, %v18692_v1  ;;  %v8228_v43 = vand.u32 4294901760, %v8227_v62 }
 0x68c   :  { %19641 = vst [vmem:[#allocation28_spill] sm:$0xff] %v18697_v31  ;;  %v18705_v52 = vand.u32 4294901760, %v8047_v4  ;;  %14628 = vmatpush3.bf16.xpose.msra.mxu0 %v14625_v46  ;;  %v8218_v11 = vand.u32 4294901760, %v8217_v14  ;;  %v8236_v42 = vand.u32 4294901760, %v18697_v31 }
 0x68d   :  { %v18709_v8 = vsub.f32 %v12995_v53, %v18700_v27  ;;  %14630 = vmatprep.subr.bf16.mxu0 %v14629_v13  ;;  %v8247_v55 = vsub.f32 %v18692_v1, %v8246_v24 }
 0x68e   :  { %v18713_v3 = vsub.f32 %v8047_v4, %v18705_v52  ;;  %v12998_v61 = vpop.f32.mrb[42].mxu1  ;;  %13043 = vmatprep.mubr.f32.mxu1 %v8218_v11  ;;  %13214 = vmatprep.mubr.f32.mxu0 %v8236_v42  ;;  %v8237_v16 = vsub.f32 %v18697_v31, %v8236_v42  ;;  %v19645_v11 = vld [vmem:[#allocation56_spill] sm:$0xff] }
 0x68f   :  { %19642 = vst [vmem:[#allocation33_spill] sm:$0xff] %v18709_v8  ;;  %v18716_v33 = vand.u32 4294901760, %v12998_v61  ;;  %v8059_v46 = vpop.f32.mrb[43].mxu1  ;;  %13044 = vmatmul.mubr.f32.gmra.mrb[52].mxu1 %v8228_v43  ;;  %13215 = vmatmul.mubr.f32.gmra.mrb[54].mxu0 %v8246_v24  ;;  %v8266_v19 = vand.u32 4294901760, %v18709_v8  ;;  %v8248_v42 = vand.u32 4294901760, %v8247_v55 }
 0x690   :  { %19643 = vst [vmem:[#allocation47_spill] sm:$0xff] %v18713_v3  ;;  %v18719_v53 = vand.u32 4294901760, %v8059_v46  ;;  %14532 = vmatpush3.bf16.xpose.msra.mxu1 %v19640_v23  ;;  %v8238_v62 = vand.u32 4294901760, %v8237_v16  ;;  %v8256_v14 = vand.u32 4294901760, %v18713_v3 }
 0x691   :  { %v18724_v4 = vsub.f32 %v12998_v61, %v18716_v33  ;;  %14534 = vmatprep.subr.bf16.mxu1 %v19645_v11  ;;  %v8267_v1 = vsub.f32 %v18709_v8, %v8266_v19  ;;  %v14633_v61 = vpack.c.bf16 %v19614_v20, %v19611_v41 }
 0x692   :  { %v18729_v43 = vsub.f32 %v8059_v46, %v18719_v53  ;;  %v13001_v24 = vpop.f32.mrb[44].mxu1  ;;  %13046 = vmatprep.mubr.f32.mxu1 %v8238_v62  ;;  %13217 = vmatprep.mubr.f32.mxu0 %v8256_v14  ;;  %v8257_v31 = vsub.f32 %v18713_v3, %v8256_v14 }
 0x693   :  { %19644 = vst [vmem:[#allocation43_spill] sm:$0xff] %v18724_v4  ;;  %v18732_v23 = vand.u32 4294901760, %v13001_v24  ;;  %v8071_v16 = vpop.f32.mrb[45].mxu1  ;;  %13047 = vmatmul.mubr.f32.gmra.mrb[54].mxu1 %v8248_v42  ;;  %13218 = vmatmul.mubr.f32.gmra.mrb[56].mxu0 %v8266_v19  ;;  %v8286_v55 = vand.u32 4294901760, %v18724_v4  ;;  %v8268_v14 = vand.u32 4294901760, %v8267_v1 }
 0x694   :  { %19646 = vst [vmem:[#allocation44_spill] sm:$0xff] %v18729_v43  ;;  %v18737_v21 = vand.u32 4294901760, %v8071_v16  ;;  %14632 = vmatpush3.bf16.xpose.msra.mxu0 %v14629_v13  ;;  %v8258_v46 = vand.u32 4294901760, %v8257_v31  ;;  %v8276_v8 = vand.u32 4294901760, %v18729_v43 }
 0x695   :  { %v18741_v62 = vsub.f32 %v13001_v24, %v18732_v23  ;;  %14634 = vmatprep.subr.bf16.mxu0 %v14633_v61  ;;  %v8287_v3 = vsub.f32 %v18724_v4, %v8286_v55 }
 0x696   :  { %v18745_v19 = vsub.f32 %v8071_v16, %v18737_v21  ;;  %v13004_v42 = vpop.f32.mrb[46].mxu1  ;;  %13049 = vmatprep.mubr.f32.mxu1 %v8258_v46  ;;  %13220 = vmatprep.mubr.f32.mxu0 %v8276_v8  ;;  %v8277_v41 = vsub.f32 %v18729_v43, %v8276_v8  ;;  %v19648_v46 = vld [vmem:[#allocation20_spill] sm:$0xff] }
 0x697   :  { %19647 = vst [vmem:[#allocation57_spill] sm:$0xff] %v18741_v62  ;;  %v18748_v20 = vand.u32 4294901760, %v13004_v42  ;;  %v8083_v31 = vpop.f32.mrb[47].mxu1  ;;  %13050 = vmatmul.mubr.f32.gmra.mrb[56].mxu1 %v8268_v14  ;;  %13221 = vmatmul.mubr.f32.gmra.mrb[58].mxu0 %v8286_v55  ;;  %v8306_v13 = vand.u32 4294901760, %v18741_v62  ;;  %v8288_v8 = vand.u32 4294901760, %v8287_v3 }
 0x698   :  { %v18751_v24 = vand.u32 4294901760, %v8083_v31  ;;  %14536 = vmatpush3.bf16.xpose.msra.mxu1 %v19645_v11  ;;  %v8278_v1 = vand.u32 4294901760, %v8277_v41  ;;  %v8296_v16 = vand.u32 4294901760, %v18745_v19  ;;  %v14637_v11 = vpack.c.bf16 %v19620_v6, %v19615_v58  ;;  %v19649_v6 = vld [vmem:[#allocation24_spill] sm:$0xff] }
 0x699   :  { %v18756_v4 = vsub.f32 %v13004_v42, %v18748_v20  ;;  %14538 = vmatprep.subr.bf16.mxu1 %v19648_v46  ;;  %v8307_v43 = vsub.f32 %v18741_v62, %v8306_v13 }
 0x69a   :  { %v18761_v14 = vsub.f32 %v8083_v31, %v18751_v24  ;;  %13052 = vmatprep.mubr.f32.mxu1 %v8278_v1  ;;  %13223 = vmatprep.mubr.f32.mxu0 %v8296_v16  ;;  %v8297_v55 = vsub.f32 %v18745_v19, %v8296_v16 }
 0x69b   :  { %13053 = vmatmul.mubr.f32.gmra.mrb[58].mxu1 %v8288_v8  ;;  %13224 = vmatmul.mubr.f32.gmra.mrb[60].mxu0 %v8306_v13  ;;  %v8326_v42 = vand.u32 4294901760, %v18756_v4  ;;  %v8308_v62 = vand.u32 4294901760, %v8307_v43  ;;  %v14641_v43 = vpack.c.bf16 %v19626_v56, %v19621_v48  ;;  %v14649_v48 = vpack.c.bf16 %v18422_v10, %v18428_v18  ;;  %v19654_v18 = vld [vmem:[#allocation26_spill] sm:$0xff]  ;;  %v19655_v10 = vld [vmem:[#allocation27_spill] sm:$0xff] }
 0x69c   :  { %14636 = vmatpush3.bf16.xpose.msra.mxu0 %v14633_v61  ;;  %v8298_v41 = vand.u32 4294901760, %v8297_v55  ;;  %v8316_v3 = vand.u32 4294901760, %v18761_v14 }
 0x69d   :  { %14638 = vmatprep.subr.bf16.mxu0 %v14637_v11  ;;  %v8327_v31 = vsub.f32 %v18756_v4, %v8326_v42 }
 0x69e   :  { %13055 = vmatprep.mubr.f32.mxu1 %v8298_v41  ;;  %13226 = vmatprep.mubr.f32.mxu0 %v8316_v3  ;;  %v8317_v1 = vsub.f32 %v18761_v14, %v8316_v3 }
 0x69f   :  { %13056 = vmatmul.mubr.f32.gmra.mrb[60].mxu1 %v8308_v62  ;;  %13227 = vmatmul.mubr.f32.gmra.mrb[62].mxu0 %v8326_v42  ;;  %v8328_v61 = vand.u32 4294901760, %v8327_v31  ;;  %v14645_v62 = vpack.c.bf16 %v19632_v60, %v19627_v25  ;;  %v14557_v25 = vpack.c.bf16 %v18205_v54, %v18209_v50  ;;  %v14565_v54 = vpack.c.bf16 %v18273_v30, %v18279_v45  ;;  %v19650_v50 = vld [vmem:[#allocation45_spill] sm:$0xff] }
 0x6a0   :  { %14540 = vmatpush3.bf16.xpose.msra.mxu1 %v19648_v46  ;;  %13261 = vmatprep.mubr.f32.mxu0 %v18645_v51  ;;  %v8318_v58 = vand.u32 4294901760, %v8317_v1  ;;  %v14569_v30 = vpack.c.bf16 %v19650_v50, %v18314_v47  ;;  %v19653_v47 = vld [vmem:[#allocation37_spill] sm:$0xff] }
 0x6a1   :  { %14542 = vmatprep.subr.bf16.mxu1 %v19649_v6  ;;  %v19658_v60 = vld [vmem:[#allocation25_spill] sm:$0xff] }
 0x6a2   :  { %13058 = vmatprep.mubr.f32.mxu1 %v8318_v58 }
 0x6a3   :  { %13059 = vmatmul.mubr.f32.gmra.mrb[62].mxu1 %v8328_v61 }
 0x6a4   :  { %14640 = vmatpush3.bf16.xpose.msra.mxu0 %v14637_v11  ;;  %13093 = vmatprep.mubr.f32.mxu1 %v18645_v51 }
 0x6a5   :  { %14642 = vmatprep.subr.bf16.mxu0 %v14641_v43 }
 0x6a8   :  { %14544 = vmatpush3.bf16.xpose.msra.mxu1 %v19649_v6 }
 0x6a9   :  { %14546 = vmatprep.subr.bf16.mxu1 %v18424_v34 }
 0x6ac   :  { %14644 = vmatpush3.bf16.xpose.msra.mxu0 %v14641_v43 }
 0x6ad   :  { %14646 = vmatprep.subr.bf16.mxu0 %v14645_v62 }
 0x6b0   :  { %14548 = vmatpush3.bf16.xpose.msra.mxu1 %v18424_v34  ;;  %v14577_v34 = vpack.c.bf16 %v19654_v18, %v19653_v47 }
 0x6b1   :  { %14550 = vmatprep.subr.bf16.mxu1 %v18435_v9 }
 0x6b4   :  { %14648 = vmatpush3.bf16.xpose.msra.mxu0 %v14645_v62 }
 0x6b5   :  { %14650 = vmatprep.subr.bf16.mxu0 %v14649_v48 }
 0x6b8   :  { %14552 = vmatpush3.bf16.xpose.msra.mxu1 %v18435_v9  ;;  %v14561_v9 = vpack.c.bf16 %v18237_v5, %v18249_v36  ;;  %v19651_v5 = vld [vmem:[#allocation12_spill] sm:$0xff]  ;;  %v19652_v36 = vld [vmem:[#allocation55_spill] sm:$0xff] }
 0x6b9   :  { %14554 = vmatprep.subr.bf16.mxu1 %v18445_v32  ;;  %v14573_v45 = vpack.c.bf16 %v19652_v36, %v19651_v5 }
 0x6bc   :  { %14652 = vmatpush3.bf16.xpose.msra.mxu0 %v14649_v48 }
 0x6bd   :  { %14654 = vmatprep.subr.bf16.mxu0 %v19633_v12 }
 0x6c0   :  { %14556 = vmatpush3.bf16.xpose.msra.mxu1 %v18445_v32  ;;  %v19656_v32 = vld [vmem:[#allocation19_spill] sm:$0xff] }
 0x6c1   :  { %14558 = vmatprep.subr.bf16.mxu1 %v14557_v25  ;;  %v14581_v56 = vpack.c.bf16 %v19656_v32, %v19655_v10 }
 0x6c3   :  { %13262 = vmatmul.mubr.f32.vlgmr.msra.gmra.mrb[48].mxu0 %v18643_v40 }
 0x6c4   :  { %13264 = vmatprep.mubr.f32.mxu0 %v18656_v63  ;;  %14656 = vmatpush3.bf16.xpose.msra.mxu0 %v19633_v12 }
 0x6c5   :  { %14658 = vmatprep.subr.bf16.mxu0 %v19634_v0 }
 0x6c7   :  { %13094 = vmatmul.mubr.f32.vlgmr.msra.gmra.mrb[48].mxu1 %v18643_v40  ;;  %13265 = vmatmul.mubr.f32.gmra.mrb[50].mxu0 %v18654_v37 }
 0x6c8   :  { %13096 = vmatprep.mubr.f32.mxu1 %v18656_v63  ;;  %14560 = vmatpush3.bf16.xpose.msra.mxu1 %v14557_v25 }
 0x6c9   :  { %13267 = vmatprep.mubr.f32.mxu0 %v18672_v26  ;;  %14562 = vmatprep.subr.bf16.mxu1 %v14561_v9 }
 0x6cb   :  { %13097 = vmatmul.mubr.f32.gmra.mrb[50].mxu1 %v18654_v37  ;;  %13268 = vmatmul.mubr.f32.gmra.mrb[52].mxu0 %v18667_v35 }
 0x6cc   :  { %13099 = vmatprep.mubr.f32.mxu1 %v18672_v26  ;;  %13270 = vmatprep.mubr.f32.mxu0 %v18687_v7 }
 0x6cd   :  { %14660 = vmatpush3.bf16.xpose.msra.mxu0 %v19634_v0  ;;  %v19662_v0 = vld [vmem:[#allocation47_spill] sm:$0xff] }
 0x6ce   :  { %14662 = vmatprep.subr.bf16.mxu0 %v19635_v2 }
 0x6cf   :  { %13100 = vmatmul.mubr.f32.gmra.mrb[52].mxu1 %v18667_v35  ;;  %13271 = vmatmul.mubr.f32.gmra.mrb[54].mxu0 %v18684_v38 }
 0x6d0   :  { %13102 = vmatprep.mubr.f32.mxu1 %v18687_v7  ;;  %14564 = vmatpush3.bf16.xpose.msra.mxu1 %v14561_v9 }
 0x6d1   :  { %13273 = vmatprep.mubr.f32.mxu0 %v18705_v52  ;;  %14566 = vmatprep.subr.bf16.mxu1 %v14565_v54 }
 0x6d3   :  { %13103 = vmatmul.mubr.f32.gmra.mrb[54].mxu1 %v18684_v38  ;;  %13274 = vmatmul.mubr.f32.gmra.mrb[56].mxu0 %v18700_v27 }
 0x6d4   :  { %13105 = vmatprep.mubr.f32.mxu1 %v18705_v52  ;;  %13276 = vmatprep.mubr.f32.mxu0 %v18719_v53 }
 0x6d5   :  { %14664 = vmatpush3.bf16.xpose.msra.mxu0 %v19635_v2  ;;  %v19663_v2 = vld [vmem:[#allocation33_spill] sm:$0xff] }
 0x6d6   :  { %14666 = vmatprep.subr.bf16.mxu0 %v19636_v29 }
 0x6d7   :  { %13106 = vmatmul.mubr.f32.gmra.mrb[56].mxu1 %v18700_v27  ;;  %13277 = vmatmul.mubr.f32.gmra.mrb[58].mxu0 %v18716_v33 }
 0x6d8   :  { %13108 = vmatprep.mubr.f32.mxu1 %v18719_v53  ;;  %14568 = vmatpush3.bf16.xpose.msra.mxu1 %v14565_v54 }
 0x6d9   :  { %13279 = vmatprep.mubr.f32.mxu0 %v18737_v21  ;;  %14570 = vmatprep.subr.bf16.mxu1 %v14569_v30 }
 0x6db   :  { %13109 = vmatmul.mubr.f32.gmra.mrb[58].mxu1 %v18716_v33  ;;  %13280 = vmatmul.mubr.f32.gmra.mrb[60].mxu0 %v18732_v23 }
 0x6dc   :  { %13111 = vmatprep.mubr.f32.mxu1 %v18737_v21  ;;  %13282 = vmatprep.mubr.f32.mxu0 %v18751_v24 }
 0x6dd   :  { %14668 = vmatpush3.bf16.xpose.msra.mxu0 %v19636_v29  ;;  %v19664_v29 = vld [vmem:[#allocation44_spill] sm:$0xff] }
 0x6de   :  { %14670 = vmatprep.subr.bf16.mxu0 %v18401_v15 }
 0x6df   :  { %13112 = vmatmul.mubr.f32.gmra.mrb[60].mxu1 %v18732_v23  ;;  %13283 = vmatmul.mubr.f32.gmra.mrb[62].mxu0 %v18748_v20 }
 0x6e0   :  { %13114 = vmatprep.mubr.f32.mxu1 %v18751_v24  ;;  %14572 = vmatpush3.bf16.xpose.msra.mxu1 %v14569_v30 }
 0x6e1   :  { %13317 = vmatprep.mubr.f32.mxu0 %v18645_v51  ;;  %14574 = vmatprep.subr.bf16.mxu1 %v14573_v45  ;;  %v19666_v51 = vld [vmem:[#allocation57_spill] sm:$0xff] }
 0x6e3   :  { %13115 = vmatmul.mubr.f32.gmra.mrb[62].mxu1 %v18748_v20 }
 0x6e4   :  { %13149 = vmatprep.mubr.f32.mxu1 %v18651_v22 }
 0x6e5   :  { %14672 = vmatpush3.bf16.xpose.msra.mxu0 %v18401_v15  ;;  %v19657_v15 = vld [vmem:[#allocation15_spill] sm:$0xff] }
 0x6e6   :  { %14674 = vmatprep.subr.bf16.mxu0 %v18439_v49  ;;  %v14585_v12 = vpack.c.bf16 %v19658_v60, %v19657_v15 }
 0x6e8   :  { %14576 = vmatpush3.bf16.xpose.msra.mxu1 %v14573_v45 }
 0x6e9   :  { %14578 = vmatprep.subr.bf16.mxu1 %v14577_v34 }
 0x6ed   :  { %14676 = vmatpush3.bf16.xpose.msra.mxu0 %v18439_v49  ;;  %v19659_v49 = vld [vmem:[#allocation17_spill] sm:$0xff] }
 0x6ee   :  { %14678 = vmatprep.subr.bf16.mxu0 %v18455_v28 }
 0x6f0   :  { %14580 = vmatpush3.bf16.xpose.msra.mxu1 %v14577_v34 }
 0x6f1   :  { %14582 = vmatprep.subr.bf16.mxu1 %v14581_v56 }
 0x6f5   :  { %14680 = vmatpush3.bf16.xpose.msra.mxu0 %v18455_v28  ;;  %v19660_v28 = vld [vmem:[#allocation28_spill] sm:$0xff] }
 0x6f6   :  { %14682 = vmatprep.subr.bf16.mxu0 %v18470_v39 }
 0x6f8   :  { %14584 = vmatpush3.bf16.xpose.msra.mxu1 %v14581_v56 }
 0x6f9   :  { %14586 = vmatprep.subr.bf16.mxu1 %v14585_v12 }
 0x6fd   :  { %14684 = vmatpush3.bf16.xpose.msra.mxu0 %v18470_v39  ;;  %v19661_v39 = vld [vmem:[#allocation34_spill] sm:$0xff] }
 0x700   :  { %14588 = vmatpush3.bf16.xpose.msra.mxu1 %v14585_v12 }
 0x704   :  { %13318 = vmatmul.mubr.f32.vlgmr.msra.gmra.mrb[48].mxu0 %v18643_v40  ;;  %v19665_v40 = vld [vmem:[#allocation43_spill] sm:$0xff] }
 0x705   :  { %13320 = vmatprep.mubr.f32.mxu0 %v18656_v63 }
 0x707   :  { %13150 = vmatmul.mubr.f32.vlgmr.msra.gmra.mrb[48].mxu1 %v18648_v44 }
 0x708   :  { %13321 = vmatmul.mubr.f32.gmra.mrb[50].mxu0 %v18654_v37  ;;  %13152 = vmatprep.mubr.f32.mxu1 %v18664_v17 }
 0x709   :  { %13323 = vmatprep.mubr.f32.mxu0 %v18672_v26 }
 0x70b   :  { %13153 = vmatmul.mubr.f32.gmra.mrb[50].mxu1 %v18661_v57 }
 0x70c   :  { %13324 = vmatmul.mubr.f32.gmra.mrb[52].mxu0 %v18667_v35  ;;  %13155 = vmatprep.mubr.f32.mxu1 %v18681_v59 }
 0x70d   :  { %13326 = vmatprep.mubr.f32.mxu0 %v18687_v7 }
 0x70f   :  { %13156 = vmatmul.mubr.f32.gmra.mrb[52].mxu1 %v19659_v49 }
 0x710   :  { %13327 = vmatmul.mubr.f32.gmra.mrb[54].mxu0 %v18684_v38  ;;  %13158 = vmatprep.mubr.f32.mxu1 %v19660_v28 }
 0x711   :  { %13329 = vmatprep.mubr.f32.mxu0 %v18705_v52 }
 0x713   :  { %13159 = vmatmul.mubr.f32.gmra.mrb[54].mxu1 %v19661_v39 }
 0x714   :  { %13330 = vmatmul.mubr.f32.gmra.mrb[56].mxu0 %v18700_v27  ;;  %13161 = vmatprep.mubr.f32.mxu1 %v19662_v0 }
 0x715   :  { %13332 = vmatprep.mubr.f32.mxu0 %v18719_v53 }
 0x717   :  { %13162 = vmatmul.mubr.f32.gmra.mrb[56].mxu1 %v19663_v2 }
 0x718   :  { %13333 = vmatmul.mubr.f32.gmra.mrb[58].mxu0 %v18716_v33  ;;  %13164 = vmatprep.mubr.f32.mxu1 %v19664_v29 }
 0x719   :  { %13335 = vmatprep.mubr.f32.mxu0 %v18737_v21 }
 0x71b   :  { %13165 = vmatmul.mubr.f32.gmra.mrb[58].mxu1 %v19665_v40 }
 0x71c   :  { %13336 = vmatmul.mubr.f32.gmra.mrb[60].mxu0 %v18732_v23  ;;  %13167 = vmatprep.mubr.f32.mxu1 %v18745_v19 }
 0x71d   :  { %13338 = vmatprep.mubr.f32.mxu0 %v18751_v24 }
 0x71f   :  { %13168 = vmatmul.mubr.f32.gmra.mrb[60].mxu1 %v19666_v51 }
 0x720   :  { %13339 = vmatmul.mubr.f32.gmra.mrb[62].mxu0 %v18748_v20  ;;  %13170 = vmatprep.mubr.f32.mxu1 %v18761_v14 }
 0x723   :  { %13171 = vmatmul.mubr.f32.gmra.mrb[62].mxu1 %v18756_v4 }
 0x7d7   :  { %v13319_v44 = vpop.f32.mrb[48].mxu0 }
 0x7d8   :  { %v9285_v22 = vpop.f32.mrb[49].mxu0 }
 0x7da   :  { %v13151_v37 = vpop.f32.mrb[48].mxu1 }
 0x7db   :  { %v14685_v63 = vadd.f32 %v13319_v44, %v13151_v37  ;;  %v13322_v57 = vpop.f32.mrb[50].mxu0  ;;  %v8675_v17 = vpop.f32.mrb[49].mxu1 }
 0x7dc   :  { %v14686_v35 = vadd.f32 %v9285_v22, %v8675_v17  ;;  %v9297_v26 = vpop.f32.mrb[51].mxu0 }
 0x7dd   :  { %9380 = vst [vmem:[#allocation8 + $0x8] sm:$0xff] %v14685_v63 }
 0x7de   :  { %9379 = vst [vmem:[#allocation8] sm:$0xff] %v14686_v35  ;;  %v13154_v21 = vpop.f32.mrb[50].mxu1 }
 0x7df   :  { %v14687_v59 = vadd.f32 %v13322_v57, %v13154_v21  ;;  %v13325_v38 = vpop.f32.mrb[52].mxu0  ;;  %v8689_v7 = vpop.f32.mrb[51].mxu1 }
 0x7e0   :  { %v14688_v27 = vadd.f32 %v9297_v26, %v8689_v7  ;;  %v9309_v52 = vpop.f32.mrb[53].mxu0 }
 0x7e1   :  { %9382 = vst [vmem:[#allocation8 + $0x18] sm:$0xff] %v14687_v59 }
 0x7e2   :  { %9381 = vst [vmem:[#allocation8 + $0x10] sm:$0xff] %v14688_v27  ;;  %v13157_v33 = vpop.f32.mrb[52].mxu1 }
 0x7e3   :  { %v14689_v53 = vadd.f32 %v13325_v38, %v13157_v33  ;;  %v13328_v4 = vpop.f32.mrb[54].mxu0  ;;  %v8703_v23 = vpop.f32.mrb[53].mxu1 }
 0x7e4   :  { %v14690_v19 = vadd.f32 %v9309_v52, %v8703_v23  ;;  %v9321_v20 = vpop.f32.mrb[55].mxu0 }
 0x7e5   :  { %9384 = vst [vmem:[#allocation8 + $0x28] sm:$0xff] %v14689_v53 }
 0x7e6   :  { %9383 = vst [vmem:[#allocation8 + $0x20] sm:$0xff] %v14690_v19  ;;  %v13160_v13 = vpop.f32.mrb[54].mxu1 }
 0x7e7   :  { %v14691_v24 = vadd.f32 %v13328_v4, %v13160_v13  ;;  %v13331_v16 = vpop.f32.mrb[56].mxu0  ;;  %v8717_v46 = vpop.f32.mrb[55].mxu1 }
 0x7e8   :  { %v14692_v8 = vadd.f32 %v9321_v20, %v8717_v46  ;;  %v9333_v14 = vpop.f32.mrb[57].mxu0 }
 0x7e9   :  { %9386 = vst [vmem:[#allocation8 + $0x38] sm:$0xff] %v14691_v24 }
 0x7ea   :  { %9385 = vst [vmem:[#allocation8 + $0x30] sm:$0xff] %v14692_v8  ;;  %v13163_v55 = vpop.f32.mrb[56].mxu1 }
 0x7eb   :  { %v14693_v11 = vadd.f32 %v13331_v16, %v13163_v55  ;;  %v13334_v42 = vpop.f32.mrb[58].mxu0  ;;  %v8731_v41 = vpop.f32.mrb[57].mxu1 }
 0x7ec   :  { %v14694_v3 = vadd.f32 %v9333_v14, %v8731_v41  ;;  %v9345_v31 = vpop.f32.mrb[59].mxu0 }
 0x7ed   :  { %9388 = vst [vmem:[#allocation8 + $0x48] sm:$0xff] %v14693_v11 }
 0x7ee   :  { %9387 = vst [vmem:[#allocation8 + $0x40] sm:$0xff] %v14694_v3  ;;  %v13166_v1 = vpop.f32.mrb[58].mxu1 }
 0x7ef   :  { %v14695_v58 = vadd.f32 %v13334_v42, %v13166_v1  ;;  %v13337_v6 = vpop.f32.mrb[60].mxu0  ;;  %v8745_v61 = vpop.f32.mrb[59].mxu1 }
 0x7f0   :  { %v14696_v43 = vadd.f32 %v9345_v31, %v8745_v61  ;;  %v9357_v62 = vpop.f32.mrb[61].mxu0 }
 0x7f1   :  { %9390 = vst [vmem:[#allocation8 + $0x58] sm:$0xff] %v14695_v58 }
 0x7f2   :  { %9389 = vst [vmem:[#allocation8 + $0x50] sm:$0xff] %v14696_v43  ;;  %v13169_v48 = vpop.f32.mrb[60].mxu1 }
 0x7f3   :  { %v14697_v25 = vadd.f32 %v13337_v6, %v13169_v48  ;;  %v13340_v9 = vpop.f32.mrb[62].mxu0  ;;  %v8759_v54 = vpop.f32.mrb[61].mxu1 }
 0x7f4   :  { %v14698_v50 = vadd.f32 %v9357_v62, %v8759_v54  ;;  %v9369_v30 = vpop.f32.mrb[63].mxu0 }
 0x7f5   :  { %9392 = vst [vmem:[#allocation8 + $0x68] sm:$0xff] %v14697_v25 }
 0x7f6   :  { %9391 = vst [vmem:[#allocation8 + $0x60] sm:$0xff] %v14698_v50  ;;  %v13172_v5 = vpop.f32.mrb[62].mxu1 }
 0x7f7   :  { %v14699_v36 = vadd.f32 %v13340_v9, %v13172_v5  ;;  %v8773_v45 = vpop.f32.mrb[63].mxu1 }
 0x7f8   :  { %v14700_v47 = vadd.f32 %v9369_v30, %v8773_v45 }
 0x7f9   :  { %9394 = vst [vmem:[#allocation8 + $0x78] sm:$0xff] %v14699_v36 }
 0x7fa   :  { %9393 = vst [vmem:[#allocation8 + $0x70] sm:$0xff] %v14700_v47 }
 0x7fb   :  { %15308 = shalt.err (!%p15305_p6)
}
 0x7fc   :  { %s15309_s10 = scalar_lea.hbm %s18898_s2, 2048 }
 0x7fd   :  { %p15310_p7 = scmp.ne.s32.totalorder %s18898_s2, %s15309_s10  ;;  %p15313_p8 = scmp.lt.u32.totalorder %s15309_s10, %s18898_s2 }
 0x7ff   :  { %p15315_p9 = pnand %p15313_p8, %p15310_p7 }
 0x801   :  { %15318 = shalt.err (!%p15315_p9)
}
 0x802   :  { %9406 = dma.vmem_to_hbm [thread:$0]  %s9401_s6, 2048, %s18898_s2, [#allocation5], %s15326_s19, %s15326_s19, %s15327_s20  }
 0x803   :  { %15323 = dma.done.wait [#allocation5], 2048  }
 0x804   :  { %15324 = vsyncadd [#allocation5], 4294965248 }
 0x805   :  { %9410 = vsyncpa [#allocation4], 1 }
 0x806   :  { %9411 = vsyncpa [#allocation7], 1 }
 0x807   :  { %9412 = vsyncpa [#allocation5], 1 }

</bundles_post_ra>
